<compile_context>
chip_gen: v6e
topology: v6e:2x2x1
jax: 0.10.0
libtpu: 0.0.40
codegen_flags: <defaults>
</compile_context>

<pallas_src>
import math

import numpy as np

import jax
import jax.numpy as jnp
from jax.experimental import pallas as pl
from jax.experimental.pallas import tpu as pltpu


_VMEM_TILE_BUDGET = 12 * 1024 * 1024   # conservative vs. v7x 32 MiB scoped / 64 MiB phys.


def _tile_bytes(TB, TH, H, W, D, out_bytes):
    """Approximate per-step VMEM working set (double buffers included)."""
    two_d = 2 * D
    out_blk = 2 * TB * TH * W * two_d * out_bytes     # output block, double-buffered
    arg_tmp = TB * TH * W * two_d * 4                 # f32 sin-argument temporaries
    ltri = 2 * TH * H * 2                             # bf16 lower-tri tile, 2 buffers
    mfull = 2 * TB * H * W * 2                        # bf16 mask (full-H view)
    mtile = 2 * TB * TH * W * 2                       # bf16 mask (H-tile view)
    utri = 2 * W * W * 2                              # bf16 upper-tri (constant index)
    coef = 8 * max(128, two_d) * 4                    # padded coefficient table
    return out_blk + arg_tmp + ltri + mfull + mtile + utri + coef


def _pick_tiles(B, H, W, D, out_bytes, budget=_VMEM_TILE_BUDGET):
    """Choose (TB, TH) = (batch tile, height tile).

    - TH: the largest sublane-aligned divisor of H (or H itself) whose
      working set fits the VMEM budget.
    - keep >= 2 parallel grid points when possible (v7x has 2 TensorCores).
    - TB: merge batch elements per step while the working set still fits and
      >= 2 grid points remain (amortizes per-step overhead on v5e/v6e).
    """
    th_cands = sorted(set([d for d in range(16, H, 16) if H % d == 0] + [H]))
    th_fit = [t for t in th_cands if _tile_bytes(1, t, H, W, D, out_bytes) <= budget]
    if not th_fit:
        th_fit = [th_cands[0]]                # best effort: smallest aligned tile
    TH = max(th_fit)
    if B * (H // TH) < 2:
        splitters = [t for t in th_fit if H // t >= 2]
        if splitters:
            TH = max(splitters)               # expose a second grid point
    n_h = H // TH

    TB = 1
    for tb in [d for d in range(2, B + 1) if B % d == 0]:
        if _tile_bytes(tb, TH, H, W, D, out_bytes) > budget:
            continue
        if (B // tb) * n_h < 2 and B * n_h >= 2:
            continue                          # would starve one v7x TensorCore
        TB = tb
    return TB, TH


def _make_kernel(TB, normalize, scale, out_dtype):
    def kernel(ltri_ref, utri_ref, coef_ref, mfull_ref, mtile_ref, out_ref):
        ltri = ltri_ref[...]                  # (TH, H)  bf16 lower-tri rows of this tile
        utri = utri_ref[...]                  # (W, W)   bf16 upper-tri
        coef = coef_ref[...]                  # (3, 2D)  f32 [1/dim_t | phase] table

        for t in range(TB):                   # TB is small and static
            m_full = mfull_ref[t]             # (H, W)   bf16 mask, full height
            m_tile = mtile_ref[t]             # (TH, W)  bf16 mask, this H tile

            # Inclusive cumsums as triangular matmuls on the MXU.
            # bf16 0/1 inputs + f32 accumulation are bit-exact.
            y_embed = jnp.dot(ltri, m_full,
                              preferred_element_type=jnp.float32)   # (TH, W)
            x_embed = jnp.dot(m_tile, utri,
                              preferred_element_type=jnp.float32)   # (TH, W)

            if normalize:
                # denominators = totals along H / W (== last cumsum entry)
                y_den = jnp.sum(m_full.astype(jnp.float32), axis=0, keepdims=True)
                x_den = jnp.sum(m_tile.astype(jnp.float32), axis=1, keepdims=True)
                y_embed = y_embed * (scale / (y_den + 1e-6))
                x_embed = x_embed * (scale / (x_den + 1e-6))

            # channels [0:D)  <- y_embed / dim_t   (coef[0] = [1/dim_t, 0...0])
            # channels [D:2D) <- x_embed / dim_t   (coef[1] = [0...0, 1/dim_t])
            # odd channels get a +pi/2 phase (coef[2]) so cos == sin(arg):
            # one EUP transcendental over the lane-dense (TH, W, 2D) slab.
            # (If the lane broadcast ever becomes the binding slot it could be
            #  folded into an MXU outer product against coef -- the MXU is idle
            #  after the cumsums -- but the kernel is store-bound today.)
            arg = (y_embed[:, :, None] * coef[0]
                   + x_embed[:, :, None] * coef[1]
                   + coef[2])                                        # (TH, W, 2D) f32
            out_ref[t] = jnp.sin(arg).astype(out_dtype)

    return kernel


def detr_sine_position_embedding(pixel_values, pixel_mask, embedding_dim=64,
                                 temperature=10000, normalize=False, scale=None,
                                 channels_last=True, out_dtype=jnp.bfloat16):
    """DETR sine position embedding.

    Fast path (default): (B, H, W, 2*embedding_dim) in bfloat16 -- lane-dense
    stores, no extra HBM pass.  For exact PyTorch parity pass
    channels_last=False (NCHW; the permute then runs on the narrow output)
    and/or out_dtype=jnp.float32.

    Note: if 2*embedding_dim < 128 the output stores become lane-masked
    (perf cliff, not a correctness issue).
    """
    if pixel_mask is None:
        raise ValueError("No pixel mask provided")
    if scale is not None and normalize is False:
        raise ValueError("normalize should be True if scale is passed")
    if scale is None:
        scale = 2 * math.pi
    del pixel_values  # only used for device/dtype in the PyTorch module

    B, H, W = pixel_mask.shape
    D = embedding_dim
    out_dtype = jnp.dtype(out_dtype)
    out_bytes = out_dtype.itemsize

    TB, TH = _pick_tiles(B, H, W, D, out_bytes)
    nb, n_h = B // TB, H // TH

    # --- compile-time constants (built once, DMA'd once) -------------------
    ltri = jnp.asarray(np.tril(np.ones((H, H), np.float32)), dtype=jnp.bfloat16)
    utri = jnp.asarray(np.triu(np.ones((W, W), np.float32)), dtype=jnp.bfloat16)

    k = np.arange(D, dtype=np.float64)
    dim_t = float(temperature) ** (2.0 * np.floor(k / 2.0) / float(D))
    inv_dim_t = (1.0 / dim_t).astype(np.float32)
    phase = ((np.arange(D) % 2).astype(np.float32)) * np.float32(np.pi / 2.0)

    coef = np.zeros((3, 2 * D), dtype=np.float32)
    coef[0, :D] = inv_dim_t                  # y half
    coef[1, D:] = inv_dim_t                  # x half
    coef[2, :D] = phase                      # sin/cos phase
    coef[2, D:] = phase
    coef = jnp.asarray(coef)

    mask_bf16 = pixel_mask.astype(jnp.bfloat16)   # 0/1 values: exact in bf16

    kernel = _make_kernel(TB, normalize, float(scale), out_dtype)

    # advisory cost estimate for XLA's scheduler
    flops = int(2 * B * H * W * (H + W) + 5 * B * H * W * 2 * D)
    transcendentals = int(B * H * W * 2 * D)
    bytes_accessed = int(B * H * W * 2 * D * out_bytes      # output stores
                         + 2 * 2 * B * H * W                # two bf16 mask views
                         + 2 * (H * H + W * W)              # triangular matrices
                         + 4 * 3 * 2 * D)                   # coefficient table

    ws = _tile_bytes(TB, TH, H, W, D, out_bytes)
    vmem_limit = int(min(64 << 20, max(32 << 20, ws + (8 << 20))))

    # NOTE: utri/coef use constant index maps so Pallas does not re-DMA them
    # across steps; their (small) second VMEM buffer is already counted in
    # the budget above.
    out_nhwc = pl.pallas_call(
        kernel,
        out_shape=jax.ShapeDtypeStruct((B, H, W, 2 * D), out_dtype),
        grid_spec=pltpu.PrefetchScalarGridSpec(
            num_scalar_prefetch=0,
            grid=(nb, n_h),
            in_specs=[
                pl.BlockSpec((TH, H), lambda b, h: (h, 0)),         # ltri rows of tile
                pl.BlockSpec((W, W), lambda b, h: (0, 0)),          # utri (constant)
                pl.BlockSpec((3, 2 * D), lambda b, h: (0, 0)),      # coef (constant)
                pl.BlockSpec((TB, H, W), lambda b, h: (b, 0, 0)),   # mask, full H (y cumsum)
                pl.BlockSpec((TB, TH, W), lambda b, h: (b, h, 0)),  # mask, H tile (x cumsum)
            ],
            out_specs=pl.BlockSpec((TB, TH, W, 2 * D),
                                   lambda b, h: (b, h, 0, 0)),
        ),
        compiler_params=pltpu.CompilerParams(
            dimension_semantics=("parallel", "parallel"),
            vmem_limit_bytes=vmem_limit),
        cost_estimate=pl.CostEstimate(flops=flops,
                                      transcendentals=transcendentals,
                                      bytes_accessed=bytes_accessed),
    )(ltri, utri, coef, mask_bf16, mask_bf16)

    if channels_last:
        return out_nhwc                      # (B, H, W, 2D): lane-dense, no extra HBM pass
    # NCHW (PyTorch layout). Extra XLA HBM pass, but on the narrow out_dtype
    # (bf16 by default) -> half the traffic of the old f32 permute.
    return jnp.transpose(out_nhwc, (0, 3, 1, 2))


def _reference_nhwc(pixel_mask, embedding_dim=64, temperature=10000,
                    normalize=False, scale=2 * math.pi):
    # pure-JAX reference mirroring the PyTorch forward (pre-permute, NHWC)
    mask = pixel_mask.astype(jnp.float32)
    y_embed = jnp.cumsum(mask, axis=1)
    x_embed = jnp.cumsum(mask, axis=2)
    if normalize:
        y_embed = y_embed / (y_embed[:, -1:, :] + 1e-6) * scale
        x_embed = x_embed / (x_embed[:, :, -1:] + 1e-6) * scale
    dim_t = jnp.arange(embedding_dim, dtype=jnp.float32)
    dim_t = temperature ** (2 * jnp.floor(dim_t / 2) / embedding_dim)
    pos_x = x_embed[:, :, :, None] / dim_t
    pos_y = y_embed[:, :, :, None] / dim_t
    pos_x = jnp.stack((jnp.sin(pos_x[..., 0::2]), jnp.cos(pos_x[..., 1::2])),
                      axis=4).reshape(*pos_x.shape[:3], -1)
    pos_y = jnp.stack((jnp.sin(pos_y[..., 0::2]), jnp.cos(pos_y[..., 1::2])),
                      axis=4).reshape(*pos_y.shape[:3], -1)
    return jnp.concatenate((pos_y, pos_x), axis=3)       # (B, H, W, 2D)


if __name__ == "__main__":
    key = jax.random.PRNGKey(0)
    B, C, H, W = 2, 3, 16, 16
    embedding_dim = 64

    # pixel_values is only used for device/dtype in the PyTorch module
    pixel_values = jax.random.normal(key, (B, C, H, W), dtype=jnp.float32)

    # deterministic "valid region" style mask (1 inside, 0 in padded border)
    hh = jnp.arange(H)[None, :, None]
    ww = jnp.arange(W)[None, None, :]
    valid_h = jnp.array([16, 12])[:, None, None]
    valid_w = jnp.array([16, 10])[:, None, None]
    pixel_mask = ((hh < valid_h) & (ww < valid_w)).astype(jnp.int32)   # (B, H, W)

    ref = _reference_nhwc(pixel_mask, embedding_dim, 10000, False)
    ref_norm = _reference_nhwc(pixel_mask, embedding_dim, 10000, True)

    # 1) fast path (default): channels-last, bf16 stores, no wrapper permute
    pos_fast = detr_sine_position_embedding(pixel_values, pixel_mask,
                                            embedding_dim=embedding_dim)
    pos_fast = jax.block_until_ready(pos_fast)
    assert pos_fast.shape == (B, H, W, 2 * embedding_dim)
    assert pos_fast.dtype == jnp.bfloat16
    assert jnp.allclose(pos_fast.astype(jnp.float32), ref, atol=1e-2, rtol=1e-2)

    # 2) exact PyTorch layout/dtype parity: NCHW, float32
    pos_nchw = detr_sine_position_embedding(pixel_values, pixel_mask,
                                            embedding_dim=embedding_dim,
                                            channels_last=False,
                                            out_dtype=jnp.float32)
    pos_nchw = jax.block_until_ready(pos_nchw)
    assert pos_nchw.shape == (B, 2 * embedding_dim, H, W)
    assert jnp.allclose(pos_nchw, jnp.transpose(ref, (0, 3, 1, 2)),
                        atol=1e-4, rtol=1e-4)

    # 3) normalize=True path (f32 parity)
    pos_norm = detr_sine_position_embedding(pixel_values, pixel_mask,
                                            embedding_dim=embedding_dim,
                                            normalize=True,
                                            channels_last=False,
                                            out_dtype=jnp.float32)
    pos_norm = jax.block_until_ready(pos_norm)
    assert jnp.allclose(pos_norm, jnp.transpose(ref_norm, (0, 3, 1, 2)),
                        atol=1e-4, rtol=1e-4)

    print("KERNEL_OK")
</pallas_src>

<mosaic_0001>
module attributes {stable_mosaic.version = 11 : i64} {
  func.func @kernel(%arg0: i32, %arg1: i32, %arg2: memref<16x16xbf16, #tpu.memory_space<vmem>>, %arg3: memref<16x16xbf16, #tpu.memory_space<vmem>>, %arg4: memref<3x128xf32, #tpu.memory_space<vmem>>, %arg5: memref<1x16x16xbf16, #tpu.memory_space<vmem>>, %arg6: memref<1x16x16xbf16, #tpu.memory_space<vmem>>, %arg7: memref<1x16x16x128xbf16, #tpu.memory_space<vmem>>) attributes {dimension_semantics = [#tpu.dimension_semantics<parallel>, #tpu.dimension_semantics<parallel>], iteration_bounds = array<i64: 2, 1>, scalar_prefetch = 0 : i64, scratch_operands = 0 : i64, tpu.core_type = #tpu.core_type<tc>, window_params = [{transform_indices = @transform_0, window_bounds = array<i64: 16, 16>}, {pipeline_mode = #tpu.pipeline_mode<synchronous>, transform_indices = @transform_1, window_bounds = array<i64: 16, 16>}, {pipeline_mode = #tpu.pipeline_mode<synchronous>, transform_indices = @transform_2, window_bounds = array<i64: 3, 128>}, {transform_indices = @transform_3, window_bounds = array<i64: 1, 16, 16>}, {transform_indices = @transform_4, window_bounds = array<i64: 1, 16, 16>}, {transform_indices = @transform_5, window_bounds = array<i64: 1, 16, 16, 128>}]} {
    %c0 = arith.constant 0 : index
    %c0_0 = arith.constant 0 : index
    %0 = vector.load %arg2[%c0, %c0_0] : memref<16x16xbf16, #tpu.memory_space<vmem>>, vector<16x16xbf16>
    %c0_1 = arith.constant 0 : index
    %c0_2 = arith.constant 0 : index
    %1 = vector.load %arg3[%c0_1, %c0_2] : memref<16x16xbf16, #tpu.memory_space<vmem>>, vector<16x16xbf16>
    %c0_3 = arith.constant 0 : index
    %c0_4 = arith.constant 0 : index
    %2 = vector.load %arg4[%c0_3, %c0_4] : memref<3x128xf32, #tpu.memory_space<vmem>>, vector<3x128xf32>
    %c0_5 = arith.constant 0 : index
    %c0_6 = arith.constant 0 : index
    %c0_7 = arith.constant 0 : index
    %3 = vector.load %arg5[%c0_5, %c0_6, %c0_7] : memref<1x16x16xbf16, #tpu.memory_space<vmem>>, vector<1x16x16xbf16>
    %4 = vector.shape_cast %3 : vector<1x16x16xbf16> to vector<16x16xbf16>
    %c0_8 = arith.constant 0 : index
    %c0_9 = arith.constant 0 : index
    %c0_10 = arith.constant 0 : index
    %5 = vector.load %arg6[%c0_8, %c0_9, %c0_10] : memref<1x16x16xbf16, #tpu.memory_space<vmem>>, vector<1x16x16xbf16>
    %6 = vector.shape_cast %5 : vector<1x16x16xbf16> to vector<16x16xbf16>
    %cst = arith.constant dense<0.000000e+00> : vector<16x16xf32>
    %7 = tpu.matmul %0, %4, %cst {dimension_numbers = #tpu.dot_dimension_numbers<[1], [0], [0], [1], [0, 0, 1, 1], [], []>} : vector<16x16xbf16>, vector<16x16xbf16>, vector<16x16xf32> -> vector<16x16xf32>
    %cst_11 = arith.constant dense<0.000000e+00> : vector<16x16xf32>
    %8 = tpu.matmul %6, %1, %cst_11 {dimension_numbers = #tpu.dot_dimension_numbers<[1], [0], [0], [1], [0, 0, 1, 1], [], []>} : vector<16x16xbf16>, vector<16x16xbf16>, vector<16x16xf32> -> vector<16x16xf32>
    %9 = vector.shape_cast %7 : vector<16x16xf32> to vector<16x16x1xf32>
    %10 = vector.extract_strided_slice %2 {offsets = [0, 0], sizes = [1, 128], strides = [1, 1]} : vector<3x128xf32> to vector<1x128xf32>
    %11 = vector.shape_cast %10 : vector<1x128xf32> to vector<128xf32>
    %12 = vector.shape_cast %11 : vector<128xf32> to vector<1x1x128xf32>
    %13 = vector.broadcast %9 : vector<16x16x1xf32> to vector<16x16x128xf32>
    %14 = vector.broadcast %12 : vector<1x1x128xf32> to vector<16x16x128xf32>
    %15 = arith.mulf %13, %14 : vector<16x16x128xf32>
    %16 = vector.shape_cast %8 : vector<16x16xf32> to vector<16x16x1xf32>
    %17 = vector.extract_strided_slice %2 {offsets = [1, 0], sizes = [1, 128], strides = [1, 1]} : vector<3x128xf32> to vector<1x128xf32>
    %18 = vector.shape_cast %17 : vector<1x128xf32> to vector<128xf32>
    %19 = vector.shape_cast %18 : vector<128xf32> to vector<1x1x128xf32>
    %20 = vector.broadcast %16 : vector<16x16x1xf32> to vector<16x16x128xf32>
    %21 = vector.broadcast %19 : vector<1x1x128xf32> to vector<16x16x128xf32>
    %22 = arith.mulf %20, %21 : vector<16x16x128xf32>
    %23 = arith.addf %15, %22 : vector<16x16x128xf32>
    %24 = vector.extract_strided_slice %2 {offsets = [2, 0], sizes = [1, 128], strides = [1, 1]} : vector<3x128xf32> to vector<1x128xf32>
    %25 = vector.shape_cast %24 : vector<1x128xf32> to vector<128xf32>
    %26 = vector.shape_cast %25 : vector<128xf32> to vector<1x1x128xf32>
    %27 = vector.broadcast %26 : vector<1x1x128xf32> to vector<16x16x128xf32>
    %28 = arith.addf %23, %27 : vector<16x16x128xf32>
    %29 = math.sin %28 : vector<16x16x128xf32>
    %30 = arith.truncf %29 : vector<16x16x128xf32> to vector<16x16x128xbf16>
    %c0_12 = arith.constant 0 : index
    %c0_13 = arith.constant 0 : index
    %c0_14 = arith.constant 0 : index
    %c0_15 = arith.constant 0 : index
    %31 = vector.load %arg7[%c0_12, %c0_13, %c0_14, %c0_15] : memref<1x16x16x128xbf16, #tpu.memory_space<vmem>>, vector<1x16x16x128xbf16>
    %32 = vector.shape_cast %31 : vector<1x16x16x128xbf16> to vector<16x16x128xbf16>
    %33 = vector.shape_cast %30 : vector<16x16x128xbf16> to vector<1x16x16x128xbf16>
    tpu.vector_store %arg7[%c0_12, %c0_13, %c0_14, %c0_15], %33 {strides = array<i32>} : memref<1x16x16x128xbf16, #tpu.memory_space<vmem>>, vector<1x16x16x128xbf16>,
    return
  }
  func.func @transform_0(%arg0: i32, %arg1: i32) -> (i32, i32) {
    %c0_i32 = arith.constant 0 : i32
    %c0_i32_0 = arith.constant 0 : i32
    return %arg1, %c0_i32 : i32, i32
  }
  func.func @transform_1(%arg0: i32, %arg1: i32) -> (i32, i32) {
    %c0_i32 = arith.constant 0 : i32
    %c0_i32_0 = arith.constant 0 : i32
    %c0_i32_1 = arith.constant 0 : i32
    return %c0_i32, %c0_i32_0 : i32, i32
  }
  func.func @transform_2(%arg0: i32, %arg1: i32) -> (i32, i32) {
    %c0_i32 = arith.constant 0 : i32
    %c0_i32_0 = arith.constant 0 : i32
    %c0_i32_1 = arith.constant 0 : i32
    return %c0_i32, %c0_i32_0 : i32, i32
  }
  func.func @transform_3(%arg0: i32, %arg1: i32) -> (i32, i32, i32) {
    %c0_i32 = arith.constant 0 : i32
    %c0_i32_0 = arith.constant 0 : i32
    %c0_i32_1 = arith.constant 0 : i32
    return %arg0, %c0_i32, %c0_i32_0 : i32, i32, i32
  }
  func.func @transform_4(%arg0: i32, %arg1: i32) -> (i32, i32, i32) {
    %c0_i32 = arith.constant 0 : i32
    %c0_i32_0 = arith.constant 0 : i32
    return %arg0, %arg1, %c0_i32 : i32, i32, i32
  }
  func.func @transform_5(%arg0: i32, %arg1: i32) -> (i32, i32, i32, i32) {
    %c0_i32 = arith.constant 0 : i32
    %c0_i32_0 = arith.constant 0 : i32
    %c0_i32_1 = arith.constant 0 : i32
    return %arg0, %arg1, %c0_i32, %c0_i32_0 : i32, i32, i32, i32
  }
}

</mosaic_0001>

<bundles_post_ra>
// kernel: tpu_custom_call.1
= control target key start
LH: loop header
LB: loop body
LE: loop exit
PB: predicated region body
PF: predicated region fallthrough
CT: control target
= control target key end

     0   :  { %s8731_s0 = inlined_call_operand.hbm [shape: bf16[16,16], index: 0, kind: input, shape index: {}]   ;;  %s8732_s1 = inlined_call_operand.hbm [shape: bf16[16,16], index: 1, kind: input, shape index: {}]   ;;  %s8733_s2 = inlined_call_operand.hbm [shape: f32[3,128], index: 2, kind: input, shape index: {}]   ;;  %s8734_s3 = inlined_call_operand.hbm [shape: bf16[2,16,16], index: 3, kind: input, shape index: {}]   ;;  %s8735_s4 = inlined_call_operand.hbm [shape: bf16[2,16,16], index: 4, kind: input, shape index: {}]   ;;  %s8736_s5 = inlined_call_operand.hbm [shape: bf16[2,16,16,128], index: 5, kind: output, shape index: {}]  }
   0x1   :  { %8747 = sst [smem:[#allocation18_spill]] %s8732_s1 }
   0x2   :  { %8748 = sst [smem:[#allocation19_spill]] %s8734_s3 }
   0x3   :  { %8749 = sst [smem:[#allocation20_spill]] %s8735_s4 }
   0x4   :  { %10 = vsyncpa [#allocation3], 0 }
   0x5   :  { %11 = vsyncpa [#allocation6], 0 }
   0x6   :  { %12 = vsyncpa [#allocation9], 0 }
   0x7   :  { %14 = vsyncpa [#allocation9 + $0x1], 0 }
   0x8   :  { %15 = vsyncpa [#allocation4], 0 }
   0x9   :  { %17 = vsyncpa [#allocation4 + $0x1], 0  ;;  %s5588_s18 = smov 0   ;;  %s5590_s19 = smov 0  }
   0xa   :  { %s5592_s20 = smov 0   ;;  %s5594_s21 = smov 0  }
   0xb   :  { %s5596_s22 = smov 0   ;;  %s5598_s23 = smov 0  }
   0xc LB: > { %s5619_s24 = sadd.s32 4294967295, %s5538_s23   ;;  %s4610_s25 = sadd.s32 4294967294, %s5538_s23   ;;  %s5538_s23 = sphi %s5598_s23, %s23_s23   ;;  %s5534_s22 = sphi %s5596_s22, %s8843_s22   ;;  %s5530_s21 = sphi %s5594_s21, %s8842_s21   ;;  %s5526_s20 = sphi %s5592_s20, %s8841_s20   ;;  %s5522_s19 = sphi %s5590_s19, %s8840_s19   ;;  %s5518_s18 = sphi %s5588_s18, %s8839_s18  }
   0xd   : > { %p123_p0 = scmp.ne.s32.totalorder %s5522_s19, %s5518_s18  ;;  %p8743_p1 = scmp.eq.s32.totalorder %s5619_s24, 0 }
   0xe   : > { %p183_p3 = scmp.eq.s32.totalorder %s4610_s25, 1  ;;  %p4611_p5 = scmp.ge.s32.totalorder %s5538_s23, 1 }
   0xf   : > { %p5628_p4 = por %p8743_p1, %p123_p0  ;;  %p190_p7 = scmp.lt.s32.totalorder %s5538_s23, 3 }
  0x10   : > { %p5633_p6 = por %p183_p3, %p123_p0  ;;  %s5540_s29 = smov [#allocation5]  }
  0x11   : > { %p5638_p8 = pnand %p4611_p5, %p190_p7  ;;  %s218_s30 = sshll.u32 %s5540_s29, 4  ;;  %s219_s30 = int_to_ptr.vmem [resolvable:$true] %s218_s30 }
  0x12   : > { %s8751_s27 = scalar_select %p5633_p6, 1, 0 }
  0x13   : > { %p5092_p10 = pneg %p5638_p8  ;;  %s35_s7 = sadd.s32 1, %s5534_s22 }
  0x14   : > { %8752 = sst [smem:[#allocation16_spill]] %s8751_s27  ;;  %s5327_s8 = scalar_lea.vmem %s219_s30, 128 }
  0x15   : > { %p5647_p11 = pnand %p5092_p10, %p8743_p1  ;;  %p5328_p13 = scmp.ne.s32.totalorder %s219_s30, %s5327_s8 }
  0x16   : > { %p5335_p5 = scmp.lt.s32.totalorder %s219_s30, %s219_s30  ;;  %p5336_p7 = scmp.lt.s32.totalorder %s5327_s8, %s5327_s8 }
  0x17   : > { %p8744_p12 = pneg %p5647_p11 }
  0x18   : > { %p5337_p9 = por %p5336_p7, %p5335_p5 }
  0x19   : > { %p5330_p0 = pnand %p5328_p13, %p8744_p12 }
  0x1b   : > { %p5331_p3 = pneg %p5330_p0 }
  0x1d   : > { %p5338_p2 = pnand %p5337_p9, %p5331_p3 }
  0x1f   : > { %5341 = shalt.err (!%p5338_p2)
}
  0x20   : > { %s8737_s9 = smov 64   ;;  %s8739_s10 = smov 4  }
  0x21   : > { %s8755_s1 = sld [smem:[#allocation18_spill]]  ;;  %p37_p2 = scmp.ge.s32.totalorder %s35_s7, 2 }
  0x22   : > { %s110_s13 = sadd.s32 1, %s5526_s20  ;;  %p117_p9 = scmp.ne.s32.totalorder %s5526_s20, %s5522_s19 }
  0x23   : > { %p118_p10 = scmp.eq.s32.totalorder %s5538_s23, 0  ;;  %s8845_s7 = smov (%p37_p2, %s35_s7), 0 }
  0x24   : > { %8756 = sst [smem:[#allocation17_spill]] %s8845_s7  ;;  %p8758_p0 = scmp.eq.s32.totalorder %s5619_s24, 1 }
  0x25   : > { %p5671_p13 = por %p118_p10, %p117_p9  ;;  %s107_s16 = ssub.s32 %s5534_s22, %s8845_s7 }
  0x26   : > { %p5677_p3 = por %p8758_p0, %p117_p9  ;;  %p5116_p5 = scmp.lt.s32.totalorder %s5538_s23, 2 }
  0x27   : > { %5098 = dma.hbm_to_vmem [thread:$0]  (!%p5647_p11), %s8755_s1, 128, %s219_s30, [#allocation6], %s8737_s9, %s8737_s9, %s8739_s10  }
  0x28   : > { %s8759_s15 = scalar_select %p5677_p3, 1, 0 }
  0x29   : > { %p108_p7 = scmp.eq.s32.totalorder %s107_s16, 0  ;;  %s243_s17 = sand.u32 1, %s5538_s23  }
  0x2a   : > { %s245_s25 = sand.u32 1, %s5526_s20   ;;  %s4800_s8 = sshll.u32 %s5534_s22, 7 }
  0x2b   : > { %s5687_s29 = scalar_select %p108_p7, %s5526_s20, %s110_s13  }
  0x2c   : > { %s4616_s30 = sshll.u32 %s245_s25, 3  ;;  %s8760_s3 = sld [smem:[#allocation19_spill]] }
  0x2d   : > { %s247_s10 = scalar_lea.vmem [#allocation8], %s4616_s30  ;;  %p5695_p2 = pnand %p5116_p5, %p5671_p13 }
  0x2e   : > { %s254_s1 = sshll.u32 %s247_s10, 4  ;;  %s8762_s4 = sld [smem:[#allocation20_spill]]  ;;  %s255_s1 = int_to_ptr.vmem [resolvable:$true] %s254_s1 }
  0x2f   : > { %s5704_s25 = scalar_lea.sflag [#allocation9], %s243_s17  ;;  %p8745_p9 = pneg %p5695_p2 }
  0x30   : > { %s5355_s11 = scalar_lea.vmem %s255_s1, 128  ;;  %s5543_s10 = smov [#allocation8]  }
  0x31   : > { %p5356_p10 = scmp.ne.s32.totalorder %s255_s1, %s5355_s11  ;;  %s5360_s14 = sshll.u32 %s5543_s10, 4  ;;  %s5361_s14 = int_to_ptr.vmem [resolvable:$false] %s5360_s14 }
  0x32   : > { %s253_s9 = scalar_lea.hbm %s8760_s3, %s4800_s8  ;;  %s5362_s12 = scalar_lea.vmem %s5361_s14, 256 }
  0x33   : > { %p5358_p13 = pnand %p5356_p10, %p8745_p9  ;;  %p5363_p5 = scmp.lt.s32.totalorder %s255_s1, %s5361_s14 }
  0x34   : > { %s5702_s13 = scalar_lea.hbm %s8762_s4, %s4800_s8  ;;  %p5364_p7 = scmp.lt.s32.totalorder %s5362_s12, %s5355_s11 }
  0x35   : > { %p5359_p0 = pneg %p5358_p13 }
  0x36   : > { %p5365_p1 = por %p5364_p7, %p5363_p5 }
  0x38   : > { %p5366_p12 = pnand %p5365_p1, %p5359_p0 }
  0x3a   : > { %5369 = shalt.err (!%p5366_p12)
}
  0x3b   : > { %s8763_s7 = smov 4   ;;  %s8764_s17 = smov 64  }
  0x3c   : > { %5105 = dma.hbm_to_vmem [thread:$0]  (!%p5695_p2), %s253_s9, 128, %s255_s1, %s5704_s25, %s8764_s17, %s8764_s17, %s8763_s7  }
  0x3d   : > { %s268_s8 = scalar_lea.vmem [#allocation10], %s4616_s30  ;;  %s5544_s10 = smov [#allocation2]  }
  0x3e   : > { %s277_s16 = sshll.u32 %s268_s8, 4  ;;  %s205_s3 = sshll.u32 %s5544_s10, 4  ;;  %s5717_s16 = int_to_ptr.vmem [resolvable:$true] %s277_s16  ;;  %s206_s3 = int_to_ptr.vmem [resolvable:$true] %s205_s3 }
  0x3f   : > { %s5545_s4 = smov [#allocation7]   ;;  %s5381_s11 = scalar_lea.vmem %s206_s3, 128 }
  0x40   : > { %s232_s14 = sshll.u32 %s5545_s4, 4  ;;  %p5382_p1 = scmp.ne.s32.totalorder %s206_s3, %s5381_s11  ;;  %s233_s14 = int_to_ptr.vmem [resolvable:$true] %s232_s14 }
  0x41   : > { %p8765_p12 = pneg %p5647_p11  ;;  %p5389_p0 = scmp.lt.s32.totalorder %s206_s3, %s206_s3 }
  0x42   : > { %p5390_p5 = scmp.lt.s32.totalorder %s5381_s11, %s5381_s11 }
  0x43   : > { %p5384_p10 = pnand %p5382_p1, %p8765_p12 }
  0x44   : > { %p5391_p7 = por %p5390_p5, %p5389_p0 }
  0x45   : > { %p5385_p13 = pneg %p5384_p10 }
  0x47   : > { %p5392_p9 = pnand %p5391_p7, %p5385_p13 }
  0x49   : > { %5395 = shalt.err (!%p5392_p9)
}
  0x4a   : > { %5095 = dma.hbm_to_vmem [thread:$0]  (!%p5647_p11), %s8731_s0, 128, %s206_s3, [#allocation3], %s8764_s17, %s8764_s17, %s8763_s7  }
  0x4b   : > { %s5407_s9 = scalar_lea.vmem %s233_s14, 64  ;;  %p8766_p1 = pmov %p8765_p12 }
  0x4c   : > { %p5408_p6 = scmp.ne.s32.totalorder %s233_s14, %s5407_s9  ;;  %p5415_p3 = scmp.lt.s32.totalorder %s233_s14, %s233_s14 }
  0x4d   : > { %p5416_p0 = scmp.lt.s32.totalorder %s5407_s9, %s5407_s9 }
  0x4e   : > { %p5410_p12 = pnand %p5408_p6, %p8766_p1 }
  0x4f   : > { %p5417_p13 = por %p5416_p0, %p5415_p3 }
  0x50   : > { %p5411_p10 = pneg %p5410_p12 }
  0x52   : > { %p5418_p9 = pnand %p5417_p13, %p5411_p10 }
  0x54   : > { %5421 = shalt.err (!%p5418_p9)
}
  0x55   : > { %5101 = dma.hbm_to_vmem [thread:$0]  (!%p5647_p11), %s8733_s2, 64, %s233_s14, [#allocation6]  }
  0x56   : > { %s5435_s3 = scalar_lea.vmem %s5717_s16, 128  ;;  %p8767_p6 = pneg %p5695_p2 }
  0x57   : > { %p5436_p5 = scmp.ne.s32.totalorder %s5717_s16, %s5435_s3  ;;  %s5546_s8 = smov [#allocation10]  }
  0x58   : > { %s5440_s10 = sshll.u32 %s5546_s8, 4  ;;  %s5441_s10 = int_to_ptr.vmem [resolvable:$false] %s5440_s10 }
  0x59   : > { %p5438_p7 = pnand %p5436_p5, %p8767_p6  ;;  %s5442_s11 = scalar_lea.vmem %s5441_s10, 256 }
  0x5a   : > { %p5443_p3 = scmp.lt.s32.totalorder %s5717_s16, %s5441_s10  ;;  %p5444_p12 = scmp.lt.s32.totalorder %s5442_s11, %s5435_s3 }
  0x5b   : > { %p5439_p1 = pneg %p5438_p7 }
  0x5c   : > { %p5445_p10 = por %p5444_p12, %p5443_p3 }
  0x5e   : > { %p5446_p0 = pnand %p5445_p10, %p5439_p1 }
  0x60   : > { %5449 = shalt.err (!%p5446_p0)
}
  0x61   : > { %5108 = dma.hbm_to_vmem [thread:$0]  (!%p5695_p2), %s5702_s13, 128, %s5717_s16, %s5704_s25, %s8764_s17, %s8764_s17, %s8763_s7  }
  0x62   : > { %289 = sbr.rel (%p5638_p8) target bundleno = 1338 (0x53a), region = 40  ;;  %p8768_p11 = scmp.eq.s32.totalorder (!%p5638_p8), %s5619_s24, 0 }
  0x67   : > { %5501 = dma.done.wait (%p8768_p11), [#allocation3], 128   ;;  %p8769_p13 = pmov %p8768_p11 }
  0x68   : > { %p8770_p9 = pmov %p8768_p11 }
  0x69   : > { %5503 = vsyncadd (%p8769_p13), [#allocation3], 4294967168 }
  0x6a   : > { %5505 = dma.done.wait (%p8770_p9), [#allocation6], 192   ;;  %p8771_p5 = pmov %p8770_p9 }
  0x6b   : > { %s303_s27 = sand.u32 1, %s5619_s24   ;;  %s5764_s6 = sand.u32 1, %s5522_s19  }
  0x6c   : > { %5507 = vsyncadd (%p8771_p5), [#allocation6], 4294967104  ;;  %s4626_s28 = sshll.u32 %s5764_s6, 3  ;;  %s304_s13 = scalar_lea.sflag [#allocation9], %s303_s27 }
  0x6d   : > { %s307_s25 = scalar_lea.vmem [#allocation8], %s4626_s28 }
  0x6e   : > { %5509 = dma.done.wait (%p5628_p4), %s304_s13, 256  }
  0x6f   : > { %5511 = vsyncadd (%p5628_p4), %s304_s13, 4294967040  ;;  %v5547_v0 = vmov 0.0   ;;  %vm5548_vm0 = vmmov 0   ;;  %v5184_v1 = vld [vmem:[%s307_s25] sm:$0xff]   ;;  %vm372_vm1 = vcmask 130048   ;;  %v5186_v3 = vld [vmem:[#allocation5] sm:$0xff]   ;;  %v472_v5 = vlaneseq }
  0x70   : > { %4934 = vmatprep.subr.bf16.mxu0 %v5547_v0  ;;  %4936 = vmatprep.mubr.msk.bf16.mxu0 %vm5548_vm0, %v5547_v0  ;;  %v5185_v2 = vld [vmem:[#allocation2] sm:$0xff]   ;;  %s316_s24 = scalar_lea.vmem [#allocation10], %s4626_s28  ;;  %s4628_s26 = sshll.u32 %s5764_s6, 7 }
  0x71   : > { %4940 = vmatprep.subr.bf16.mxu1 %v5547_v0  ;;  %4942 = vmatprep.mubr.msk.bf16.mxu1 %vm5548_vm0, %v5547_v0  ;;  %v5187_v4 = vld [vmem:[%s316_s24] sm:$0xff]   ;;  %v473_v6 = vshrl.u32 %v472_v5, 7  ;;  %s6238_s7 = scalar_lea.vmem [#allocation11], %s4628_s26  ;;  %s4834_s17 = sshll.u32 %s5530_s21, 11 }
  0x72   : > { %4935 = vmatpush3.bf16.msra.mxu0 %v5184_v1  ;;  %4941 = vmatpush3.bf16.msra.mxu1 %v5186_v3  ;;  %v356_v5 = vld [vmem:[#allocation7] sm:$0x7]  ;;  %s4469_s16 = sshll.u32 %s6238_s7, 4  ;;  %s8680_s4 = scalar_lea.hbm %s8736_s5, %s4834_s17  ;;  %s8682_s16 = int_to_ptr.vmem [resolvable:$true] %s4469_s16 }
  0x73   : > { %v5771_v7 = vsub.s32 1, %v473_v6  ;;  %v5773_v8 = vsub.s32 0, %v473_v6  ;;  %v507_v15 = vsub.s32 3, %v473_v6  ;;  %v518_v16 = vsub.s32 4, %v473_v6  ;;  %s4453_s21 = scalar_lea.sflag [#allocation4], %s5764_s6  ;;  %s5450_s9 = scalar_lea.vmem %s8682_s16, 2048 }
  0x74   : > { %v529_v17 = vsub.s32 5, %v473_v6  ;;  %v540_v18 = vsub.s32 6, %v473_v6  ;;  %v5781_v20 = vsub.s32 2, %v473_v6  ;;  %v551_v21 = vsub.s32 7, %v473_v6  ;;  %p5451_p4 = scmp.ne.s32.totalorder %s8682_s16, %s5450_s9  ;;  %p8834_p8 = scmp.ne.s32.totalorder %s8759_s15, 0 }
  0x75   : > { %4937 = vmatmul.mubr.msk.bf16.vlgmr.msra.gmra.mxu0 %vm372_vm1, %v5185_v2  ;;  %4943 = vmatmul.mubr.msk.bf16.vlgmr.msra.gmra.mxu1 %vm372_vm1, %v5187_v4  ;;  %s5555_s30 = smov [#allocation11]  }
  0x76   : > { %p5452_p2 = pnand %p5451_p4, %p8834_p8  ;;  %s5454_s12 = sshll.u32 %s5555_s30, 4  ;;  %s5455_s12 = int_to_ptr.vmem [resolvable:$false] %s5454_s12 }
  0x77   : > { %s5456_s3 = scalar_lea.vmem %s5455_s12, 4096  ;;  %p5457_p7 = scmp.lt.s32.totalorder %s8682_s16, %s5455_s12 }
  0x78   : > { %p5453_p6 = pneg %p5452_p2  ;;  %p5458_p1 = scmp.lt.s32.totalorder %s5456_s3, %s5450_s9 }
  0x7a   : > { %p5459_p3 = por %p5458_p1, %p5457_p7 }
  0x7c   : > { %p5460_p12 = pnand %p5459_p3, %p5453_p6 }
 0x135   : > { %v410_v9 = vpop.f32.mrf.mxu0  ;;  %v5777_v13 = vpop.f32.mrf.mxu1 }
 0x136   : > { %v486_v10 = vrot.slane %v410_v9, %v5771_v7  ;;  %v475_v11 = vrot.slane %v410_v9, %v5773_v8  ;;  %v497_v33 = vrot.slane %v410_v9, %v5781_v20  ;;  %v508_v36 = vrot.slane %v410_v9, %v507_v15 }
 0x137   : > { %v4938_v12 = vpop.f32.mrf.mxu0  ;;  %v4944_v19 = vpop.f32.mrf.mxu1  ;;  %v519_v37 = vrot.slane %v410_v9, %v518_v16  ;;  %v530_v38 = vrot.slane %v410_v9, %v529_v17  ;;  %v541_v39 = vrot.slane %v410_v9, %v540_v18  ;;  %v552_v40 = vrot.slane %v410_v9, %v551_v21 }
 0x138   : > { %488 = vbcast.lane.b32.xlu1 %v486_v10, 256  ;;  %477 = vbcast.lane.b32.xlu0 %v475_v11, 256  ;;  %v687_v41 = vrot.slane %v5777_v13, %v5773_v8  ;;  %v698_v42 = vrot.slane %v5777_v13, %v5771_v7  ;;  %v709_v43 = vrot.slane %v5777_v13, %v5781_v20 }
 0x139   : > { %v5779_v14 = vpop.f32.mrf.mxu0  ;;  %v5783_v23 = vpop.f32.mrf.mxu1  ;;  %v720_v44 = vrot.slane %v5777_v13, %v507_v15  ;;  %v731_v45 = vrot.slane %v5777_v13, %v518_v16  ;;  %v742_v46 = vrot.slane %v5777_v13, %v529_v17  ;;  %v753_v47 = vrot.slane %v5777_v13, %v540_v18 }
 0x13a   : > { %v5786_v24 = vrot.slane %v5779_v14, %v507_v15  ;;  %v5789_v25 = vrot.slane %v5779_v14, %v518_v16  ;;  %v5792_v26 = vrot.slane %v5779_v14, %v529_v17  ;;  %v5795_v27 = vrot.slane %v5779_v14, %v540_v18 }
 0x13b   : > { %v4939_v22 = vpop.f32.mrf.mxu0  ;;  %v5798_v28 = vrot.slane %v5779_v14, %v551_v21  ;;  %v4945_v29 = vpop.f32.mrf.mxu1  ;;  %v5801_v30 = vrot.slane %v5783_v23, %v507_v15  ;;  %v5804_v31 = vrot.slane %v5783_v23, %v518_v16  ;;  %v5807_v32 = vrot.slane %v5783_v23, %v529_v17 }
 0x13c   : > { %492 = vbcast.lane.b32.xlu1 %v486_v10, 264  ;;  %481 = vbcast.lane.b32.xlu0 %v475_v11, 264  ;;  %v5811_v34 = vrot.slane %v5783_v23, %v540_v18  ;;  %v5814_v35 = vrot.slane %v5783_v23, %v551_v21  ;;  %v764_v48 = vrot.slane %v5777_v13, %v551_v21 }
 0x13d   : > { %v563_v49 = vrot.slane %v5779_v14, %v5773_v8  ;;  %v574_v50 = vrot.slane %v5779_v14, %v5771_v7  ;;  %v585_v51 = vrot.slane %v5779_v14, %v5781_v20  ;;  %v775_v52 = vrot.slane %v5783_v23, %v5773_v8 }
 0x13e   : > { %v786_v53 = vrot.slane %v5783_v23, %v5771_v7  ;;  %v797_v54 = vrot.slane %v5783_v23, %v5781_v20  ;;  %v5884_v10 = vrot.slane %v356_v5, %v5771_v7  ;;  %v5887_v11 = vrot.slane %v356_v5, %v5773_v8 }
 0x13f   : > { %v5890_v12 = vrot.slane %v356_v5, %v5781_v20  ;;  %v5551_v5 = vmov 2131351028  }
 0x140   : > { %503 = vbcast.lane.b32.xlu1 %v497_v33, 264  ;;  %499 = vbcast.lane.b32.xlu0 %v497_v33, 256 }
 0x144   : > { %514 = vbcast.lane.b32.xlu1 %v508_v36, 264  ;;  %510 = vbcast.lane.b32.xlu0 %v508_v36, 256 }
 0x148   : > { %525 = vbcast.lane.b32.xlu1 %v519_v37, 264  ;;  %521 = vbcast.lane.b32.xlu0 %v519_v37, 256 }
 0x14c   : > { %536 = vbcast.lane.b32.xlu1 %v530_v38, 264  ;;  %532 = vbcast.lane.b32.xlu0 %v530_v38, 256 }
 0x150   : > { %547 = vbcast.lane.b32.xlu1 %v541_v39, 264  ;;  %543 = vbcast.lane.b32.xlu0 %v541_v39, 256 }
 0x154   : > { %558 = vbcast.lane.b32.xlu1 %v552_v40, 264  ;;  %554 = vbcast.lane.b32.xlu0 %v552_v40, 256 }
 0x158   : > { %693 = vbcast.lane.b32.xlu1 %v687_v41, 264  ;;  %689 = vbcast.lane.b32.xlu0 %v687_v41, 256 }
 0x15c   : > { %704 = vbcast.lane.b32.xlu1 %v698_v42, 264  ;;  %700 = vbcast.lane.b32.xlu0 %v698_v42, 256 }
 0x160   : > { %715 = vbcast.lane.b32.xlu1 %v709_v43, 264  ;;  %711 = vbcast.lane.b32.xlu0 %v709_v43, 256 }
 0x164   : > { %726 = vbcast.lane.b32.xlu1 %v720_v44, 264  ;;  %722 = vbcast.lane.b32.xlu0 %v720_v44, 256 }
 0x168   : > { %737 = vbcast.lane.b32.xlu1 %v731_v45, 264  ;;  %733 = vbcast.lane.b32.xlu0 %v731_v45, 256 }
 0x16c   : > { %748 = vbcast.lane.b32.xlu1 %v742_v46, 264  ;;  %744 = vbcast.lane.b32.xlu0 %v742_v46, 256 }
 0x170   : > { %759 = vbcast.lane.b32.xlu1 %v753_v47, 264  ;;  %755 = vbcast.lane.b32.xlu0 %v753_v47, 256 }
 0x174   : > { %770 = vbcast.lane.b32.xlu1 %v764_v48, 264  ;;  %766 = vbcast.lane.b32.xlu0 %v764_v48, 256 }
 0x178   : > { %569 = vbcast.lane.b32.xlu1 %v563_v49, 264  ;;  %565 = vbcast.lane.b32.xlu0 %v563_v49, 256 }
 0x17c   : > { %580 = vbcast.lane.b32.xlu1 %v574_v50, 264  ;;  %576 = vbcast.lane.b32.xlu0 %v574_v50, 256 }
 0x180   : > { %591 = vbcast.lane.b32.xlu1 %v585_v51, 264  ;;  %587 = vbcast.lane.b32.xlu0 %v585_v51, 256 }
 0x184   : > { %602 = vbcast.lane.b32.xlu1 %v5786_v24, 264  ;;  %598 = vbcast.lane.b32.xlu0 %v5786_v24, 256 }
 0x188   : > { %613 = vbcast.lane.b32.xlu1 %v5789_v25, 264  ;;  %609 = vbcast.lane.b32.xlu0 %v5789_v25, 256 }
 0x18c   : > { %624 = vbcast.lane.b32.xlu1 %v5792_v26, 264  ;;  %620 = vbcast.lane.b32.xlu0 %v5792_v26, 256 }
 0x190   : > { %635 = vbcast.lane.b32.xlu1 %v5795_v27, 264  ;;  %631 = vbcast.lane.b32.xlu0 %v5795_v27, 256 }
 0x194   : > { %646 = vbcast.lane.b32.xlu1 %v5798_v28, 264  ;;  %642 = vbcast.lane.b32.xlu0 %v5798_v28, 256 }
 0x198   : > { %781 = vbcast.lane.b32.xlu1 %v775_v52, 264  ;;  %777 = vbcast.lane.b32.xlu0 %v775_v52, 256 }
 0x19c   : > { %792 = vbcast.lane.b32.xlu1 %v786_v53, 264  ;;  %788 = vbcast.lane.b32.xlu0 %v786_v53, 256  ;;  %v5549_v53 = vmov 683565275  }
 0x1a0   : > { %803 = vbcast.lane.b32.xlu1 %v797_v54, 264  ;;  %799 = vbcast.lane.b32.xlu0 %v797_v54, 256 }
 0x1a4   : > { %814 = vbcast.lane.b32.xlu1 %v5801_v30, 264  ;;  %810 = vbcast.lane.b32.xlu0 %v5801_v30, 256 }
 0x1a8   : > { %825 = vbcast.lane.b32.xlu1 %v5804_v31, 264  ;;  %821 = vbcast.lane.b32.xlu0 %v5804_v31, 256 }
 0x1aa   : > { %v489_v55 = vpop.permute.xlu1 %488  ;;  %v478_v56 = vpop.permute.xlu0 %477 }
 0x1ab   : > { %v652_v15 = vmul.f32 %v5887_v11, %v478_v56  ;;  %v5917_v44 = vmul.f32 %v5887_v11, %v489_v55  ;;  %v5550_v55 = vmov 2475754826  }
 0x1ac   : > { %836 = vbcast.lane.b32.xlu1 %v5807_v32, 264  ;;  %832 = vbcast.lane.b32.xlu0 %v5807_v32, 256 }
 0x1ae   : > { %v493_v57 = vpop.permute.xlu1 %492  ;;  %v482_v58 = vpop.permute.xlu0 %481 }
 0x1af   : > { %v653_v16 = vmul.f32 %v5887_v11, %v482_v58  ;;  %v655_v23 = vmul.f32 %v5887_v11, %v493_v57 }
 0x1b0   : > { %847 = vbcast.lane.b32.xlu1 %v5811_v34, 264  ;;  %843 = vbcast.lane.b32.xlu0 %v5811_v34, 256 }
 0x1b2   : > { %v5857_v59 = vpop.permute.xlu1 %503  ;;  %v5859_v60 = vpop.permute.xlu0 %499 }
 0x1b4   : > { %858 = vbcast.lane.b32.xlu1 %v5814_v35, 264  ;;  %854 = vbcast.lane.b32.xlu0 %v5814_v35, 256 }
 0x1b6   : > { %v5863_v61 = vpop.permute.xlu1 %514  ;;  %v5865_v62 = vpop.permute.xlu0 %510 }
 0x1ba   : > { %v5867_v63 = vpop.permute.xlu1 %525  ;;  %v5869_v0 = vpop.permute.xlu0 %521 }
 0x1be   : > { %v5871_v1 = vpop.permute.xlu1 %536  ;;  %v5873_v2 = vpop.permute.xlu0 %532 }
 0x1c2   : > { %v5875_v3 = vpop.permute.xlu1 %547  ;;  %v5877_v4 = vpop.permute.xlu0 %543 }
 0x1c6   : > { %v5879_v6 = vpop.permute.xlu1 %558  ;;  %v5881_v9 = vpop.permute.xlu0 %554 }
 0x1ca   : > { %v694_v13 = vpop.permute.xlu1 %693  ;;  %v690_v14 = vpop.permute.xlu0 %689 }
 0x1cb   : > { %v865_v17 = vmul.f32 %v5884_v10, %v694_v13  ;;  %v864_v18 = vmul.f32 %v5884_v10, %v690_v14  ;;  %v5552_v14 = vmov 2102212464  }
 0x1cd   : > { %v897_v19 = vadd.f32 %v865_v17, %v653_v16  ;;  %v896_v21 = vadd.f32 %v864_v18, %v652_v15  ;;  %v5553_v16 = vmov 920167782  }
 0x1ce   : > { %v705_v7 = vpop.permute.xlu1 %704  ;;  %v701_v41 = vpop.permute.xlu0 %700 }
 0x1cf   : > { %v5897_v22 = vadd.f32 %v5890_v12, %v897_v19  ;;  %v5900_v8 = vadd.f32 %v5890_v12, %v896_v21  ;;  %v867_v20 = vmul.f32 %v5884_v10, %v705_v7  ;;  %v5926_v51 = vmul.f32 %v5884_v10, %v701_v41 }
 0x1d1   : > { %v1068_v24 = vand.u32 2147483647, %v5897_v22  ;;  %v1071_v25 = vand.u32 2139095040, %v5897_v22  ;;  %v964_v26 = vand.u32 2147483647, %v5900_v8  ;;  %v967_v27 = vand.u32 2139095040, %v5900_v8 }
 0x1d2   : > { %v899_v29 = vadd.f32 %v867_v20, %v655_v23  ;;  %v5554_v23 = vmov 1326507024   ;;  %vm1070_vm1 = vcmp.lt.s32.totalorder %v5897_v22, 0 }
 0x1d3   : > { %v1072_v28 = vshrl.u32 %v1071_v25, 23  ;;  %v1075_v30 = vand.u32 8388607, %v1068_v24  ;;  %v968_v31 = vshrl.u32 %v967_v27, 23  ;;  %v971_v32 = vand.u32 8388607, %v964_v26 }
 0x1d4   : > { %v5913_v34 = vadd.f32 %v5890_v12, %v899_v29 }
 0x1d5   : > { %v4639_v33 = vadd.s32 4294967169, %v1072_v28  ;;  %v4635_v35 = vadd.s32 4294967169, %v968_v31  ;;  %v1076_v37 = vor.u32 8388608, %v1075_v30  ;;  %v972_v38 = vor.u32 8388608, %v971_v32 }
 0x1d6   : > { %v1279_v40 = vand.u32 2139095040, %v5913_v34 }
 0x1d7   : > { %v1078_v36 = vadd.s32 1, %v4639_v33  ;;  %v974_v39 = vadd.s32 1, %v4635_v35  ;;  %v5919_v48 = vshll.u32 %v1076_v37, 8  ;;  %v5923_v50 = vshll.u32 %v972_v38, 8 }
 0x1d8   : > { %v1280_v43 = vshrl.u32 %v1279_v40, 23 }
 0x1d9   : > { %vm1079_vm2 = vcmp.gt.s32.totalorder %v1078_v36, 0  ;;  %vm975_vm3 = vcmp.gt.s32.totalorder %v974_v39, 0 }
 0x1da   : > { %v1080_v42 = vsel %vm1079_vm2, %v1078_v36, 0  ;;  %v976_v47 = vsel %vm975_vm3, %v974_v39, 0  ;;  %v5929_v57 = vadd.s32 4294967169, %v1280_v43 }
 0x1db   : > { %v1081_v45 = vshrl.u32 %v1080_v42, 5  ;;  %v1082_v46 = vand.u32 31, %v1080_v42  ;;  %v5921_v49 = vshrl.u32 %v976_v47, 5  ;;  %v978_v56 = vand.u32 31, %v976_v47 }
 0x1dd   : > { %v1083_v52 = vsub.s32 32, %v1082_v46  ;;  %v1085_v54 = vshll.u32 %v5549_v53, %v1082_v46  ;;  %v1088_v58 = vshll.u32 %v5550_v55, %v1082_v46  ;;  %v1091_v13 = vshll.u32 %v5551_v5, %v1082_v46 }
 0x1de   : > { %v1094_v15 = vshll.u32 %v5552_v14, %v1082_v46  ;;  %v1097_v17 = vshll.u32 %v5553_v16, %v1082_v46  ;;  %vm1100_vm4 = vcmp.lt.s32.totalorder %v1081_v45, 1  ;;  %vm1101_vm5 = vcmp.lt.s32.totalorder %v1081_v45, 2 }
 0x1df   : > { %v1086_v18 = vshrl.u32 %v5550_v55, %v1083_v52  ;;  %v1089_v19 = vshrl.u32 %v5551_v5, %v1083_v52  ;;  %v1092_v21 = vshrl.u32 %v5552_v14, %v1083_v52  ;;  %v1084_v7 = vshrl.u32 %v5549_v53, %v1083_v52 }
 0x1e0   : > { %v1095_v20 = vshrl.u32 %v5553_v16, %v1083_v52  ;;  %v1098_v25 = vshrl.u32 %v5554_v23, %v1083_v52  ;;  %v979_v30 = vsub.s32 32, %v978_v56  ;;  %vm1102_vm6 = vcmp.lt.s32.totalorder %v1081_v45, 3 }
 0x1e1   : > { %v1087_v27 = vor.u32 %v1086_v18, %v1085_v54  ;;  %v1090_v28 = vor.u32 %v1089_v19, %v1088_v58  ;;  %v1093_v29 = vor.u32 %v1092_v21, %v1091_v13  ;;  %vm1103_vm7 = vcmp.lt.s32.totalorder %v1081_v45, 4 }
 0x1e2   : > { %v1096_v31 = vor.u32 %v1095_v20, %v1094_v15  ;;  %v1099_v32 = vor.u32 %v1098_v25, %v1097_v17  ;;  %v981_v41 = vshll.u32 %v5549_v53, %v978_v56  ;;  %v982_v46 = vshrl.u32 %v5550_v55, %v979_v30 }
 0x1e3   : > { %v1104_v33 = vsel %vm1100_vm4, %v1084_v7, %v1087_v27  ;;  %v1105_v35 = vsel %vm1103_vm7, %v1093_v29, 2102212464  ;;  %v1108_v36 = vsel %vm1100_vm4, %v1087_v27, %v1090_v28  ;;  %v1112_v37 = vsel %vm1100_vm4, %v1090_v28, %v1093_v29 }
 0x1e4   : > { %v1106_v38 = vsel %vm1102_vm6, %v1090_v28, %v1105_v35  ;;  %v1109_v39 = vsel %vm1103_vm7, %v1096_v31, 920167782  ;;  %v1113_v40 = vsel %vm1103_vm7, %v1099_v32, 1326507024  ;;  %v984_v47 = vshll.u32 %v5550_v55, %v978_v56 }
 0x1e5   : > { %v1110_v42 = vsel %vm1102_vm6, %v1093_v29, %v1109_v39  ;;  %v1114_v43 = vsel %vm1102_vm6, %v1096_v31, %v1113_v40  ;;  %v1107_v52 = vsel %vm1101_vm5, %v1104_v33, %v1106_v38  ;;  %v985_v13 = vshrl.u32 %v5551_v5, %v979_v30 }
 0x1e6   : > { %v1111_v54 = vsel %vm1101_vm5, %v1108_v36, %v1110_v42  ;;  %v1115_v58 = vsel %vm1101_vm5, %v1112_v37, %v1114_v43  ;;  %v983_v21 = vor.u32 %v982_v46, %v981_v41  ;;  %v987_v20 = vshll.u32 %v5551_v5, %v978_v56 }
 0x1e7   : > { %v5952_v15 = vmul.u32.u64.low %v5919_v48, %v1115_v58  ;;  %v5953_v17 = vmul.u32.u64.high %v5919_v48, %v1115_v58, %v5952_v15  ;;  %v5956_v18 = vmul.u32.u64.low %v5919_v48, %v1111_v54  ;;  %v5957_v19 = vmul.u32.u64.high %v5919_v48, %v1111_v54, %v5956_v18 }
 0x1e8   : > { %v986_v7 = vor.u32 %v985_v13, %v984_v47  ;;  %v988_v25 = vshrl.u32 %v5552_v14, %v979_v30  ;;  %v980_v27 = vshrl.u32 %v5549_v53, %v979_v30  ;;  %v990_v45 = vshll.u32 %v5552_v14, %v978_v56 }
 0x1e9   : > { %v991_v28 = vshrl.u32 %v5553_v16, %v979_v30  ;;  %v994_v29 = vshrl.u32 %v5554_v23, %v979_v30  ;;  %v1123_v31 = vmul.u32 %v5919_v48, %v1107_v52  ;;  %v993_v33 = vshll.u32 %v5553_v16, %v978_v56 }
 0x1ea   : > { %v989_v32 = vor.u32 %v988_v25, %v987_v20  ;;  %vm996_vm8 = vcmp.lt.s32.totalorder %v5921_v49, 1  ;;  %vm1125_vm9 = vc.u32 %v5953_v17, %v5956_v18  ;;  %v1126_v35 = vadd.s32 1, %v5957_v19 }
 0x1eb   : > { %v992_v36 = vor.u32 %v991_v28, %v990_v45  ;;  %vm997_vm10 = vcmp.lt.s32.totalorder %v5921_v49, 2  ;;  %v995_v37 = vor.u32 %v994_v29, %v993_v33  ;;  %vm998_vm11 = vcmp.lt.s32.totalorder %v5921_v49, 3 }
 0x1ec   : > { %vm999_vm12 = vcmp.lt.s32.totalorder %v5921_v49, 4  ;;  %v1004_v30 = vsel %vm996_vm8, %v983_v21, %v986_v7  ;;  %v1127_v48 = vsel %vm1125_vm9, %v1126_v35, %v5957_v19  ;;  %v1008_v56 = vsel %vm996_vm8, %v986_v7, %v989_v32 }
 0x1ed   : > { %v1001_v38 = vsel %vm999_vm12, %v989_v32, 2102212464  ;;  %v1005_v39 = vsel %vm999_vm12, %v992_v36, 920167782  ;;  %v1128_v40 = vadd.s32 %v1127_v48, %v1123_v31  ;;  %v1000_v41 = vsel %vm996_vm8, %v980_v27, %v983_v21 }
 0x1ee   : > { %v1006_v42 = vsel %vm998_vm11, %v989_v32, %v1005_v39  ;;  %v1009_v43 = vsel %vm999_vm12, %v995_v37, 1326507024  ;;  %v1002_v46 = vsel %vm998_vm11, %v986_v7, %v1001_v38  ;;  %v1286_v54 = vadd.s32 1, %v5929_v57 }
 0x1ef   : > { %v1007_v47 = vsel %vm997_vm10, %v1004_v30, %v1006_v42  ;;  %v1010_v52 = vsel %vm998_vm11, %v992_v36, %v1009_v43  ;;  %v1129_v58 = vadd.s32 536870912, %v1128_v40  ;;  %v1276_v7 = vand.u32 2147483647, %v5913_v34 }
 0x1f0   : > { %v1011_v13 = vsel %vm997_vm10, %v1008_v56, %v1010_v52  ;;  %v5980_v15 = vmul.u32.u64.low %v5923_v50, %v1007_v47  ;;  %v5981_v19 = vmul.u32.u64.high %v5923_v50, %v1007_v47, %v5980_v15  ;;  %vm1287_vm13 = vcmp.gt.s32.totalorder %v1286_v54, 0 }
 0x1f1   : > { %v5985_v21 = vmul.u32.u64.low %v5923_v50, %v1011_v13  ;;  %v5986_v20 = vmul.u32.u64.high %v5923_v50, %v1011_v13, %v5985_v21  ;;  %v5989_v25 = vshrl.u32 %v1129_v58, 30  ;;  %v1003_v57 = vsel %vm997_vm10, %v1000_v41, %v1002_v46 }
 0x1f2   : > { %v1288_v27 = vsel %vm1287_vm13, %v1286_v54, 0  ;;  %v898_v45 = vadd.f32 %v5926_v51, %v5917_v44  ;;  %v1022_v31 = vadd.s32 1, %v5981_v19  ;;  %v1019_v32 = vmul.u32 %v5923_v50, %v1003_v57 }
 0x1f3   : > { %v1290_v28 = vand.u32 31, %v1288_v27  ;;  %v1131_v29 = vshll.u32 %v5989_v25, 30  ;;  %vm1021_vm14 = vc.u32 %v5986_v20, %v5980_v15  ;;  %v1283_v33 = vand.u32 8388607, %v1276_v7 }
 0x1f4   : > { %v1023_v36 = vsel %vm1021_vm14, %v1022_v31, %v5981_v19  ;;  %v6004_v37 = vadd.f32 %v5890_v12, %v898_v45  ;;  %v1124_v30 = vadd.s32 %v5956_v18, %v5953_v17  ;;  %v1289_v43 = vshrl.u32 %v1288_v27, 5 }
 0x1f5   : > { %v1291_v35 = vsub.s32 32, %v1290_v28  ;;  %v1132_v49 = vsub.s32 %v1128_v40, %v1131_v29  ;;  %v1024_v44 = vadd.s32 %v1023_v36, %v1019_v32  ;;  %v1284_v38 = vor.u32 8388608, %v1283_v33 }
 0x1f6   : > { %v1175_v40 = vand.u32 2139095040, %v6004_v37  ;;  %v1293_v46 = vshll.u32 %v5549_v53, %v1290_v28  ;;  %v1296_v17 = vshll.u32 %v5550_v55, %v1290_v28  ;;  %v1299_v18 = vshll.u32 %v5551_v5, %v1290_v28 }
 0x1f7   : > { %v1134_v51 = vsub.s32 0, %v1132_v49  ;;  %v1025_v48 = vadd.s32 536870912, %v1024_v44  ;;  %v1294_v50 = vshrl.u32 %v5550_v55, %v1291_v35  ;;  %v1297_v56 = vshrl.u32 %v5551_v5, %v1291_v35 }
 0x1f8   : > { %v1300_v41 = vshrl.u32 %v5552_v14, %v1291_v35  ;;  %v1303_v47 = vshrl.u32 %v5553_v16, %v1291_v35  ;;  %v1306_v54 = vshrl.u32 %v5554_v23, %v1291_v35  ;;  %v1302_v19 = vshll.u32 %v5552_v14, %v1290_v28 }
 0x1f9   : > { %v4640_v39 = vmin.u32 %v1134_v51, %v1132_v49  ;;  %v6011_v42 = vshrl.u32 %v1025_v48, 30  ;;  %v1295_v13 = vor.u32 %v1294_v50, %v1293_v46  ;;  %v6020_v21 = vshll.u32 %v1284_v38, 8 }
 0x1fa   : > { %v1298_v27 = vor.u32 %v1297_v56, %v1296_v17  ;;  %v1301_v45 = vor.u32 %v1300_v41, %v1299_v18  ;;  %v1305_v29 = vshll.u32 %v5553_v16, %v1290_v28  ;;  %v1154_v31 = vsub.s32 4, %v5989_v25 }
 0x1fb   : > { %v1136_v52 = vclz %v4640_v39  ;;  %v1027_v58 = vshll.u32 %v6011_v42, 30  ;;  %v1304_v33 = vor.u32 %v1303_v47, %v1302_v19  ;;  %v1176_v36 = vshrl.u32 %v1175_v40, 23 }
 0x1fc   : > { %v1292_v51 = vshrl.u32 %v5549_v53, %v1291_v35  ;;  %v1307_v48 = vor.u32 %v1306_v54, %v1305_v29  ;;  %vm1308_vm0 = vcmp.lt.s32.totalorder %v1289_v43, 1  ;;  %vm1310_vm2 = vcmp.lt.s32.totalorder %v1289_v43, 3 }
 0x1fd   : > { %v4641_v57 = vadd.s32 4294967294, %v1136_v52  ;;  %v6024_v32 = vsub.s32 %v1024_v44, %v1027_v58  ;;  %vm1311_vm3 = vcmp.lt.s32.totalorder %v1289_v43, 4  ;;  %v1316_v44 = vsel %vm1308_vm0, %v1295_v13, %v1298_v27 }
 0x1fe   : > { %v1313_v56 = vsel %vm1311_vm3, %v1301_v45, 2102212464  ;;  %v1317_v46 = vsel %vm1311_vm3, %v1304_v33, 920167782  ;;  %v1320_v35 = vsel %vm1308_vm0, %v1298_v27, %v1301_v45  ;;  %v1321_v18 = vsel %vm1311_vm3, %v1307_v48, 1326507024 }
 0x1ff   : > { %vm4642_vm15 = vcmp.lt.s32.totalorder %v4641_v57, 0  ;;  %v1030_v50 = vsub.s32 0, %v6024_v32  ;;  %v1318_v17 = vsel %vm1310_vm2, %v1301_v45, %v1317_v46  ;;  %vm6035_vm4 = vcmp.le.f32.partialorder %v1068_v24, 0.7853982 }
 0x200   : > { %v1139_v38 = vsel %vm4642_vm15, 0, %v4641_v57  ;;  %vm1309_vm5 = vcmp.lt.s32.totalorder %v1289_v43, 2  ;;  %v1314_v19 = vsel %vm1310_vm2, %v1298_v27, %v1313_v56  ;;  %vm966_vm6 = vcmp.lt.s32.totalorder %v5900_v8, 0 }
 0x201   : > { %v1140_v39 = vsub.s32 32, %v1139_v38  ;;  %v1144_v28 = vsub.s32 4294967266, %v1139_v38  ;;  %v1141_v41 = vshll.u32 %v1132_v49, %v1139_v38  ;;  %v4636_v40 = vmin.u32 %v1030_v50, %v6024_v32 }
 0x202   : > { %v1312_v49 = vsel %vm1308_vm0, %v1292_v51, %v1295_v13  ;;  %v1322_v45 = vsel %vm1310_vm2, %v1304_v33, %v1321_v18  ;;  %v1172_v51 = vand.u32 2147483647, %v6004_v37  ;;  %v4643_v56 = vadd.s32 4294967169, %v1176_v36 }
 0x203   : > { %v1142_v47 = vshrl.u32 %v1124_v30, %v1140_v39  ;;  %v1145_v52 = vadd.s32 127, %v1144_v28  ;;  %v1032_v58 = vclz %v4636_v40  ;;  %v1319_v30 = vsel %vm1309_vm5, %v1316_v44, %v1318_v17 }
 0x204   : > { %v1323_v24 = vsel %vm1309_vm5, %v1320_v35, %v1322_v45  ;;  %v6046_v38 = vmul.u32.u64.low %v6020_v21, %v1319_v30  ;;  %v6047_v50 = vmul.u32.u64.high %v6020_v21, %v1319_v30, %v6046_v38  ;;  %v1020_v28 = vadd.s32 %v5980_v15, %v5986_v20 }
 0x205   : > { %v1143_v57 = vor.u32 %v1142_v47, %v1141_v41  ;;  %v1146_v29 = vshll.u32 %v1145_v52, 23  ;;  %v4637_v48 = vadd.s32 4294967294, %v1032_v58  ;;  %v1315_v33 = vsel %vm1309_vm5, %v1312_v49, %v1314_v19 }
 0x206   : > { %v6051_v13 = vmul.u32.u64.low %v6020_v21, %v1323_v24  ;;  %v6052_v27 = vmul.u32.u64.high %v6020_v21, %v1323_v24, %v6051_v13  ;;  %v1155_v40 = vsel %vm1070_vm1, %v1154_v31, %v5989_v25  ;;  %v1050_v52 = vsub.s32 4, %v6011_v42 }
 0x207   : > { %v1147_v39 = vor.u32 4788187, %v1146_v29  ;;  %vm4638_vm7 = vcmp.lt.s32.totalorder %v4637_v48, 0  ;;  %v1150_v41 = vcvt.s32.f32 %v1143_v57  ;;  %v1334_v17 = vadd.s32 1, %v6047_v50 }
 0x208   : > { %v1035_v46 = vsel %vm4638_vm7, 0, %v4637_v48  ;;  %v1331_v15 = vmul.u32 %v6020_v21, %v1315_v33  ;;  %vm1333_vm8 = vc.u32 %v6052_v27, %v6046_v38  ;;  %v1182_v20 = vadd.s32 1, %v4643_v56  ;;  %v712_v33 = vpop.permute.xlu0 %711 }
 0x209   : > { %v1148_v44 = vand.u32 2147483647, %v1147_v39  ;;  %v1036_v35 = vsub.s32 32, %v1035_v46  ;;  %v1040_v47 = vsub.s32 4294967266, %v1035_v46  ;;  %v1037_v43 = vshll.u32 %v6024_v32, %v1035_v46 }
 0x20a   : > { %v1335_v25 = vsel %vm1333_vm8, %v1334_v17, %v6047_v50  ;;  %v1157_v49 = vsel %vm6035_vm4, 0, %v1155_v40  ;;  %vm1183_vm9 = vcmp.gt.s32.totalorder %v1182_v20, 0  ;;  %v1051_v21 = vsel %vm966_vm6, %v1050_v52, %v6011_v42 }
 0x20b   : > { %v1151_v18 = vmul.f32 %v1150_v41, %v1148_v44  ;;  %v1038_v36 = vshrl.u32 %v1020_v28, %v1036_v35  ;;  %v1041_v58 = vadd.s32 127, %v1040_v47  ;;  %v1336_v19 = vadd.s32 %v1335_v25, %v1331_v15  ;;  %v716_v28 = vpop.permute.xlu1 %715 }
 0x20c   : > { %v1184_v30 = vsel %vm1183_vm9, %v1182_v20, 0  ;;  %vm6077_vm10 = vcmp.le.f32.partialorder %v964_v26, 0.7853982  ;;  %v1161_v39 = vadd.s32 3, %v1157_v49  ;;  %v1179_v42 = vand.u32 8388607, %v1172_v51 }
 0x20d   : > { %v1152_v31 = vxor.u32 2147483648, %v1151_v18  ;;  %v1039_v57 = vor.u32 %v1038_v36, %v1037_v43  ;;  %v1042_v29 = vshll.u32 %v1041_v58, 23  ;;  %v1337_v48 = vadd.s32 536870912, %v1336_v19 }
 0x20e   : > { %v1186_v24 = vand.u32 31, %v1184_v30  ;;  %v1053_v26 = vsel %vm6077_vm10, 0, %v1051_v21  ;;  %v657_v41 = vmul.f32 %v5887_v11, %v5857_v59  ;;  %v6096_v46 = vmul.f32 %v5887_v11, %v5859_v60 }
 0x20f   : > { %v1153_v32 = vsel %vm1070_vm1, %v1152_v31, %v1151_v18  ;;  %v1043_v13 = vor.u32 4788187, %v1042_v29  ;;  %v6088_v56 = vshrl.u32 %v1337_v48, 30  ;;  %v1046_v40 = vcvt.s32.f32 %v1039_v57 }
 0x210   : > { %v1156_v50 = vsel %vm6035_vm4, %v5897_v22, %v1153_v32  ;;  %v6090_v44 = vsub.s32 32, %v1186_v24  ;;  %v869_v47 = vmul.f32 %v5884_v10, %v716_v28  ;;  %v6101_v52 = vmul.f32 %v5884_v10, %v712_v33 }
 0x211   : > { %5188 = vcosq.f32 %v1156_v50  ;;  %v1044_v54 = vand.u32 2147483647, %v1043_v13  ;;  %v1339_v35 = vshll.u32 %v6088_v56, 30  ;;  %v6103_v17 = vand.u32 3, %v1161_v39 }
 0x212   : > { %5190 = vsinq.f32 %v1156_v50  ;;  %v1057_v15 = vadd.s32 3, %v1053_v26  ;;  %v1180_v20 = vor.u32 8388608, %v1179_v42  ;;  %v1193_v43 = vshrl.u32 %v5551_v5, %v6090_v44 }
 0x213   : > { %v1047_v18 = vmul.f32 %v1046_v40, %v1044_v54  ;;  %v6105_v59 = vsub.s32 %v1336_v19, %v1339_v35  ;;  %v1196_v60 = vshrl.u32 %v5552_v14, %v6090_v44  ;;  %v1199_v36 = vshrl.u32 %v5553_v16, %v6090_v44 }
 0x214   : > { %v6113_v25 = vshrl.u32 %v1184_v30, 5  ;;  %v1190_v31 = vshrl.u32 %v5550_v55, %v6090_v44  ;;  %v1198_v49 = vshll.u32 %v5552_v14, %v1186_v24  ;;  %v1189_v57 = vshll.u32 %v5549_v53, %v1186_v24 }
 0x215   : > { %v1048_v58 = vxor.u32 2147483648, %v1047_v18  ;;  %v1342_v19 = vsub.s32 0, %v6105_v59  ;;  %v1192_v29 = vshll.u32 %v5550_v55, %v1186_v24  ;;  %v1195_v21 = vshll.u32 %v5551_v5, %v1186_v24 }
 0x216   : > { %v1200_v48 = vor.u32 %v1199_v36, %v1198_v49  ;;  %v1201_v30 = vshll.u32 %v5553_v16, %v1186_v24  ;;  %v1202_v50 = vshrl.u32 %v5554_v23, %v6090_v44  ;;  %v1191_v33 = vor.u32 %v1190_v31, %v1189_v57 }
 0x217   : > { %v1049_v32 = vsel %vm966_vm6, %v1048_v58, %v1047_v18  ;;  %v4648_v13 = vmin.u32 %v1342_v19, %v6105_v59  ;;  %v1194_v42 = vor.u32 %v1193_v43, %v1192_v29  ;;  %v1197_v28 = vor.u32 %v1196_v60, %v1195_v21 }
 0x218   : > { %v1052_v39 = vsel %vm6077_vm10, %v5900_v8, %v1049_v32  ;;  %v1203_v26 = vor.u32 %v1202_v50, %v1201_v30  ;;  %v901_v54 = vadd.f32 %v869_v47, %v657_v41  ;;  %vm1164_vm11 = vcmp.eq.s32.totalorder %v6103_v17, 0 }
 0x219   : > { %5192 = vcosq.f32 %v1052_v39  ;;  %v1344_v40 = vclz %v4648_v13  ;;  %vm1207_vm12 = vcmp.lt.s32.totalorder %v6113_v25, 4  ;;  %vm1167_vm13 = vcmp.eq.s32.totalorder %v6103_v17, 2 }
 0x21a   : > { %5194 = vsinq.f32 %v1052_v39  ;;  %v6134_v24 = vand.u32 3, %v1057_v15  ;;  %vm1204_vm14 = vcmp.lt.s32.totalorder %v6113_v25, 1  ;;  %v1213_v45 = vsel %vm1207_vm12, %v1200_v48, 920167782 }
 0x21b   : > { %v4649_v35 = vadd.s32 4294967294, %v1344_v40  ;;  %vm1206_vm15 = vcmp.lt.s32.totalorder %v6113_v25, 3  ;;  %v1216_v41 = vsel %vm1204_vm14, %v1194_v42, %v1197_v28  ;;  %v6142_v47 = vshll.u32 %v1180_v20, 8 }
 0x21c   : > { %vm1163_vm0 = vcmp.lt.s32.totalorder %v6103_v17, 2  ;;  %v1212_v15 = vsel %vm1204_vm14, %v1191_v33, %v1194_v42  ;;  %v1214_v43 = vsel %vm1206_vm15, %v1197_v28, %v1213_v45  ;;  %v1217_v60 = vsel %vm1207_vm12, %v1203_v26, 1326507024 }
 0x21d   : > { %v6152_v36 = vadd.f32 %v5890_v12, %v901_v54  ;;  %vm4650_vm1 = vcmp.lt.s32.totalorder %v4649_v35, 0  ;;  %vm1205_vm2 = vcmp.lt.s32.totalorder %v6113_v25, 2  ;;  %v1218_v20 = vsel %vm1206_vm15, %v1200_v48, %v1217_v60 }
 0x21e   : > { %v5189_v18 = vpop.eup %5188  ;;  %v1347_v19 = vsel %vm4650_vm1, 0, %v4649_v35  ;;  %v1209_v57 = vsel %vm1207_vm12, %v1197_v28, 2102212464  ;;  %v1219_v29 = vsel %vm1205_vm2, %v1216_v41, %v1218_v20  ;;  %v1332_v21 = vadd.s32 %v6046_v38, %v6052_v27 }
 0x21f   : > { %v5191_v58 = vpop.eup %5190  ;;  %v1168_v31 = vxor.u32 2147483648, %v5189_v18  ;;  %v1352_v32 = vsub.s32 4294967266, %v1347_v19  ;;  %v1188_v30 = vshrl.u32 %v5549_v53, %v6090_v44  ;;  %v1215_v50 = vsel %vm1205_vm2, %v1212_v15, %v1214_v43 }
 0x220   : > { %v1165_v49 = vxor.u32 2147483648, %v5191_v58  ;;  %vm1160_vm3 = vweird.f32 %v5897_v22  ;;  %v1348_v48 = vsub.s32 32, %v1347_v19  ;;  %v1487_v28 = vand.u32 2139095040, %v6152_v36 }
 0x221   : > { %v6169_v39 = vmul.u32.u64.low %v6142_v47, %v1219_v29  ;;  %v6170_v13 = vmul.u32.u64.high %v6142_v47, %v1219_v29, %v6169_v39  ;;  %v1169_v26 = vsel %vm1167_vm13, %v1168_v31, %v5191_v58  ;;  %vm1278_vm4 = vcmp.lt.s32.totalorder %v5913_v34, 0 }
 0x222   : > { %v1353_v38 = vadd.s32 127, %v1352_v32  ;;  %v1208_v27 = vsel %vm1204_vm14, %v1188_v30, %v1191_v33  ;;  %v1210_v44 = vsel %vm1206_vm15, %v1194_v42, %v1209_v57  ;;  %v1166_v54 = vsel %vm1164_vm11, %v5189_v18, %v1165_v49 }
 0x223   : > { %vm1056_vm5 = vweird.f32 %v5900_v8  ;;  %v6184_v40 = vmul.u32.u64.low %v6142_v47, %v1215_v50  ;;  %v6185_v45 = vmul.u32.u64.high %v6142_v47, %v1215_v50, %v6184_v40  ;;  %v1488_v35 = vshrl.u32 %v1487_v28, 23 }
 0x224   : > { %vm1059_vm6 = vcmp.lt.s32.totalorder %v6134_v24, 2  ;;  %vm1060_vm7 = vcmp.eq.s32.totalorder %v6134_v24, 0  ;;  %v1354_v41 = vshll.u32 %v1353_v38, 23  ;;  %v900_v33 = vadd.f32 %v6101_v52, %v6096_v46 }
 0x225   : > { %vm1063_vm8 = vcmp.eq.s32.totalorder %v6134_v24, 2  ;;  %v1350_v42 = vshrl.u32 %v1332_v21, %v1348_v48  ;;  %v1211_v18 = vsel %vm1205_vm2, %v1208_v27, %v1210_v44  ;;  %v4655_v15 = vadd.s32 4294967169, %v1488_v35 }
 0x226   : > { %v5193_v43 = vpop.eup %5192  ;;  %v1170_v60 = vsel %vm1163_vm0, %v1166_v54, %v1169_v26  ;;  %v1349_v58 = vshll.u32 %v6105_v59, %v1347_v19  ;;  %v1362_v31 = vsub.s32 4, %v6088_v56  ;;  %vm1229_vm9 = vc.u32 %v6170_v13, %v6184_v40 }
 0x227   : > { %v5195_v46 = vpop.eup %5194  ;;  %v1064_v52 = vxor.u32 2147483648, %v5193_v43  ;;  %v1355_v20 = vor.u32 4788187, %v1354_v41  ;;  %v1230_v49 = vadd.s32 1, %v6185_v45  ;;  %v1494_v25 = vadd.s32 1, %v4655_v15 }
 0x228   : > { %v1061_v57 = vxor.u32 2147483648, %v5195_v46  ;;  %v1227_v29 = vmul.u32 %v6142_v47, %v1211_v18  ;;  %v1484_v21 = vand.u32 2147483647, %v6152_v36  ;;  %v6205_v17 = vadd.f32 %v5890_v12, %v900_v33 }
 0x229   : > { %v1065_v59 = vsel %vm1063_vm8, %v1064_v52, %v5195_v46  ;;  %v1351_v19 = vor.u32 %v1350_v42, %v1349_v58  ;;  %v1231_v32 = vsel %vm1229_vm9, %v1230_v49, %v6185_v45  ;;  %vm1495_vm10 = vcmp.gt.s32.totalorder %v1494_v25, 0 }
 0x22a   : > { %v1171_v30 = vsel %vm1160_vm3, nan, %v1170_v60  ;;  %v1062_v50 = vsel %vm1060_vm7, %v5193_v43, %v1061_v57  ;;  %v1232_v47 = vadd.s32 %v1231_v32, %v1227_v29  ;;  %v1496_v48 = vsel %vm1495_vm10, %v1494_v25, 0 }
 0x22b   : > { %v1066_v39 = vsel %vm1059_vm6, %v1062_v50, %v1065_v59  ;;  %v1356_v28 = vand.u32 2147483647, %v1355_v20  ;;  %v6220_v26 = vsel %vm1278_vm4, %v1362_v31, %v6088_v56  ;;  %v1498_v38 = vand.u32 31, %v1496_v48 }
 0x22c   : > { %v1067_v27 = vsel %vm1056_vm5, nan, %v1066_v39  ;;  %vm6226_vm11 = vcmp.le.f32.partialorder %v1276_v7, 0.7853982  ;;  %v1233_v44 = vadd.s32 536870912, %v1232_v47  ;;  %v1358_v24 = vcvt.s32.f32 %v1351_v19 }
 0x22d   : > { %v4838_v54 = vpack.c.bf16 %v1171_v30, %v1067_v27  ;;  %v1491_v45 = vand.u32 8388607, %v1484_v21  ;;  %v1499_v35 = vsub.s32 32, %v1498_v38  ;;  %v1365_v56 = vsel %vm6226_vm11, 0, %v6220_v26 }
 0x22e   : > { %v6235_v41 = vshrl.u32 %v1233_v44, 30  ;;  %v1383_v8 = vand.u32 2139095040, %v6205_v17  ;;  %v1359_v7 = vmul.f32 %v1358_v24, %v1356_v28  ;;  %v1501_v33 = vshll.u32 %v5549_v53, %v1498_v38 }
 0x22f   : > { %4839 = vst [vmem:[%s6238_s7] sm:$0xff] %v4838_v54   ;;  %v1502_v42 = vshrl.u32 %v5550_v55, %v1499_v35  ;;  %v1505_v18 = vshrl.u32 %v5551_v5, %v1499_v35  ;;  %v1504_v43 = vshll.u32 %v5550_v55, %v1498_v38  ;;  %v1507_v60 = vshll.u32 %v5551_v5, %v1498_v38 }
 0x230   : > { %v1235_v15 = vshll.u32 %v6235_v41, 30  ;;  %v1508_v58 = vshrl.u32 %v5552_v14, %v1499_v35  ;;  %v1492_v31 = vor.u32 8388608, %v1491_v45  ;;  %v1497_v46 = vshrl.u32 %v1496_v48, 5 }
 0x231   : > { %v1510_v52 = vshll.u32 %v5552_v14, %v1498_v38  ;;  %v1511_v20 = vshrl.u32 %v5553_v16, %v1499_v35  ;;  %v1503_v25 = vor.u32 %v1502_v42, %v1501_v33  ;;  %v1506_v57 = vor.u32 %v1505_v18, %v1504_v43 }
 0x232   : > { %v6250_v49 = vsub.s32 %v1232_v47, %v1235_v15  ;;  %v1509_v29 = vor.u32 %v1508_v58, %v1507_v60  ;;  %v1513_v19 = vshll.u32 %v5553_v16, %v1498_v38  ;;  %v1514_v32 = vshrl.u32 %v5554_v23, %v1499_v35 }
 0x233   : > { %v1512_v59 = vor.u32 %v1511_v20, %v1510_v52  ;;  %v1380_v30 = vand.u32 2147483647, %v6205_v17  ;;  %v1360_v50 = vxor.u32 2147483648, %v1359_v7  ;;  %v1500_v48 = vshrl.u32 %v5549_v53, %v1499_v35 }
 0x234   : > { %v1238_v39 = vsub.s32 0, %v6250_v49  ;;  %v1384_v28 = vshrl.u32 %v1383_v8, 23  ;;  %v1515_v26 = vor.u32 %v1514_v32, %v1513_v19  ;;  %vm1516_vm12 = vcmp.lt.s32.totalorder %v1497_v46, 1 }
 0x235   : > { %vm1518_vm13 = vcmp.lt.s32.totalorder %v1497_v46, 3  ;;  %vm1519_vm14 = vcmp.lt.s32.totalorder %v1497_v46, 4  ;;  %v1524_v44 = vsel %vm1516_vm12, %v1503_v25, %v1506_v57  ;;  %v1528_v24 = vsel %vm1516_vm12, %v1506_v57, %v1509_v29 }
 0x236   : > { %v4644_v47 = vmin.u32 %v1238_v39, %v6250_v49  ;;  %v1521_v27 = vsel %vm1519_vm14, %v1509_v29, 2102212464  ;;  %v1525_v54 = vsel %vm1519_vm14, %v1512_v59, 920167782  ;;  %v1529_v45 = vsel %vm1519_vm14, %v1515_v26, 1326507024 }
 0x237   : > { %v1526_v38 = vsel %vm1518_vm13, %v1509_v29, %v1525_v54  ;;  %v1532_v33 = vshll.u32 %v1492_v31, 8  ;;  %v1361_v42 = vsel %vm1278_vm4, %v1360_v50, %v1359_v7  ;;  %vm1517_vm15 = vcmp.lt.s32.totalorder %v1497_v46, 2 }
 0x238   : > { %v1240_v18 = vclz %v4644_v47  ;;  %v1520_v35 = vsel %vm1516_vm12, %v1500_v48, %v1503_v25  ;;  %v1522_v8 = vsel %vm1518_vm13, %v1506_v57, %v1521_v27  ;;  %v1527_v15 = vsel %vm1517_vm15, %v1524_v44, %v1526_v38 }
 0x239   : > { %v1530_v43 = vsel %vm1518_vm13, %v1512_v59, %v1529_v45  ;;  %v4651_v60 = vadd.s32 4294967169, %v1384_v28  ;;  %v6263_v20 = vmul.u32.u64.low %v1532_v33, %v1527_v15  ;;  %v6264_v19 = vmul.u32.u64.high %v1532_v33, %v1527_v15, %v6263_v20 }
 0x23a   : > { %v4645_v58 = vadd.s32 4294967294, %v1240_v18  ;;  %v1531_v52 = vsel %vm1517_vm15, %v1528_v24, %v1530_v43  ;;  %v1364_v31 = vsel %vm6226_vm11, %v5913_v34, %v1361_v42  ;;  %v6275_v57 = vmul.f32 %v5887_v11, %v5863_v61 }
 0x23b   : > { %v6270_v7 = vmul.u32.u64.low %v1532_v33, %v1531_v52  ;;  %v6271_v29 = vmul.u32.u64.high %v1532_v33, %v1531_v52, %v6270_v7  ;;  %v1390_v25 = vadd.s32 1, %v4651_v60  ;;  %v1523_v46 = vsel %vm1517_vm15, %v1520_v35, %v1522_v8 }
 0x23c   : > { %vm4646_vm0 = vcmp.lt.s32.totalorder %v4645_v58, 0  ;;  %v1369_v59 = vadd.s32 3, %v1365_v56  ;;  %v1228_v32 = vadd.s32 %v6184_v40, %v6170_v13  ;;  %5196 = vcosq.f32 %v1364_v31 }
 0x23d   : > { %v1243_v50 = vsel %vm4646_vm0, 0, %v4645_v58  ;;  %vm1391_vm1 = vcmp.gt.s32.totalorder %v1390_v25, 0  ;;  %v1387_v48 = vand.u32 8388607, %v1380_v30  ;;  %v1258_v28 = vsub.s32 4, %v6235_v41 }
 0x23e   : > { %v1244_v39 = vsub.s32 32, %v1243_v50  ;;  %v1248_v22 = vsub.s32 4294967266, %v1243_v50  ;;  %v1539_v26 = vmul.u32 %v1532_v33, %v1523_v46  ;;  %vm1541_vm2 = vc.u32 %v6271_v29, %v6263_v20 }
 0x23f   : > { %v1542_v61 = vadd.s32 1, %v6264_v19  ;;  %v1245_v56 = vshll.u32 %v6250_v49, %v1243_v50  ;;  %v1392_v40 = vsel %vm1391_vm1, %v1390_v25, 0  ;;  %v6288_v27 = vmul.f32 %v5887_v11, %v5865_v62 }
 0x240   : > { %v1246_v47 = vshrl.u32 %v1228_v32, %v1244_v39  ;;  %v1249_v13 = vadd.s32 127, %v1248_v22  ;;  %v6292_v44 = vmul.f32 %v5887_v11, %v5867_v63  ;;  %v1394_v38 = vand.u32 31, %v1392_v40  ;;  %v727_v22 = vpop.permute.xlu1 %726 }
 0x241   : > { %v1543_v54 = vsel %vm1541_vm2, %v1542_v61, %v6264_v19  ;;  %5198 = vsinq.f32 %v1364_v31  ;;  %v6295_v42 = vand.u32 3, %v1369_v59  ;;  %vm6299_vm3 = vcmp.le.f32.partialorder %v1172_v51, 0.7853982 }
 0x242   : > { %v1247_v24 = vor.u32 %v1246_v47, %v1245_v56  ;;  %v1250_v45 = vshll.u32 %v1249_v13, 23  ;;  %v1544_v33 = vadd.s32 %v1543_v54, %v1539_v26  ;;  %vm1174_vm4 = vcmp.lt.s32.totalorder %v6004_v37, 0 }
 0x243   : > { %v1395_v62 = vsub.s32 32, %v1394_v38  ;;  %v1259_v18 = vsel %vm1174_vm4, %v1258_v28, %v6235_v41  ;;  %v1388_v8 = vor.u32 8388608, %v1387_v48  ;;  %v1397_v43 = vshll.u32 %v5549_v53, %v1394_v38 }
 0x244   : > { %v1251_v63 = vor.u32 4788187, %v1250_v45  ;;  %v1545_v35 = vadd.s32 536870912, %v1544_v33  ;;  %v1254_v15 = vcvt.s32.f32 %v1247_v24  ;;  %v1261_v7 = vsel %vm6299_vm3, 0, %v1259_v18 }
 0x245   : > { %v1398_v60 = vshrl.u32 %v5550_v55, %v1395_v62  ;;  %v1401_v51 = vshrl.u32 %v5551_v5, %v1395_v62  ;;  %v1404_v19 = vshrl.u32 %v5552_v14, %v1395_v62  ;;  %v1407_v31 = vshrl.u32 %v5553_v16, %v1395_v62 }
 0x246   : > { %v1252_v58 = vand.u32 2147483647, %v1251_v63  ;;  %v6310_v52 = vshrl.u32 %v1545_v35, 30  ;;  %v1393_v41 = vshrl.u32 %v1392_v40, 5  ;;  %v1400_v25 = vshll.u32 %v5550_v55, %v1394_v38 }
 0x247   : > { %v1406_v46 = vshll.u32 %v5552_v14, %v1394_v38  ;;  %v1399_v50 = vor.u32 %v1398_v60, %v1397_v43  ;;  %v1403_v39 = vshll.u32 %v5551_v5, %v1394_v38  ;;  %v1409_v26 = vshll.u32 %v5553_v16, %v1394_v38 }
 0x248   : > { %v1255_v59 = vmul.f32 %v1254_v15, %v1252_v58  ;;  %v1547_v32 = vshll.u32 %v6310_v52, 30  ;;  %v1402_v48 = vor.u32 %v1401_v51, %v1400_v25  ;;  %v1410_v61 = vshrl.u32 %v5554_v23, %v1395_v62 }
 0x249   : > { %v1408_v28 = vor.u32 %v1407_v31, %v1406_v46  ;;  %v1405_v13 = vor.u32 %v1404_v19, %v1403_v39  ;;  %v6324_v40 = vshll.u32 %v1388_v8, 8  ;;  %v5197_v54 = vpop.eup %5196  ;;  %v1396_v24 = vshrl.u32 %v5549_v53, %v1395_v62 }
 0x24a   : > { %v1256_v56 = vxor.u32 2147483648, %v1255_v59  ;;  %v6322_v47 = vsub.s32 %v1544_v33, %v1547_v32  ;;  %v1411_v45 = vor.u32 %v1410_v61, %v1409_v26  ;;  %vm1412_vm5 = vcmp.lt.s32.totalorder %v1393_v41, 1 }
 0x24b   : > { %v871_v63 = vmul.f32 %v5884_v10, %v727_v22  ;;  %vm1375_vm6 = vcmp.eq.s32.totalorder %v6295_v42, 2  ;;  %vm1413_vm7 = vcmp.lt.s32.totalorder %v1393_v41, 2  ;;  %vm1415_vm8 = vcmp.lt.s32.totalorder %v1393_v41, 4 }
 0x24c   : > { %v1257_v38 = vsel %vm1174_vm4, %v1256_v56, %v1255_v59  ;;  %v1550_v18 = vsub.s32 0, %v6322_v47  ;;  %vm1372_vm9 = vcmp.eq.s32.totalorder %v6295_v42, 0  ;;  %vm1414_vm10 = vcmp.lt.s32.totalorder %v1393_v41, 3  ;;  %v723_v59 = vpop.permute.xlu0 %722 }
 0x24d   : > { %v1260_v33 = vsel %vm6299_vm3, %v6004_v37, %v1257_v38  ;;  %v1420_v62 = vsel %vm1412_vm5, %v1399_v50, %v1402_v48  ;;  %v1421_v35 = vsel %vm1415_vm8, %v1408_v28, 920167782  ;;  %v1417_v15 = vsel %vm1415_vm8, %v1405_v13, 2102212464 }
 0x24e   : > { %5200 = vcosq.f32 %v1260_v33  ;;  %v4656_v8 = vmin.u32 %v1550_v18, %v6322_v47  ;;  %v1422_v43 = vsel %vm1414_vm10, %v1405_v13, %v1421_v35  ;;  %v5199_v60 = vpop.eup %5198  ;;  %v1424_v58 = vsel %vm1412_vm5, %v1402_v48, %v1405_v13 }
 0x24f   : > { %5202 = vsinq.f32 %v1260_v33  ;;  %v1423_v51 = vsel %vm1413_vm7, %v1420_v62, %v1422_v43  ;;  %v1425_v19 = vsel %vm1415_vm8, %v1411_v45, 1326507024  ;;  %v1376_v31 = vxor.u32 2147483648, %v5197_v54 }
 0x250   : > { %v1265_v49 = vadd.s32 3, %v1261_v7  ;;  %v1552_v25 = vclz %v4656_v8  ;;  %v1416_v46 = vsel %vm1412_vm5, %v1396_v24, %v1399_v50  ;;  %v1418_v32 = vsel %vm1414_vm10, %v1402_v48, %v1417_v15 }
 0x251   : > { %v1426_v39 = vsel %vm1414_vm10, %v1408_v28, %v1425_v19  ;;  %v6345_v22 = vmul.u32.u64.low %v6324_v40, %v1423_v51  ;;  %v6346_v26 = vmul.u32.u64.high %v6324_v40, %v1423_v51, %v6345_v22  ;;  %vm1371_vm11 = vcmp.lt.s32.totalorder %v6295_v42, 2 }
 0x252   : > { %v1373_v61 = vxor.u32 2147483648, %v5199_v60  ;;  %v4657_v56 = vadd.s32 4294967294, %v1552_v25  ;;  %v1427_v13 = vsel %vm1413_vm7, %v1424_v58, %v1426_v39  ;;  %v903_v7 = vadd.f32 %v871_v63, %v6275_v57 }
 0x253   : > { %vm1486_vm12 = vcmp.lt.s32.totalorder %v6152_v36, 0  ;;  %v6354_v50 = vmul.u32.u64.low %v6324_v40, %v1427_v13  ;;  %v6355_v48 = vmul.u32.u64.high %v6324_v40, %v1427_v13, %v6354_v50  ;;  %v870_v28 = vmul.f32 %v5884_v10, %v723_v59 }
 0x254   : > { %v1266_v24 = vand.u32 3, %v1265_v49  ;;  %vm4658_vm13 = vcmp.lt.s32.totalorder %v4657_v56, 0  ;;  %v1419_v45 = vsel %vm1413_vm7, %v1416_v46, %v1418_v32  ;;  %v6360_v38 = vadd.f32 %v5890_v12, %v903_v7 }
 0x255   : > { %vm1368_vm14 = vweird.f32 %v5913_v34  ;;  %v1377_v57 = vsel %vm1375_vm6, %v1376_v31, %v5199_v60  ;;  %v1540_v63 = vadd.s32 %v6263_v20, %v6271_v29  ;;  %v1555_v18 = vsel %vm4658_vm13, 0, %v4657_v56  ;;  %v738_v31 = vpop.permute.xlu1 %737 }
 0x256   : > { %v1438_v33 = vadd.s32 1, %v6346_v26  ;;  %v1374_v62 = vsel %vm1372_vm9, %v5197_v54, %v1373_v61  ;;  %v1556_v35 = vsub.s32 32, %v1555_v18  ;;  %v1560_v41 = vsub.s32 4294967266, %v1555_v18 }
 0x257   : > { %v1570_v8 = vsub.s32 4, %v6310_v52  ;;  %vm6373_vm15 = vcmp.le.f32.partialorder %v1484_v21, 0.7853982  ;;  %v1435_v43 = vmul.u32 %v6324_v40, %v1419_v45  ;;  %vm1437_vm0 = vc.u32 %v6355_v48, %v6345_v22 }
 0x258   : > { %v1695_v20 = vand.u32 2139095040, %v6360_v38  ;;  %v902_v29 = vadd.f32 %v870_v28, %v6288_v27  ;;  %vm1264_vm1 = vweird.f32 %v6004_v37  ;;  %v1557_v54 = vshll.u32 %v6322_v47, %v1555_v18 }
 0x259   : > { %v1558_v60 = vshrl.u32 %v1540_v63, %v1556_v35  ;;  %v1561_v51 = vadd.s32 127, %v1560_v41  ;;  %v1439_v21 = vsel %vm1437_vm0, %v1438_v33, %v6346_v26  ;;  %vm1267_vm2 = vcmp.lt.s32.totalorder %v1266_v24, 2  ;;  %v734_v35 = vpop.permute.xlu0 %733 }
 0x25a   : > { %v1440_v58 = vadd.s32 %v1439_v21, %v1435_v43  ;;  %v1692_v19 = vand.u32 2147483647, %v6360_v38  ;;  %v1696_v40 = vshrl.u32 %v1695_v20, 23  ;;  %vm1268_vm3 = vcmp.eq.s32.totalorder %v1266_v24, 0 }
 0x25b   : > { %vm1271_vm4 = vcmp.eq.s32.totalorder %v1266_v24, 2  ;;  %v1559_v49 = vor.u32 %v1558_v60, %v1557_v54  ;;  %v1562_v25 = vshll.u32 %v1561_v51, 23  ;;  %v5201_v46 = vpop.eup %5200  ;;  %v1378_v27 = vsel %vm1371_vm11, %v1374_v62, %v1377_v57 }
 0x25c   : > { %v1441_v59 = vadd.s32 536870912, %v1440_v58  ;;  %v4663_v47 = vadd.s32 4294967169, %v1696_v40  ;;  %v6389_v32 = vadd.f32 %v5890_v12, %v902_v29  ;;  %v5203_v39 = vpop.eup %5202  ;;  %v1272_v26 = vxor.u32 2147483648, %v5201_v46 }
 0x25d   : > { %v1563_v61 = vor.u32 4788187, %v1562_v25  ;;  %v1571_v56 = vsel %vm1486_vm12, %v1570_v8, %v6310_v52  ;;  %v873_v13 = vmul.f32 %v5884_v10, %v738_v31  ;;  %v1269_v7 = vxor.u32 2147483648, %v5203_v39 }
 0x25e   : > { %v6395_v50 = vshrl.u32 %v1441_v59, 30  ;;  %v1699_v42 = vand.u32 8388607, %v1692_v19  ;;  %v1702_v28 = vadd.s32 1, %v4663_v47  ;;  %v1379_v45 = vsel %vm1368_vm14, nan, %v1378_v27 }
 0x25f   : > { %v1273_v57 = vsel %vm1271_vm4, %v1272_v26, %v5203_v39  ;;  %v1564_v63 = vand.u32 2147483647, %v1563_v61  ;;  %v1566_v18 = vcvt.s32.f32 %v1559_v49  ;;  %v1270_v33 = vsel %vm1268_vm3, %v5201_v46, %v1269_v7 }
 0x260   : > { %v1443_v52 = vshll.u32 %v6395_v50, 30  ;;  %vm1703_vm5 = vcmp.gt.s32.totalorder %v1702_v28, 0  ;;  %v1591_v62 = vand.u32 2139095040, %v6389_v32  ;;  %v1274_v41 = vsel %vm1267_vm2, %v1270_v33, %v1273_v57 }
 0x261   : > { %v1567_v8 = vmul.f32 %v1566_v18, %v1564_v63  ;;  %v1573_v34 = vsel %vm6373_vm15, 0, %v1571_v56  ;;  %v1704_v43 = vsel %vm1703_vm5, %v1702_v28, 0  ;;  %v6410_v20 = vmul.f32 %v5887_v11, %v5869_v0 }
 0x262   : > { %v1275_v29 = vsel %vm1264_vm1, nan, %v1274_v41  ;;  %v6414_v54 = vsub.s32 %v1440_v58, %v1443_v52  ;;  %v1700_v60 = vor.u32 8388608, %v1699_v42  ;;  %v1706_v24 = vand.u32 31, %v1704_v43 }
 0x263   : > { %v4843_v51 = vpack.c.bf16 %v1379_v45, %v1275_v29  ;;  %v1568_v21 = vxor.u32 2147483648, %v1567_v8  ;;  %v6417_v40 = vmul.f32 %v5884_v10, %v734_v35  ;;  %v6419_v31 = vadd.s32 3, %v1573_v34 }
 0x264   : > { %v1446_v49 = vsub.s32 0, %v6414_v54  ;;  %v6422_v25 = vshrl.u32 %v1704_v43, 5  ;;  %v1592_v0 = vshrl.u32 %v1591_v62, 23  ;;  %v1436_v58 = vadd.s32 %v6345_v22, %v6355_v48 }
 0x265   : > { %4915 = vst [vmem:[%s6238_s7 + $0x8] sm:$0xff] %v4843_v51   ;;  %v1569_v37 = vsel %vm1486_vm12, %v1568_v21, %v1567_v8  ;;  %v1707_v46 = vsub.s32 32, %v1706_v24  ;;  %v6430_v27 = vadd.f32 %v873_v13, %v6292_v44  ;;  %v1466_v47 = vsub.s32 4, %v6395_v50 }
 0x266   : > { %v4652_v59 = vmin.u32 %v1446_v49, %v6414_v54  ;;  %v1709_v39 = vshll.u32 %v5549_v53, %v1706_v24  ;;  %v6435_v26 = vshll.u32 %v1700_v60, 8  ;;  %v1572_v61 = vsel %vm6373_vm15, %v6152_v36, %v1569_v37 }
 0x267   : > { %v1710_v56 = vshrl.u32 %v5550_v55, %v1707_v46  ;;  %v1712_v22 = vshll.u32 %v5550_v55, %v1706_v24  ;;  %v1713_v48 = vshrl.u32 %v5551_v5, %v1707_v46  ;;  %vm1724_vm6 = vcmp.lt.s32.totalorder %v6422_v25, 1 }
 0x268   : > { %v1448_v44 = vclz %v4652_v59  ;;  %vm1725_vm7 = vcmp.lt.s32.totalorder %v6422_v25, 2  ;;  %v4659_v13 = vadd.s32 4294967169, %v1592_v0  ;;  %v1715_v28 = vshll.u32 %v5551_v5, %v1706_v24 }
 0x269   : > { %v1711_v7 = vor.u32 %v1710_v56, %v1709_v39  ;;  %v1714_v42 = vor.u32 %v1713_v48, %v1712_v22  ;;  %v1716_v45 = vshrl.u32 %v5552_v14, %v1707_v46  ;;  %5204 = vcosq.f32 %v1572_v61 }
 0x26a   : > { %v4653_v15 = vadd.s32 4294967294, %v1448_v44  ;;  %v1718_v57 = vshll.u32 %v5552_v14, %v1706_v24  ;;  %v1719_v63 = vshrl.u32 %v5553_v16, %v1707_v46  ;;  %v1708_v18 = vshrl.u32 %v5549_v53, %v1707_v46 }
 0x26b   : > { %v1717_v33 = vor.u32 %v1716_v45, %v1715_v28  ;;  %v1721_v52 = vshll.u32 %v5553_v16, %v1706_v24  ;;  %v1722_v62 = vshrl.u32 %v5554_v23, %v1707_v46  ;;  %5206 = vsinq.f32 %v1572_v61 }
 0x26c   : > { %vm4654_vm8 = vcmp.lt.s32.totalorder %v4653_v15, 0  ;;  %v1720_v35 = vor.u32 %v1719_v63, %v1718_v57  ;;  %vm1726_vm9 = vcmp.lt.s32.totalorder %v6422_v25, 3  ;;  %vm1727_vm10 = vcmp.lt.s32.totalorder %v6422_v25, 4 }
 0x26d   : > { %v1451_v41 = vsel %vm4654_vm8, 0, %v4653_v15  ;;  %v1723_v8 = vor.u32 %v1722_v62, %v1721_v52  ;;  %v1732_v34 = vsel %vm1724_vm6, %v1711_v7, %v1714_v42  ;;  %v1729_v60 = vsel %vm1727_vm10, %v1717_v33, 2102212464 }
 0x26e   : > { %v1452_v43 = vsub.s32 32, %v1451_v41  ;;  %v1456_v29 = vsub.s32 4294967266, %v1451_v41  ;;  %v1736_v51 = vsel %vm1724_vm6, %v1714_v42, %v1717_v33  ;;  %v1453_v21 = vshll.u32 %v6414_v54, %v1451_v41 }
 0x26f   : > { %v1728_v24 = vsel %vm1724_vm6, %v1708_v18, %v1711_v7  ;;  %v1733_v49 = vsel %vm1727_vm10, %v1720_v35, 920167782  ;;  %v1737_v0 = vsel %vm1727_vm10, %v1723_v8, 1326507024  ;;  %v1730_v61 = vsel %vm1726_vm9, %v1714_v42, %v1729_v60 }
 0x270   : > { %v1454_v37 = vshrl.u32 %v1436_v58, %v1452_v43  ;;  %v1457_v46 = vadd.s32 127, %v1456_v29  ;;  %v1734_v59 = vsel %vm1726_vm9, %v1717_v33, %v1733_v49  ;;  %v1738_v39 = vsel %vm1726_vm9, %v1720_v35, %v1737_v0 }
 0x271   : > { %v1735_v56 = vsel %vm1725_vm7, %v1732_v34, %v1734_v59  ;;  %v1739_v54 = vsel %vm1725_vm7, %v1736_v51, %v1738_v39  ;;  %v1598_v22 = vadd.s32 1, %v4659_v13  ;;  %v1588_v42 = vand.u32 2147483647, %v6389_v32 }
 0x272   : > { %v1455_v48 = vor.u32 %v1454_v37, %v1453_v21  ;;  %v1458_v44 = vshll.u32 %v1457_v46, 23  ;;  %v6472_v58 = vmul.u32.u64.low %v6435_v26, %v1739_v54  ;;  %v6473_v7 = vmul.u32.u64.high %v6435_v26, %v1739_v54, %v6472_v58 }
 0x273   : > { %v6476_v28 = vmul.u32.u64.low %v6435_v26, %v1735_v56  ;;  %v6477_v45 = vmul.u32.u64.high %v6435_v26, %v1735_v56, %v6476_v28  ;;  %vm1599_vm11 = vcmp.gt.s32.totalorder %v1598_v22, 0  ;;  %vm6483_vm12 = vcmp.le.f32.partialorder %v1380_v30, 0.7853982 }
 0x274   : > { %vm1382_vm13 = vcmp.lt.s32.totalorder %v6205_v17, 0  ;;  %v1459_v13 = vor.u32 4788187, %v1458_v44  ;;  %v1600_v57 = vsel %vm1599_vm11, %v1598_v22, 0  ;;  %v6489_v63 = vand.u32 3, %v6419_v31 }
 0x275   : > { %v1467_v18 = vsel %vm1382_vm13, %v1466_v47, %v6395_v50  ;;  %v1731_v33 = vsel %vm1725_vm7, %v1728_v24, %v1730_v61  ;;  %v1602_v52 = vand.u32 31, %v1600_v57  ;;  %v1462_v30 = vcvt.s32.f32 %v1455_v48 }
 0x276   : > { %v1460_v62 = vand.u32 2147483647, %v1459_v13  ;;  %vm1749_vm14 = vc.u32 %v6473_v7, %v6476_v28  ;;  %v6500_v35 = vadd.f32 %v6417_v40, %v6410_v20  ;;  %v6502_v41 = vpop.eup %5204  ;;  %v1750_v31 = vadd.s32 1, %v6477_v45 }
 0x277   : > { %v1595_v50 = vand.u32 8388607, %v1588_v42  ;;  %v1603_v47 = vsub.s32 32, %v1602_v52  ;;  %v6509_v25 = vadd.f32 %v5890_v12, %v6430_v27  ;;  %v1469_v34 = vsel %vm6483_vm12, 0, %v1467_v18 }
 0x278   : > { %v1463_v8 = vmul.f32 %v1462_v30, %v1460_v62  ;;  %v1747_v43 = vmul.u32 %v6435_v26, %v1731_v33  ;;  %v1601_v20 = vshrl.u32 %v1600_v57, 5  ;;  %v5207_v40 = vpop.eup %5206  ;;  %v1751_v29 = vsel %vm1749_vm14, %v1750_v31, %v6477_v45 }
 0x279   : > { %v1605_v60 = vshll.u32 %v5549_v53, %v1602_v52  ;;  %v1606_v51 = vshrl.u32 %v5550_v55, %v1603_v47  ;;  %v1608_v21 = vshll.u32 %v5550_v55, %v1602_v52  ;;  %v1609_v27 = vshrl.u32 %v5551_v5, %v1603_v47 }
 0x27a   : > { %v1464_v24 = vxor.u32 2147483648, %v1463_v8  ;;  %v1752_v49 = vadd.s32 %v1751_v29, %v1747_v43  ;;  %v1611_v0 = vshll.u32 %v5551_v5, %v1602_v52  ;;  %v1612_v46 = vshrl.u32 %v5552_v14, %v1603_v47 }
 0x27b   : > { %v1607_v37 = vor.u32 %v1606_v51, %v1605_v60  ;;  %v1614_v26 = vshll.u32 %v5552_v14, %v1602_v52  ;;  %v1615_v59 = vshrl.u32 %v5553_v16, %v1603_v47  ;;  %vm1583_vm15 = vcmp.eq.s32.totalorder %v6489_v63, 2 }
 0x27c   : > { %v1465_v39 = vsel %vm1382_vm13, %v1464_v24, %v1463_v8  ;;  %v1753_v61 = vadd.s32 536870912, %v1752_v49  ;;  %v1610_v56 = vor.u32 %v1609_v27, %v1608_v21  ;;  %v1617_v54 = vshll.u32 %v5553_v16, %v1602_v52 }
 0x27d   : > { %vm1580_vm0 = vcmp.eq.s32.totalorder %v6489_v63, 0  ;;  %v1468_v22 = vsel %vm6483_vm12, %v6205_v17, %v1465_v39  ;;  %v1613_v48 = vor.u32 %v1612_v46, %v1611_v0  ;;  %v1616_v44 = vor.u32 %v1615_v59, %v1614_v26 }
 0x27e   : > { %v1618_v58 = vshrl.u32 %v5554_v23, %v1603_v47  ;;  %5208 = vcosq.f32 %v1468_v22  ;;  %v1473_v45 = vadd.s32 3, %v1469_v34  ;;  %v6532_v13 = vshrl.u32 %v1753_v61, 30 }
 0x27f   : > { %v1596_v57 = vor.u32 8388608, %v1595_v50  ;;  %v1581_v18 = vxor.u32 2147483648, %v5207_v40  ;;  %v1584_v33 = vxor.u32 2147483648, %v6502_v41  ;;  %5210 = vsinq.f32 %v1468_v22 }
 0x280   : > { %v1619_v52 = vor.u32 %v1618_v58, %v1617_v54  ;;  %v1755_v62 = vshll.u32 %v6532_v13, 30  ;;  %v1604_v30 = vshrl.u32 %v5549_v53, %v1603_v47  ;;  %vm1620_vm1 = vcmp.lt.s32.totalorder %v1601_v20, 1 }
 0x281   : > { %vm1623_vm2 = vcmp.lt.s32.totalorder %v1601_v20, 4  ;;  %vm1622_vm3 = vcmp.lt.s32.totalorder %v1601_v20, 3  ;;  %v1628_v31 = vsel %vm1620_vm1, %v1607_v37, %v1610_v56  ;;  %vm1621_vm4 = vcmp.lt.s32.totalorder %v1601_v20, 2 }
 0x282   : > { %v1625_v15 = vsel %vm1623_vm2, %v1613_v48, 2102212464  ;;  %v1629_v8 = vsel %vm1623_vm2, %v1616_v44, 920167782  ;;  %v6537_v43 = vsub.s32 %v1752_v49, %v1755_v62  ;;  %v1632_v50 = vsel %vm1620_vm1, %v1610_v56, %v1613_v48 }
 0x283   : > { %v1630_v34 = vsel %vm1622_vm3, %v1613_v48, %v1629_v8  ;;  %v1474_v29 = vand.u32 3, %v1473_v45  ;;  %v1633_v51 = vsel %vm1623_vm2, %v1619_v52, 1326507024  ;;  %v1636_v21 = vshll.u32 %v1596_v57, 8 }
 0x284   : > { %v1631_v60 = vsel %vm1621_vm4, %v1628_v31, %v1630_v34  ;;  %v1758_v24 = vsub.s32 0, %v6537_v43  ;;  %v1624_v27 = vsel %vm1620_vm1, %v1604_v30, %v1607_v37  ;;  %v1626_v47 = vsel %vm1622_vm3, %v1610_v56, %v1625_v15 }
 0x285   : > { %v1634_v0 = vsel %vm1622_vm3, %v1616_v44, %v1633_v51  ;;  %v1585_v46 = vsel %vm1583_vm15, %v1584_v33, %v5207_v40  ;;  %v6544_v49 = vmul.u32.u64.low %v1636_v21, %v1631_v60  ;;  %v6545_v59 = vmul.u32.u64.high %v1636_v21, %v1631_v60, %v6544_v49 }
 0x286   : > { %v1635_v26 = vsel %vm1621_vm4, %v1632_v50, %v1634_v0  ;;  %v1582_v39 = vsel %vm1580_vm0, %v6502_v41, %v1581_v18  ;;  %v4664_v61 = vmin.u32 %v1758_v24, %v6537_v43  ;;  %vm1576_vm5 = vweird.f32 %v6152_v36 }
 0x287   : > { %v6552_v54 = vmul.u32.u64.low %v1636_v21, %v1635_v26  ;;  %v6553_v22 = vmul.u32.u64.high %v1636_v21, %v1635_v26, %v6552_v54  ;;  %v1627_v37 = vsel %vm1621_vm4, %v1624_v27, %v1626_v47  ;;  %v1903_v40 = vand.u32 2139095040, %v6509_v25 }
 0x288   : > { %vm1579_vm6 = vcmp.lt.s32.totalorder %v6489_v63, 2  ;;  %vm1472_vm7 = vweird.f32 %v6205_v17  ;;  %vm1475_vm8 = vcmp.lt.s32.totalorder %v1474_v29, 2  ;;  %v1760_v56 = vclz %v4664_v61  ;;  %v749_v54 = vpop.permute.xlu1 %748 }
 0x289   : > { %v6562_v41 = vadd.f32 %v5890_v12, %v6500_v35  ;;  %v1586_v48 = vsel %vm1579_vm6, %v1582_v39, %v1585_v46  ;;  %vm1476_vm9 = vcmp.eq.s32.totalorder %v1474_v29, 0  ;;  %v1646_v44 = vadd.s32 1, %v6545_v59 }
 0x28a   : > { %v1904_v58 = vshrl.u32 %v1903_v40, 23  ;;  %v4665_v45 = vadd.s32 4294967294, %v1760_v56  ;;  %v1643_v20 = vmul.u32 %v1636_v21, %v1627_v37  ;;  %vm1645_vm10 = vc.u32 %v6553_v22, %v6544_v49 }
 0x28b   : > { %v1900_v63 = vand.u32 2147483647, %v6509_v25  ;;  %v5209_v57 = vpop.eup %5208  ;;  %vm1479_vm11 = vcmp.eq.s32.totalorder %v1474_v29, 2  ;;  %v1748_v18 = vadd.s32 %v6476_v28, %v6473_v7  ;;  %v1647_v35 = vsel %vm1645_vm10, %v1646_v44, %v6545_v59 }
 0x28c   : > { %v4671_v33 = vadd.s32 4294967169, %v1904_v58  ;;  %v5211_v52 = vpop.eup %5210  ;;  %v1587_v62 = vsel %vm1576_vm5, nan, %v1586_v48  ;;  %v1480_v30 = vxor.u32 2147483648, %v5209_v57  ;;  %vm4666_vm12 = vcmp.lt.s32.totalorder %v4665_v45, 0 }
 0x28d   : > { %v1648_v15 = vadd.s32 %v1647_v35, %v1643_v20  ;;  %v1477_v31 = vxor.u32 2147483648, %v5211_v52  ;;  %v1763_v8 = vsel %vm4666_vm12, 0, %v4665_v45  ;;  %v1778_v34 = vsub.s32 4, %v6532_v13 }
 0x28e   : > { %v1910_v50 = vadd.s32 1, %v4671_v33  ;;  %v1481_v60 = vsel %vm1479_vm11, %v1480_v30, %v5211_v52  ;;  %v1764_v51 = vsub.s32 32, %v1763_v8  ;;  %v1768_v21 = vsub.s32 4294967266, %v1763_v8 }
 0x28f   : > { %v1907_v7 = vand.u32 8388607, %v1900_v63  ;;  %v1478_v28 = vsel %vm1476_vm9, %v5209_v57, %v1477_v31  ;;  %v1765_v24 = vshll.u32 %v6537_v43, %v1763_v8  ;;  %v1649_v36 = vadd.s32 536870912, %v1648_v15 }
 0x290   : > { %vm1911_vm13 = vcmp.gt.s32.totalorder %v1910_v50, 0  ;;  %v1482_v27 = vsel %vm1475_vm8, %v1478_v28, %v1481_v60  ;;  %v1766_v47 = vshrl.u32 %v1748_v18, %v1764_v51  ;;  %v1769_v0 = vadd.s32 127, %v1768_v21 }
 0x291   : > { %v1912_v46 = vsel %vm1911_vm13, %v1910_v50, 0  ;;  %v1483_v26 = vsel %vm1472_vm7, nan, %v1482_v27  ;;  %v6581_v59 = vshrl.u32 %v1649_v36, 30  ;;  %v1799_v61 = vand.u32 2139095040, %v6562_v41 }
 0x292   : > { %v1914_v39 = vand.u32 31, %v1912_v46  ;;  %v4848_v37 = vpack.c.bf16 %v1587_v62, %v1483_v26  ;;  %v1767_v40 = vor.u32 %v1766_v47, %v1765_v24  ;;  %v1770_v43 = vshll.u32 %v1769_v0, 23 }
 0x293   : > { %vm1694_vm14 = vcmp.lt.s32.totalorder %v6360_v38, 0  ;;  %v1651_v29 = vshll.u32 %v6581_v59, 30  ;;  %v6593_v44 = vmul.f32 %v5884_v10, %v749_v54  ;;  %v1908_v45 = vor.u32 8388608, %v1907_v7 }
 0x294   : > { %v1915_v56 = vsub.s32 32, %v1914_v39  ;;  %4916 = vst [vmem:[%s6238_s7 + $0x10] sm:$0xff] %v4848_v37   ;;  %v1771_v48 = vor.u32 4788187, %v1770_v43  ;;  %v6590_v17 = vsel %vm1694_vm14, %v1778_v34, %v6532_v13  ;;  %v1800_v57 = vshrl.u32 %v1799_v61, 23 }
 0x295   : > { %v6595_v58 = vsub.s32 %v1648_v15, %v1651_v29  ;;  %vm6600_vm15 = vcmp.le.f32.partialorder %v1692_v19, 0.7853982  ;;  %v1774_v33 = vcvt.s32.f32 %v1767_v40  ;;  %v1913_v30 = vshrl.u32 %v1912_v46, 5 }
 0x296   : > { %v1918_v20 = vshrl.u32 %v5550_v55, %v1915_v56  ;;  %v1772_v35 = vand.u32 2147483647, %v1771_v48  ;;  %v1921_v13 = vshrl.u32 %v5551_v5, %v1915_v56  ;;  %v1924_v52 = vshrl.u32 %v5552_v14, %v1915_v56 }
 0x297   : > { %v1654_v62 = vsub.s32 0, %v6595_v58  ;;  %v1917_v15 = vshll.u32 %v5549_v53, %v1914_v39  ;;  %v1920_v31 = vshll.u32 %v5550_v55, %v1914_v39  ;;  %v1923_v34 = vshll.u32 %v5551_v5, %v1914_v39 }
 0x298   : > { %v1775_v8 = vmul.f32 %v1774_v33, %v1772_v35  ;;  %v1926_v19 = vshll.u32 %v5552_v14, %v1914_v39  ;;  %v1927_v50 = vshrl.u32 %v5553_v16, %v1915_v56  ;;  %v1930_v7 = vshrl.u32 %v5554_v23, %v1915_v56 }
 0x299   : > { %v4660_v60 = vmin.u32 %v1654_v62, %v6595_v58  ;;  %v1919_v51 = vor.u32 %v1918_v20, %v1917_v15  ;;  %v1922_v21 = vor.u32 %v1921_v13, %v1920_v31  ;;  %v1925_v24 = vor.u32 %v1924_v52, %v1923_v34 }
 0x29a   : > { %v1776_v28 = vxor.u32 2147483648, %v1775_v8  ;;  %v1928_v36 = vor.u32 %v1927_v50, %v1926_v19  ;;  %v1929_v27 = vshll.u32 %v5553_v16, %v1914_v39  ;;  %vm1590_vm0 = vcmp.lt.s32.totalorder %v6389_v32, 0 }
 0x29b   : > { %v1644_v47 = vadd.s32 %v6544_v49, %v6553_v22  ;;  %v1656_v0 = vclz %v4660_v60  ;;  %v1948_v46 = vshll.u32 %v1908_v45, 8  ;;  %v4667_v26 = vadd.s32 4294967169, %v1800_v57 }
 0x29c   : > { %v1777_v61 = vsel %vm1694_vm14, %v1776_v28, %v1775_v8  ;;  %v1674_v54 = vsub.s32 4, %v6581_v59  ;;  %v1916_v37 = vshrl.u32 %v5549_v53, %v1915_v56  ;;  %v1931_v40 = vor.u32 %v1930_v7, %v1929_v27 }
 0x29d   : > { %v4661_v43 = vadd.s32 4294967294, %v1656_v0  ;;  %vm1932_vm1 = vcmp.lt.s32.totalorder %v1913_v30, 1  ;;  %vm1933_vm2 = vcmp.lt.s32.totalorder %v1913_v30, 2  ;;  %vm1935_vm3 = vcmp.lt.s32.totalorder %v1913_v30, 4 }
 0x29e   : > { %vm1934_vm4 = vcmp.lt.s32.totalorder %v1913_v30, 3  ;;  %v1937_v39 = vsel %vm1935_vm3, %v1925_v24, 2102212464  ;;  %v1940_v29 = vsel %vm1932_vm1, %v1919_v51, %v1922_v21  ;;  %v1941_v48 = vsel %vm1935_vm3, %v1928_v36, 920167782 }
 0x29f   : > { %v1780_v49 = vsel %vm6600_vm15, %v6360_v38, %v1777_v61  ;;  %vm4662_vm5 = vcmp.lt.s32.totalorder %v4661_v43, 0  ;;  %v1936_v22 = vsel %vm1932_vm1, %v1916_v37, %v1919_v51  ;;  %v1942_v45 = vsel %vm1934_vm4, %v1925_v24, %v1941_v48 }
 0x2a0   : > { %v1659_v20 = vsel %vm4662_vm5, 0, %v4661_v43  ;;  %v1943_v57 = vsel %vm1933_vm2, %v1940_v29, %v1942_v45  ;;  %v1944_v56 = vsel %vm1932_vm1, %v1922_v21, %v1925_v24  ;;  %v1945_v35 = vsel %vm1935_vm3, %v1931_v40, 1326507024 }
 0x2a1   : > { %v1660_v33 = vsub.s32 32, %v1659_v20  ;;  %v1664_v13 = vsub.s32 4294967266, %v1659_v20  ;;  %v1938_v52 = vsel %vm1934_vm4, %v1922_v21, %v1937_v39  ;;  %v1946_v62 = vsel %vm1934_vm4, %v1928_v36, %v1945_v35 }
 0x2a2   : > { %v1661_v15 = vshll.u32 %v6595_v58, %v1659_v20  ;;  %v1947_v31 = vsel %vm1933_vm2, %v1944_v56, %v1946_v62  ;;  %v6628_v8 = vmul.u32.u64.low %v1948_v46, %v1943_v57  ;;  %v6629_v34 = vmul.u32.u64.high %v1948_v46, %v1943_v57, %v6628_v8 }
 0x2a3   : > { %v1662_v19 = vshrl.u32 %v1644_v47, %v1660_v33  ;;  %v1665_v50 = vadd.s32 127, %v1664_v13  ;;  %v6632_v60 = vmul.u32.u64.low %v1948_v46, %v1947_v31  ;;  %v6633_v51 = vmul.u32.u64.high %v1948_v46, %v1947_v31, %v6632_v60 }
 0x2a4   : > { %vm6637_vm6 = vcmp.le.f32.partialorder %v1588_v42, 0.7853982  ;;  %v1675_v58 = vsel %vm1590_vm0, %v1674_v54, %v6581_v59  ;;  %v1939_v21 = vsel %vm1933_vm2, %v1936_v22, %v1938_v52  ;;  %v1806_v28 = vadd.s32 1, %v4667_v26 }
 0x2a5   : > { %v1781_v24 = vsel %vm6600_vm15, 0, %v6590_v17  ;;  %5212 = vcosq.f32 %v1780_v49  ;;  %v1663_v36 = vor.u32 %v1662_v19, %v1661_v15  ;;  %v1666_v27 = vshll.u32 %v1665_v50, 23 }
 0x2a6   : > { %5214 = vsinq.f32 %v1780_v49  ;;  %v1958_v42 = vadd.s32 1, %v6629_v34  ;;  %v1796_v47 = vand.u32 2147483647, %v6562_v41  ;;  %vm1807_vm7 = vcmp.gt.s32.totalorder %v1806_v28, 0 }
 0x2a7   : > { %v1667_v0 = vor.u32 4788187, %v1666_v27  ;;  %v1677_v59 = vsel %vm6637_vm6, 0, %v1675_v58  ;;  %v1955_v30 = vmul.u32 %v1948_v46, %v1939_v21  ;;  %vm1957_vm8 = vc.u32 %v6633_v51, %v6628_v8 }
 0x2a8   : > { %v663_v17 = vmul.f32 %v5887_v11, %v5871_v1  ;;  %v1785_v18 = vadd.s32 3, %v1781_v24  ;;  %v1959_v26 = vsel %vm1957_vm8, %v1958_v42, %v6629_v34  ;;  %v1808_v61 = vsel %vm1807_vm7, %v1806_v28, 0 }
 0x2a9   : > { %v1668_v54 = vand.u32 2147483647, %v1667_v0  ;;  %v1670_v37 = vcvt.s32.f32 %v1663_v36  ;;  %v1960_v40 = vadd.s32 %v1959_v26, %v1955_v30  ;;  %v1810_v43 = vand.u32 31, %v1808_v61 }
 0x2aa   : > { %v1681_v39 = vadd.s32 3, %v1677_v59  ;;  %v1803_v29 = vand.u32 8388607, %v1796_v47  ;;  %v907_v22 = vadd.f32 %v6593_v44, %v663_v17  ;;  %v6662_v1 = vmul.f32 %v5887_v11, %v5873_v2 }
 0x2ab   : > { %v1671_v48 = vmul.f32 %v1670_v37, %v1668_v54  ;;  %v1961_v46 = vadd.s32 536870912, %v1960_v40  ;;  %v1811_v49 = vsub.s32 32, %v1810_v43  ;;  %v6664_v45 = vand.u32 3, %v1785_v18 }
 0x2ac   : > { %v6668_v56 = vand.u32 3, %v1681_v39  ;;  %v1804_v35 = vor.u32 8388608, %v1803_v29  ;;  %v6677_v62 = vadd.f32 %v5890_v12, %v907_v22  ;;  %v6682_v31 = vshrl.u32 %v1808_v61, 5 }
 0x2ad   : > { %v1672_v20 = vxor.u32 2147483648, %v1671_v48  ;;  %v6666_v57 = vshrl.u32 %v1961_v46, 30  ;;  %v1814_v33 = vshrl.u32 %v5550_v55, %v1811_v49  ;;  %v1817_v13 = vshrl.u32 %v5551_v5, %v1811_v49 }
 0x2ae   : > { %v1820_v2 = vshrl.u32 %v5552_v14, %v1811_v49  ;;  %v1813_v34 = vshll.u32 %v5549_v53, %v1810_v43  ;;  %v1816_v19 = vshll.u32 %v5550_v55, %v1810_v43  ;;  %v1819_v60 = vshll.u32 %v5551_v5, %v1810_v43 }
 0x2af   : > { %v1673_v52 = vsel %vm1590_vm0, %v1672_v20, %v1671_v48  ;;  %v1963_v44 = vshll.u32 %v6666_v57, 30  ;;  %v1822_v58 = vshll.u32 %v5552_v14, %v1810_v43  ;;  %v1823_v7 = vshrl.u32 %v5553_v16, %v1811_v49 }
 0x2b0   : > { %v1676_v15 = vsel %vm6637_vm6, %v6389_v32, %v1673_v52  ;;  %v1815_v28 = vor.u32 %v1814_v33, %v1813_v34  ;;  %v1818_v24 = vor.u32 %v1817_v13, %v1816_v19  ;;  %vm1788_vm9 = vcmp.eq.s32.totalorder %v6664_v45, 0 }
 0x2b1   : > { %5216 = vcosq.f32 %v1676_v15  ;;  %v6686_v50 = vsub.s32 %v1960_v40, %v1963_v44  ;;  %vm1791_vm10 = vcmp.eq.s32.totalorder %v6664_v45, 2  ;;  %v1821_v42 = vor.u32 %v1820_v2, %v1819_v60 }
 0x2b2   : > { %v5213_v21 = vpop.eup %5212  ;;  %5218 = vsinq.f32 %v1676_v15  ;;  %v1825_v0 = vshll.u32 %v5553_v16, %v1810_v43  ;;  %v1826_v59 = vshrl.u32 %v5554_v23, %v1811_v49  ;;  %v1824_v30 = vor.u32 %v1823_v7, %v1822_v58 }
 0x2b3   : > { %v5215_v36 = vpop.eup %5214  ;;  %v1966_v27 = vsub.s32 0, %v6686_v50  ;;  %v6696_v17 = vshll.u32 %v1804_v35, 8  ;;  %v2108_v18 = vand.u32 2147483647, %v6677_v62  ;;  %v2111_v26 = vand.u32 2139095040, %v6677_v62 }
 0x2b4   : > { %v1827_v54 = vor.u32 %v1826_v59, %v1825_v0  ;;  %vm1828_vm11 = vcmp.lt.s32.totalorder %v6682_v31, 1  ;;  %vm1831_vm12 = vcmp.lt.s32.totalorder %v6682_v31, 4  ;;  %vm1787_vm13 = vcmp.lt.s32.totalorder %v6664_v45, 2 }
 0x2b5   : > { %v4672_v61 = vmin.u32 %v1966_v27, %v6686_v50  ;;  %v1789_v37 = vxor.u32 2147483648, %v5215_v36  ;;  %v1792_v40 = vxor.u32 2147483648, %v5213_v21  ;;  %v1836_v43 = vsel %vm1828_vm11, %v1815_v28, %v1818_v24 }
 0x2b6   : > { %v1837_v39 = vsel %vm1831_vm12, %v1824_v30, 920167782  ;;  %v1812_v48 = vshrl.u32 %v5549_v53, %v1811_v49  ;;  %vm1830_vm14 = vcmp.lt.s32.totalorder %v6682_v31, 3  ;;  %v1833_v46 = vsel %vm1831_vm12, %v1821_v42, 2102212464 }
 0x2b7   : > { %v1968_v29 = vclz %v4672_v61  ;;  %vm1829_vm15 = vcmp.lt.s32.totalorder %v6682_v31, 2  ;;  %v1838_v22 = vsel %vm1830_vm14, %v1821_v42, %v1837_v39  ;;  %v1840_v20 = vsel %vm1828_vm11, %v1818_v24, %v1821_v42 }
 0x2b8   : > { %v1841_v35 = vsel %vm1831_vm12, %v1827_v54, 1326507024  ;;  %vm1784_vm0 = vweird.f32 %v6360_v38  ;;  %vm1684_vm1 = vcmp.eq.s32.totalorder %v6668_v56, 0  ;;  %v1832_v13 = vsel %vm1828_vm11, %v1812_v48, %v1815_v28  ;;  %v745_v28 = vpop.permute.xlu0 %744 }
 0x2b9   : > { %v4673_v33 = vadd.s32 4294967294, %v1968_v29  ;;  %v1839_v49 = vsel %vm1829_vm15, %v1836_v43, %v1838_v22  ;;  %v1842_v52 = vsel %vm1830_vm14, %v1824_v30, %v1841_v35  ;;  %vm1683_vm2 = vcmp.lt.s32.totalorder %v6668_v56, 2 }
 0x2ba   : > { %v1834_v44 = vsel %vm1830_vm14, %v1818_v24, %v1833_v46  ;;  %v1843_v2 = vsel %vm1829_vm15, %v1840_v20, %v1842_v52  ;;  %v6721_v15 = vmul.u32.u64.low %v6696_v17, %v1839_v49  ;;  %v6722_v34 = vmul.u32.u64.high %v6696_v17, %v1839_v49, %v6721_v15 }
 0x2bb   : > { %vm1680_vm3 = vweird.f32 %v6389_v32  ;;  %vm4674_vm4 = vcmp.lt.s32.totalorder %v4673_v33, 0  ;;  %v6727_v19 = vmul.u32.u64.low %v6696_v17, %v1843_v2  ;;  %v6728_v60 = vmul.u32.u64.high %v6696_v17, %v1843_v2, %v6727_v19 }
 0x2bc   : > { %v2112_v58 = vshrl.u32 %v2111_v26, 23  ;;  %v1790_v24 = vsel %vm1788_vm9, %v5213_v21, %v1789_v37  ;;  %v1793_v7 = vsel %vm1791_vm10, %v1792_v40, %v5215_v36  ;;  %v1956_v27 = vadd.s32 %v6628_v8, %v6633_v51 }
 0x2bd   : > { %v1971_v42 = vsel %vm4674_vm4, 0, %v4673_v33  ;;  %v1835_v30 = vsel %vm1829_vm15, %v1832_v13, %v1834_v44  ;;  %vm1687_vm5 = vcmp.eq.s32.totalorder %v6668_v56, 2  ;;  %v1854_v26 = vadd.s32 1, %v6722_v34 }
 0x2be   : > { %v1972_v0 = vsub.s32 32, %v1971_v42  ;;  %v1976_v59 = vsub.s32 4294967266, %v1971_v42  ;;  %v4679_v61 = vadd.s32 4294967169, %v2112_v58  ;;  %v5217_v54 = vpop.eup %5216  ;;  %v6742_v21 = vand.u32 8388607, %v2108_v18 }
 0x2bf   : > { %v874_v36 = vmul.f32 %v5884_v10, %v745_v28  ;;  %v5219_v37 = vpop.eup %5218  ;;  %v1794_v8 = vsel %vm1787_vm13, %v1790_v24, %v1793_v7  ;;  %v1688_v51 = vxor.u32 2147483648, %v5217_v54  ;;  %v1851_v39 = vmul.u32 %v6696_v17, %v1835_v30 }
 0x2c0   : > { %v1974_v40 = vshrl.u32 %v1956_v27, %v1972_v0  ;;  %v1977_v31 = vadd.s32 127, %v1976_v59  ;;  %v1685_v43 = vxor.u32 2147483648, %v5219_v37  ;;  %vm1853_vm6 = vc.u32 %v6728_v60, %v6721_v15 }
 0x2c1   : > { %v2118_v29 = vadd.s32 1, %v4679_v61  ;;  %v1689_v48 = vsel %vm1687_vm5, %v1688_v51, %v5219_v37  ;;  %v1973_v46 = vshll.u32 %v6686_v50, %v1971_v42  ;;  %v1855_v20 = vsel %vm1853_vm6, %v1854_v26, %v6722_v34  ;;  %v760_v37 = vpop.permute.xlu1 %759 }
 0x2c2   : > { %v1978_v22 = vshll.u32 %v1977_v31, 23  ;;  %v1795_v45 = vsel %vm1784_vm0, nan, %v1794_v8  ;;  %v1686_v35 = vsel %vm1684_vm1, %v5217_v54, %v1685_v43  ;;  %v1856_v33 = vadd.s32 %v1855_v20, %v1851_v39 }
 0x2c3   : > { %vm2119_vm7 = vcmp.gt.s32.totalorder %v2118_v29, 0  ;;  %v1690_v17 = vsel %vm1683_vm2, %v1686_v35, %v1689_v48  ;;  %v1975_v13 = vor.u32 %v1974_v40, %v1973_v46  ;;  %v906_v38 = vadd.f32 %v874_v36, %v6662_v1 }
 0x2c4   : > { %v1979_v49 = vor.u32 4788187, %v1978_v22  ;;  %v2120_v52 = vsel %vm2119_vm7, %v2118_v29, 0  ;;  %v1691_v50 = vsel %vm1680_vm3, nan, %v1690_v17  ;;  %v1857_v44 = vadd.s32 536870912, %v1856_v33 }
 0x2c5   : > { %v2122_v2 = vand.u32 31, %v2120_v52  ;;  %v4853_v34 = vpack.c.bf16 %v1795_v45, %v1691_v50  ;;  %v6763_v58 = vmul.f32 %v5887_v11, %v5875_v3  ;;  %vm6767_vm8 = vcmp.le.f32.partialorder %v1900_v63, 0.7853982 }
 0x2c6   : > { %v1980_v19 = vand.u32 2147483647, %v1979_v49  ;;  %v6771_v28 = vshrl.u32 %v1857_v44, 30  ;;  %vm1902_vm9 = vcmp.lt.s32.totalorder %v6509_v25, 0  ;;  %v1982_v24 = vcvt.s32.f32 %v1975_v13 }
 0x2c7   : > { %v2123_v32 = vsub.s32 32, %v2122_v2  ;;  %4917 = vst [vmem:[%s6238_s7 + $0x18] sm:$0xff] %v4853_v34   ;;  %v1986_v1 = vsub.s32 4, %v6666_v57  ;;  %v2116_v7 = vor.u32 8388608, %v6742_v21  ;;  %v2125_v27 = vshll.u32 %v5549_v53, %v2122_v2 }
 0x2c8   : > { %v1859_v3 = vshll.u32 %v6771_v28, 30  ;;  %v6781_v42 = vadd.f32 %v5890_v12, %v906_v38  ;;  %v1983_v0 = vmul.f32 %v1982_v24, %v1980_v19  ;;  %v2128_v26 = vshll.u32 %v5550_v55, %v2122_v2 }
 0x2c9   : > { %v2126_v63 = vshrl.u32 %v5550_v55, %v2123_v32  ;;  %v2129_v59 = vshrl.u32 %v5551_v5, %v2123_v32  ;;  %v2132_v30 = vshrl.u32 %v5552_v14, %v2123_v32  ;;  %v2135_v61 = vshrl.u32 %v5553_v16, %v2123_v32 }
 0x2ca   : > { %v6786_v54 = vsub.s32 %v1856_v33, %v1859_v3  ;;  %v2131_v21 = vshll.u32 %v5551_v5, %v2122_v2  ;;  %v2138_v36 = vshrl.u32 %v5554_v23, %v2123_v32  ;;  %v1987_v8 = vsel %vm1902_vm9, %v1986_v1, %v6666_v57 }
 0x2cb   : > { %v2121_v51 = vshrl.u32 %v2120_v52, 5  ;;  %v2134_v40 = vshll.u32 %v5552_v14, %v2122_v2  ;;  %v2137_v31 = vshll.u32 %v5553_v16, %v2122_v2  ;;  %v2127_v39 = vor.u32 %v2126_v63, %v2125_v27 }
 0x2cc   : > { %v1862_v43 = vsub.s32 0, %v6786_v54  ;;  %v2130_v29 = vor.u32 %v2129_v59, %v2128_v26  ;;  %v2133_v48 = vor.u32 %v2132_v30, %v2131_v21  ;;  %v1984_v46 = vxor.u32 2147483648, %v1983_v0 }
 0x2cd   : > { %v2136_v22 = vor.u32 %v2135_v61, %v2134_v40  ;;  %v2139_v20 = vor.u32 %v2138_v36, %v2137_v31  ;;  %v877_v45 = vmul.f32 %v5884_v10, %v760_v37  ;;  %v1989_v35 = vsel %vm6767_vm8, 0, %v1987_v8 }
 0x2ce   : > { %v4668_v57 = vmin.u32 %v1862_v43, %v6786_v54  ;;  %v2156_v33 = vshll.u32 %v2116_v7, 8  ;;  %v2007_v17 = vand.u32 2139095040, %v6781_v42  ;;  %v1882_v13 = vsub.s32 4, %v6771_v28 }
 0x2cf   : > { %v2124_v49 = vshrl.u32 %v5549_v53, %v2123_v32  ;;  %vm2140_vm10 = vcmp.lt.s32.totalorder %v2121_v51, 1  ;;  %vm2142_vm11 = vcmp.lt.s32.totalorder %v2121_v51, 3  ;;  %vm1798_vm12 = vcmp.lt.s32.totalorder %v6562_v41, 0 }
 0x2d0   : > { %v1864_v52 = vclz %v4668_v57  ;;  %vm2143_vm13 = vcmp.lt.s32.totalorder %v2121_v51, 4  ;;  %v2148_v50 = vsel %vm2140_vm10, %v2127_v39, %v2130_v29  ;;  %v2152_v44 = vsel %vm2140_vm10, %v2130_v29, %v2133_v48 }
 0x2d1   : > { %v1985_v2 = vsel %vm1902_vm9, %v1984_v46, %v1983_v0  ;;  %v2145_v38 = vsel %vm2143_vm13, %v2133_v48, 2102212464  ;;  %v2149_v34 = vsel %vm2143_vm13, %v2136_v22, 920167782  ;;  %v2153_v19 = vsel %vm2143_vm13, %v2139_v20, 1326507024 }
 0x2d2   : > { %v4669_v24 = vadd.s32 4294967294, %v1864_v52  ;;  %vm2141_vm14 = vcmp.lt.s32.totalorder %v2121_v51, 2  ;;  %v2150_v32 = vsel %vm2142_vm11, %v2133_v48, %v2149_v34  ;;  %v2154_v1 = vsel %vm2142_vm11, %v2136_v22, %v2153_v19 }
 0x2d3   : > { %vm6813_vm15 = vcmp.le.f32.partialorder %v1796_v47, 0.7853982  ;;  %v2144_v3 = vsel %vm2140_vm10, %v2124_v49, %v2127_v39  ;;  %v2151_v27 = vsel %vm2141_vm14, %v2148_v50, %v2150_v32  ;;  %v2155_v63 = vsel %vm2141_vm14, %v2152_v44, %v2154_v1 }
 0x2d4   : > { %v2008_v0 = vshrl.u32 %v2007_v17, 23  ;;  %vm4670_vm0 = vcmp.lt.s32.totalorder %v4669_v24, 0  ;;  %v2146_v59 = vsel %vm2142_vm11, %v2130_v29, %v2145_v38  ;;  %v1988_v37 = vsel %vm6767_vm8, %v6509_v25, %v1985_v2 }
 0x2d5   : > { %v6821_v30 = vmul.u32.u64.low %v2156_v33, %v2155_v63  ;;  %v6822_v61 = vmul.u32.u64.high %v2156_v33, %v2155_v63, %v6821_v30  ;;  %v1867_v26 = vsel %vm4670_vm0, 0, %v4669_v24  ;;  %v1852_v8 = vadd.s32 %v6721_v15, %v6728_v60 }
 0x2d6   : > { %v6824_v21 = vmul.u32.u64.low %v2156_v33, %v2151_v27  ;;  %v6825_v36 = vmul.u32.u64.high %v2156_v33, %v2151_v27, %v6824_v21  ;;  %v4675_v47 = vadd.s32 4294967169, %v2008_v0  ;;  %v1868_v40 = vsub.s32 32, %v1867_v26 }
 0x2d7   : > { %v1872_v31 = vsub.s32 4294967266, %v1867_v26  ;;  %v1993_v43 = vadd.s32 3, %v1989_v35  ;;  %v2147_v39 = vsel %vm2141_vm14, %v2144_v3, %v2146_v59  ;;  %v909_v48 = vadd.f32 %v877_v45, %v6763_v58  ;;  %v756_v58 = vpop.permute.xlu0 %755 }
 0x2d8   : > { %v2014_v29 = vadd.s32 1, %v4675_v47  ;;  %v1869_v46 = vshll.u32 %v6786_v54, %v1867_v26  ;;  %v1870_v22 = vshrl.u32 %v1852_v8, %v1868_v40  ;;  %vm2165_vm1 = vc.u32 %v6822_v61, %v6824_v21 }
 0x2d9   : > { %v1873_v20 = vadd.s32 127, %v1872_v31  ;;  %5220 = vcosq.f32 %v1988_v37  ;;  %v1883_v15 = vsel %vm1798_vm12, %v1882_v13, %v6771_v28  ;;  %v2166_v60 = vadd.s32 1, %v6825_v36 }
 0x2da   : > { %vm2015_vm2 = vcmp.gt.s32.totalorder %v2014_v29, 0  ;;  %v1871_v56 = vor.u32 %v1870_v22, %v1869_v46  ;;  %v2163_v35 = vmul.u32 %v2156_v33, %v2147_v39  ;;  %v2004_v45 = vand.u32 2147483647, %v6781_v42 }
 0x2db   : > { %v1874_v51 = vshll.u32 %v1873_v20, 23  ;;  %v2016_v57 = vsel %vm2015_vm2, %v2014_v29, 0  ;;  %v2167_v54 = vsel %vm2165_vm1, %v2166_v60, %v6825_v36  ;;  %v6845_v49 = vadd.f32 %v5890_v12, %v909_v48 }
 0x2dc   : > { %v2018_v17 = vand.u32 31, %v2016_v57  ;;  %5222 = vsinq.f32 %v1988_v37  ;;  %v1885_v28 = vsel %vm6813_vm15, 0, %v1883_v15  ;;  %v2168_v13 = vadd.s32 %v2167_v54, %v2163_v35 }
 0x2dd   : > { %v1875_v52 = vor.u32 4788187, %v1874_v51  ;;  %v6851_v50 = vmul.f32 %v5887_v11, %v5877_v4  ;;  %v6855_v33 = vmul.f32 %v5887_v11, %v5879_v6  ;;  %v6858_v2 = vmul.f32 %v5884_v10, %v756_v58 }
 0x2de   : > { %v2019_v44 = vsub.s32 32, %v2018_v17  ;;  %v6860_v38 = vand.u32 3, %v1993_v43  ;;  %v1878_v19 = vcvt.s32.f32 %v1871_v56  ;;  %v2169_v24 = vadd.s32 536870912, %v2168_v13 }
 0x2df   : > { %v1876_v34 = vand.u32 2147483647, %v1875_v52  ;;  %v1889_v32 = vadd.s32 3, %v1885_v28  ;;  %v2011_v1 = vand.u32 8388607, %v2004_v45  ;;  %v2319_v3 = vand.u32 2139095040, %v6845_v49 }
 0x2e0   : > { %v2022_v4 = vshrl.u32 %v5550_v55, %v2019_v44  ;;  %v6866_v6 = vshrl.u32 %v2169_v24, 30  ;;  %v2025_v63 = vshrl.u32 %v5551_v5, %v2019_v44  ;;  %v2028_v0 = vshrl.u32 %v5552_v14, %v2019_v44 }
 0x2e1   : > { %v1879_v27 = vmul.f32 %v1878_v19, %v1876_v34  ;;  %v2017_v59 = vshrl.u32 %v2016_v57, 5  ;;  %v2021_v30 = vshll.u32 %v5549_v53, %v2018_v17  ;;  %v2027_v26 = vshll.u32 %v5551_v5, %v2018_v17 }
 0x2e2   : > { %v2031_v36 = vshrl.u32 %v5553_v16, %v2019_v44  ;;  %v2171_v37 = vshll.u32 %v6866_v6, 30  ;;  %v2024_v8 = vshll.u32 %v5550_v55, %v2018_v17  ;;  %v2030_v40 = vshll.u32 %v5552_v14, %v2018_v17 }
 0x2e3   : > { %v1880_v47 = vxor.u32 2147483648, %v1879_v27  ;;  %v2023_v31 = vor.u32 %v2022_v4, %v2021_v30  ;;  %v2029_v43 = vor.u32 %v2028_v0, %v2027_v26  ;;  %v2033_v39 = vshll.u32 %v5553_v16, %v2018_v17 }
 0x2e4   : > { %v2034_v29 = vshrl.u32 %v5554_v23, %v2019_v44  ;;  %v6880_v46 = vsub.s32 %v2168_v13, %v2171_v37  ;;  %v2026_v22 = vor.u32 %v2025_v63, %v2024_v8  ;;  %v2032_v20 = vor.u32 %v2031_v36, %v2030_v40 }
 0x2e5   : > { %v1881_v48 = vsel %vm1798_vm12, %v1880_v47, %v1879_v27  ;;  %v6885_v60 = vand.u32 3, %v1889_v32  ;;  %v2012_v56 = vor.u32 8388608, %v2011_v1  ;;  %vm2039_vm3 = vcmp.lt.s32.totalorder %v2017_v59, 4 }
 0x2e6   : > { %v1884_v15 = vsel %vm6813_vm15, %v6562_v41, %v1881_v48  ;;  %v2035_v51 = vor.u32 %v2034_v29, %v2033_v39  ;;  %v5221_v35 = vpop.eup %5220  ;;  %v2174_v57 = vsub.s32 0, %v6880_v46  ;;  %v2320_v58 = vshrl.u32 %v2319_v3, 23 }
 0x2e7   : > { %5224 = vcosq.f32 %v1884_v15  ;;  %v2020_v54 = vshrl.u32 %v5549_v53, %v2019_v44  ;;  %vm2036_vm4 = vcmp.lt.s32.totalorder %v2017_v59, 1  ;;  %v2041_v17 = vsel %vm2039_vm3, %v2029_v43, 2102212464 }
 0x2e8   : > { %5226 = vsinq.f32 %v1884_v15  ;;  %v4680_v52 = vmin.u32 %v2174_v57, %v6880_v46  ;;  %vm2038_vm5 = vcmp.lt.s32.totalorder %v2017_v59, 3  ;;  %v2044_v7 = vsel %vm2036_vm4, %v2023_v31, %v2026_v22 }
 0x2e9   : > { %v2045_v28 = vsel %vm2039_vm3, %v2032_v20, 920167782  ;;  %v5223_v13 = vpop.eup %5222  ;;  %v2000_v34 = vxor.u32 2147483648, %v5221_v35  ;;  %v2048_v24 = vsel %vm2036_vm4, %v2026_v22, %v2029_v43  ;;  %v2049_v32 = vsel %vm2039_vm3, %v2035_v51, 1326507024 }
 0x2ea   : > { %v2046_v19 = vsel %vm2038_vm5, %v2029_v43, %v2045_v28  ;;  %vm1995_vm6 = vcmp.lt.s32.totalorder %v6860_v38, 2  ;;  %v2176_v1 = vclz %v4680_v52  ;;  %vm2037_vm7 = vcmp.lt.s32.totalorder %v2017_v59, 2 }
 0x2eb   : > { %v2040_v4 = vsel %vm2036_vm4, %v2020_v54, %v2023_v31  ;;  %v2042_v3 = vsel %vm2038_vm5, %v2026_v22, %v2041_v17  ;;  %v2047_v44 = vsel %vm2037_vm7, %v2044_v7, %v2046_v19  ;;  %v2050_v27 = vsel %vm2038_vm5, %v2032_v20, %v2049_v32 }
 0x2ec   : > { %v2052_v63 = vshll.u32 %v2012_v56, 8  ;;  %v4687_v0 = vadd.s32 4294967169, %v2320_v58  ;;  %vm1996_vm8 = vcmp.eq.s32.totalorder %v6860_v38, 0  ;;  %v1997_v30 = vxor.u32 2147483648, %v5223_v13 }
 0x2ed   : > { %v4681_v26 = vadd.s32 4294967294, %v2176_v1  ;;  %v2051_v36 = vsel %vm2037_vm7, %v2048_v24, %v2050_v27  ;;  %vm1992_vm9 = vweird.f32 %v6509_v25  ;;  %vm1999_vm10 = vcmp.eq.s32.totalorder %v6860_v38, 2 }
 0x2ee   : > { %v6895_v47 = vmul.u32.u64.low %v2052_v63, %v2051_v36  ;;  %v6896_v37 = vmul.u32.u64.high %v2052_v63, %v2051_v36, %v6895_v47  ;;  %v6898_v8 = vmul.u32.u64.low %v2052_v63, %v2047_v44  ;;  %v6899_v40 = vmul.u32.u64.high %v2052_v63, %v2047_v44, %v6898_v8 }
 0x2ef   : > { %vm2110_vm11 = vcmp.lt.s32.totalorder %v6677_v62, 0  ;;  %vm4682_vm12 = vcmp.lt.s32.totalorder %v4681_v26, 0  ;;  %v2043_v31 = vsel %vm2037_vm7, %v2040_v4, %v2042_v3  ;;  %v2326_v43 = vadd.s32 1, %v4687_v0 }
 0x2f0   : > { %v2001_v39 = vsel %vm1999_vm10, %v2000_v34, %v5223_v13  ;;  %vm1891_vm13 = vcmp.lt.s32.totalorder %v6885_v60, 2  ;;  %v2164_v29 = vadd.s32 %v6824_v21, %v6822_v61  ;;  %v2179_v48 = vsel %vm4682_vm12, 0, %v4681_v26 }
 0x2f1   : > { %v2316_v22 = vand.u32 2147483647, %v6845_v49  ;;  %v1998_v20 = vsel %vm1996_vm8, %v5221_v35, %v1997_v30  ;;  %vm1888_vm14 = vweird.f32 %v6562_v41  ;;  %v2180_v15 = vsub.s32 32, %v2179_v48 }
 0x2f2   : > { %v2184_v56 = vsub.s32 4294967266, %v2179_v48  ;;  %vm2327_vm15 = vcmp.gt.s32.totalorder %v2326_v43, 0  ;;  %v2059_v59 = vmul.u32 %v2052_v63, %v2043_v31  ;;  %vm2061_vm0 = vc.u32 %v6896_v37, %v6898_v8 }
 0x2f3   : > { %v2062_v51 = vadd.s32 1, %v6899_v40  ;;  %v2328_v57 = vsel %vm2327_vm15, %v2326_v43, 0  ;;  %v2181_v61 = vshll.u32 %v6880_v46, %v2179_v48  ;;  %v2182_v21 = vshrl.u32 %v2164_v29, %v2180_v15 }
 0x2f4   : > { %v2185_v58 = vadd.s32 127, %v2184_v56  ;;  %v2330_v54 = vand.u32 31, %v2328_v57  ;;  %v5225_v17 = vpop.eup %5224  ;;  %v2002_v35 = vsel %vm1995_vm6, %v1998_v20, %v2001_v39  ;;  %v2194_v52 = vsub.s32 4, %v6866_v6 }
 0x2f5   : > { %v2063_v7 = vsel %vm2061_vm0, %v2062_v51, %v6899_v40  ;;  %v2323_v28 = vand.u32 8388607, %v2316_v22  ;;  %v5227_v13 = vpop.eup %5226  ;;  %v1896_v34 = vxor.u32 2147483648, %v5225_v17  ;;  %v2183_v19 = vor.u32 %v2182_v21, %v2181_v61 }
 0x2f6   : > { %v2186_v24 = vshll.u32 %v2185_v58, 23  ;;  %v2064_v32 = vadd.s32 %v2063_v7, %v2059_v59  ;;  %vm1892_vm1 = vcmp.eq.s32.totalorder %v6885_v60, 0  ;;  %v1893_v46 = vxor.u32 2147483648, %v5227_v13  ;;  %v771_v59 = vpop.permute.xlu1 %770 }
 0x2f7   : > { %vm1895_vm2 = vcmp.eq.s32.totalorder %v6885_v60, 2  ;;  %vm6926_vm3 = vcmp.le.f32.partialorder %v2108_v18, 0.7853982  ;;  %v2331_v1 = vsub.s32 32, %v2330_v54  ;;  %v2003_v4 = vsel %vm1992_vm9, nan, %v2002_v35 }
 0x2f8   : > { %v1897_v3 = vsel %vm1895_vm2, %v1896_v34, %v5227_v13  ;;  %v2187_v44 = vor.u32 4788187, %v2186_v24  ;;  %v2065_v27 = vadd.s32 536870912, %v2064_v32  ;;  %v1894_v63 = vsel %vm1892_vm1, %v5225_v17, %v1893_v46 }
 0x2f9   : > { %v6935_v0 = vsel %vm2110_vm11, %v2194_v52, %v6866_v6  ;;  %v2324_v30 = vor.u32 8388608, %v2323_v28  ;;  %v6937_v26 = vshrl.u32 %v2328_v57, 5  ;;  %v1898_v18 = vsel %vm1891_vm13, %v1894_v63, %v1897_v3 }
 0x2fa   : > { %v2188_v36 = vand.u32 2147483647, %v2187_v44  ;;  %v2190_v47 = vcvt.s32.f32 %v2183_v19  ;;  %v6941_v25 = vshrl.u32 %v2065_v27, 30  ;;  %v1899_v40 = vsel %vm1888_vm14, nan, %v1898_v18 }
 0x2fb   : > { %v2334_v31 = vshrl.u32 %v5550_v55, %v2331_v1  ;;  %v2337_v43 = vshrl.u32 %v5551_v5, %v2331_v1  ;;  %v2340_v6 = vshrl.u32 %v5552_v14, %v2331_v1  ;;  %v4858_v39 = vpack.c.bf16 %v2003_v4, %v1899_v40 }
 0x2fc   : > { %v2191_v29 = vmul.f32 %v2190_v47, %v2188_v36  ;;  %v2067_v48 = vshll.u32 %v6941_v25, 30  ;;  %v2339_v60 = vshll.u32 %v5551_v5, %v2330_v54  ;;  %v2333_v20 = vshll.u32 %v5549_v53, %v2330_v54 }
 0x2fd   : > { %v2336_v15 = vshll.u32 %v5550_v55, %v2330_v54  ;;  %v2342_v56 = vshll.u32 %v5552_v14, %v2330_v54  ;;  %v2343_v41 = vshrl.u32 %v5553_v16, %v2331_v1  ;;  %4918 = vst [vmem:[%s6238_s7 + $0x20] sm:$0xff] %v4858_v39   ;;  %v2346_v61 = vshrl.u32 %v5554_v23, %v2331_v1 }
 0x2fe   : > { %v6955_v51 = vsub.s32 %v2064_v32, %v2067_v48  ;;  %v2341_v57 = vor.u32 %v2340_v6, %v2339_v60  ;;  %v908_v21 = vadd.f32 %v6858_v2, %v6851_v50  ;;  %v2335_v58 = vor.u32 %v2334_v31, %v2333_v20 }
 0x2ff   : > { %v2338_v17 = vor.u32 %v2337_v43, %v2336_v15  ;;  %v2344_v35 = vor.u32 %v2343_v41, %v2342_v56  ;;  %v2345_v52 = vshll.u32 %v5553_v16, %v2330_v54  ;;  %v2192_v7 = vxor.u32 2147483648, %v2191_v29 }
 0x300   : > { %v2197_v28 = vsel %vm6926_vm3, 0, %v6935_v0  ;;  %v2070_v13 = vsub.s32 0, %v6955_v51  ;;  %v879_v34 = vmul.f32 %v5884_v10, %v771_v59  ;;  %vm2006_vm4 = vcmp.lt.s32.totalorder %v6781_v42, 0 }
 0x301   : > { %v2060_v19 = vadd.s32 %v6898_v8, %v6896_v37  ;;  %v2347_v50 = vor.u32 %v2346_v61, %v2345_v52  ;;  %vm2351_vm5 = vcmp.lt.s32.totalorder %v6937_v26, 4  ;;  %v2364_v2 = vshll.u32 %v2324_v30, 8 }
 0x302   : > { %v4676_v54 = vmin.u32 %v2070_v13, %v6955_v51  ;;  %v2332_v24 = vshrl.u32 %v5549_v53, %v2331_v1  ;;  %vm2348_vm6 = vcmp.lt.s32.totalorder %v6937_v26, 1  ;;  %v2353_v32 = vsel %vm2351_vm5, %v2341_v57, 2102212464 }
 0x303   : > { %vm2349_vm7 = vcmp.lt.s32.totalorder %v6937_v26, 2  ;;  %v2356_v46 = vsel %vm2348_vm6, %v2335_v58, %v2338_v17  ;;  %v2357_v4 = vsel %vm2351_vm5, %v2344_v35, 920167782  ;;  %v6979_v37 = vadd.f32 %v5890_v12, %v908_v21 }
 0x304   : > { %v2193_v8 = vsel %vm2110_vm11, %v2192_v7, %v2191_v29  ;;  %v2072_v3 = vclz %v4676_v54  ;;  %vm2350_vm8 = vcmp.lt.s32.totalorder %v6937_v26, 3  ;;  %v2352_v1 = vsel %vm2348_vm6, %v2332_v24, %v2335_v58 }
 0x305   : > { %vm6986_vm9 = vcmp.le.f32.partialorder %v2004_v45, 0.7853982  ;;  %v2354_v27 = vsel %vm2350_vm8, %v2338_v17, %v2353_v32  ;;  %v2358_v63 = vsel %vm2350_vm8, %v2341_v57, %v2357_v4  ;;  %v2360_v0 = vsel %vm2348_vm6, %v2338_v17, %v2341_v57 }
 0x306   : > { %v2361_v30 = vsel %vm2351_vm5, %v2347_v50, 1326507024  ;;  %v4677_v18 = vadd.s32 4294967294, %v2072_v3  ;;  %v2090_v36 = vsub.s32 4, %v6941_v25  ;;  %v2359_v47 = vsel %vm2349_vm7, %v2356_v46, %v2358_v63 }
 0x307   : > { %v2362_v40 = vsel %vm2350_vm8, %v2344_v35, %v2361_v30  ;;  %v2196_v45 = vsel %vm6926_vm3, %v6677_v62, %v2193_v8  ;;  %v7000_v43 = vmul.u32.u64.low %v2364_v2, %v2359_v47  ;;  %v7001_v6 = vmul.u32.u64.high %v2364_v2, %v2359_v47, %v7000_v43 }
 0x308   : > { %v2363_v31 = vsel %vm2349_vm7, %v2360_v0, %v2362_v40  ;;  %vm4678_vm10 = vcmp.lt.s32.totalorder %v4677_v18, 0  ;;  %v2355_v39 = vsel %vm2349_vm7, %v2352_v1, %v2354_v27  ;;  %v2212_v20 = vand.u32 2147483647, %v6979_v37 }
 0x309   : > { %v7005_v29 = vmul.u32.u64.low %v2364_v2, %v2363_v31  ;;  %v7006_v48 = vmul.u32.u64.high %v2364_v2, %v2363_v31, %v7005_v29  ;;  %v2075_v60 = vsel %vm4678_vm10, 0, %v4677_v18  ;;  %v2215_v15 = vand.u32 2139095040, %v6979_v37 }
 0x30a   : > { %v911_v38 = vadd.f32 %v879_v34, %v6855_v33  ;;  %5228 = vcosq.f32 %v2196_v45  ;;  %v2076_v56 = vsub.s32 32, %v2075_v60  ;;  %v2080_v41 = vsub.s32 4294967266, %v2075_v60 }
 0x30b   : > { %v2091_v59 = vsel %vm2006_vm4, %v2090_v36, %v6941_v25  ;;  %5230 = vsinq.f32 %v2196_v45  ;;  %v2371_v26 = vmul.u32 %v2364_v2, %v2355_v39  ;;  %v2374_v57 = vadd.s32 1, %v7001_v6 }
 0x30c   : > { %v2216_v61 = vshrl.u32 %v2215_v15, 23  ;;  %v2077_v21 = vshll.u32 %v6955_v51, %v2075_v60  ;;  %v2078_v58 = vshrl.u32 %v2060_v19, %v2076_v56  ;;  %v2081_v17 = vadd.s32 127, %v2080_v41 }
 0x30d   : > { %vm2373_vm11 = vc.u32 %v7006_v48, %v7000_v43  ;;  %v2219_v52 = vand.u32 8388607, %v2212_v20  ;;  %v7021_v7 = vadd.f32 %v5890_v12, %v911_v38  ;;  %v2093_v34 = vsel %vm6986_vm9, 0, %v2091_v59 }
 0x30e   : > { %v2375_v33 = vsel %vm2373_vm11, %v2374_v57, %v7001_v6  ;;  %v4683_v35 = vadd.s32 4294967169, %v2216_v61  ;;  %v2079_v25 = vor.u32 %v2078_v58, %v2077_v21  ;;  %v2082_v13 = vshll.u32 %v2081_v17, 23 }
 0x30f   : > { %v2376_v50 = vadd.s32 %v2375_v33, %v2371_v26  ;;  %v2201_v19 = vadd.s32 3, %v2197_v28  ;;  %v2097_v24 = vadd.s32 3, %v2093_v34  ;;  %v2220_v32 = vor.u32 8388608, %v2219_v52 }
 0x310   : > { %v2222_v51 = vadd.s32 1, %v4683_v35  ;;  %v2083_v2 = vor.u32 4788187, %v2082_v13  ;;  %v2527_v46 = vand.u32 2139095040, %v7021_v7  ;;  %v2086_v8 = vcvt.s32.f32 %v2079_v25 }
 0x311   : > { %v2377_v54 = vadd.s32 536870912, %v2376_v50  ;;  %v7030_v63 = vmul.f32 %v5887_v11, %v5881_v9  ;;  %v7033_v30 = vand.u32 3, %v2201_v19  ;;  %v7035_v18 = vand.u32 3, %v2097_v24 }
 0x312   : > { %vm2223_vm12 = vcmp.gt.s32.totalorder %v2222_v51, 0  ;;  %v2084_v4 = vand.u32 2147483647, %v2083_v2  ;;  %v7038_v36 = vadd.s32 %v7000_v43, %v7006_v48  ;;  %v7042_v31 = vshll.u32 %v2220_v32, 8 }
 0x313   : > { %v7026_v3 = vshrl.u32 %v2377_v54, 30  ;;  %v2224_v1 = vsel %vm2223_vm12, %v2222_v51, 0  ;;  %v2528_v6 = vshrl.u32 %v2527_v46, 23  ;;  %v2524_v34 = vand.u32 2147483647, %v7021_v7 }
 0x314   : > { %v2226_v27 = vand.u32 31, %v2224_v1  ;;  %v2087_v0 = vmul.f32 %v2086_v8, %v2084_v4  ;;  %v2225_v26 = vshrl.u32 %v2224_v1, 5  ;;  %vm2203_vm0 = vcmp.lt.s32.totalorder %v7033_v30, 2 }
 0x315   : > { %v2379_v28 = vshll.u32 %v7026_v3, 30  ;;  %v4695_v2 = vadd.s32 4294967169, %v2528_v6  ;;  %vm2200_vm3 = vweird.f32 %v6677_v62  ;;  %vm2207_vm5 = vcmp.eq.s32.totalorder %v7033_v30, 2 }
 0x316   : > { %v2227_v47 = vsub.s32 32, %v2226_v27  ;;  %v2088_v40 = vxor.u32 2147483648, %v2087_v0  ;;  %v2229_v9 = vshll.u32 %v5549_v53, %v2226_v27  ;;  %v2232_v60 = vshll.u32 %v5550_v55, %v2226_v27 }
 0x317   : > { %v7040_v45 = vsub.s32 %v2376_v50, %v2379_v28  ;;  %v7044_v39 = vpop.eup %5228  ;;  %v2235_v56 = vshll.u32 %v5551_v5, %v2226_v27  ;;  %v2238_v17 = vshll.u32 %v5552_v14, %v2226_v27  ;;  %v2241_v35 = vshll.u32 %v5553_v16, %v2226_v27 }
 0x318   : > { %v2230_v29 = vshrl.u32 %v5550_v55, %v2227_v47  ;;  %v2233_v15 = vshrl.u32 %v5551_v5, %v2227_v47  ;;  %v5231_v38 = vpop.eup %5230  ;;  %v2089_v43 = vsel %vm2006_vm4, %v2088_v40, %v2087_v0  ;;  %v2236_v41 = vshrl.u32 %v5552_v14, %v2227_v47 }
 0x319   : > { %v2382_v48 = vsub.s32 0, %v7040_v45  ;;  %v2092_v59 = vsel %vm6986_vm9, %v6781_v42, %v2089_v43  ;;  %v2239_v33 = vshrl.u32 %v5553_v16, %v2227_v47  ;;  %v2242_v52 = vshrl.u32 %v5554_v23, %v2227_v47 }
 0x31a   : > { %v2231_v57 = vor.u32 %v2230_v29, %v2229_v9  ;;  %v2234_v61 = vor.u32 %v2233_v15, %v2232_v60  ;;  %5232 = vcosq.f32 %v2092_v59  ;;  %v2237_v58 = vor.u32 %v2236_v41, %v2235_v56  ;;  %v767_v60 = vpop.permute.xlu0 %766 }
 0x31b   : > { %v4688_v21 = vmin.u32 %v2382_v48, %v7040_v45  ;;  %5234 = vsinq.f32 %v2092_v59  ;;  %v2205_v25 = vxor.u32 2147483648, %v5231_v38  ;;  %v2208_v44 = vxor.u32 2147483648, %v7044_v39 }
 0x31c   : > { %v2228_v50 = vshrl.u32 %v5549_v53, %v2227_v47  ;;  %v2240_v51 = vor.u32 %v2239_v33, %v2238_v17  ;;  %v2243_v19 = vor.u32 %v2242_v52, %v2241_v35  ;;  %vm2244_vm13 = vcmp.lt.s32.totalorder %v2225_v26, 1  ;;  %v7088_v17 = vpop.permute.xlu1 %569 }
 0x31d   : > { %v2384_v13 = vclz %v4688_v21  ;;  %vm2246_vm14 = vcmp.lt.s32.totalorder %v2225_v26, 3  ;;  %vm2247_vm15 = vcmp.lt.s32.totalorder %v2225_v26, 4  ;;  %v2252_v32 = vsel %vm2244_vm13, %v2231_v57, %v2234_v61 }
 0x31e   : > { %v2249_v24 = vsel %vm2247_vm15, %v2237_v58, 2102212464  ;;  %v2253_v46 = vsel %vm2247_vm15, %v2240_v51, 920167782  ;;  %v2256_v4 = vsel %vm2244_vm13, %v2234_v61, %v2237_v58  ;;  %vm2245_vm2 = vcmp.lt.s32.totalorder %v2225_v26, 2 }
 0x31f   : > { %v4689_v54 = vadd.s32 4294967294, %v2384_v13  ;;  %v2254_v8 = vsel %vm2246_vm14, %v2237_v58, %v2253_v46  ;;  %v2257_v1 = vsel %vm2247_vm15, %v2243_v19, 1326507024  ;;  %v2248_v0 = vsel %vm2244_vm13, %v2228_v50, %v2231_v57 }
 0x320   : > { %v2255_v28 = vsel %vm2245_vm2, %v2252_v32, %v2254_v8  ;;  %v2258_v47 = vsel %vm2246_vm14, %v2240_v51, %v2257_v1  ;;  %v2250_v9 = vsel %vm2246_vm14, %v2234_v61, %v2249_v24  ;;  %vm2204_vm4 = vcmp.eq.s32.totalorder %v7033_v30, 0  ;;  %v7100_v51 = vpop.permute.xlu0 %565  ;;  %v7110_v8 = vpop.permute.xlu1 %580 }
 0x321   : > { %vm4690_vm1 = vcmp.lt.s32.totalorder %v4689_v54, 0  ;;  %v2259_v29 = vsel %vm2245_vm2, %v2256_v4, %v2258_v47  ;;  %v7078_v48 = vmul.u32.u64.low %v7042_v31, %v2255_v28  ;;  %v7079_v56 = vmul.u32.u64.high %v7042_v31, %v2255_v28, %v7078_v48 }
 0x322   : > { %v2387_v27 = vsel %vm4690_vm1, 0, %v4689_v54  ;;  %v7074_v15 = vmul.u32.u64.low %v7042_v31, %v2259_v29  ;;  %v7075_v43 = vmul.u32.u64.high %v7042_v31, %v2259_v29, %v7074_v15  ;;  %vm2096_vm6 = vweird.f32 %v6781_v42 }
 0x323   : > { %v2388_v40 = vsub.s32 32, %v2387_v27  ;;  %v2392_v6 = vsub.s32 4294967266, %v2387_v27  ;;  %v2534_v59 = vadd.s32 1, %v4695_v2  ;;  %v2206_v57 = vsel %vm2204_vm4, %v7044_v39, %v2205_v25 }
 0x324   : > { %v2209_v61 = vsel %vm2207_vm5, %v2208_v44, %v5231_v38  ;;  %v2251_v58 = vsel %vm2245_vm2, %v2248_v0, %v2250_v9  ;;  %vm2103_vm7 = vcmp.eq.s32.totalorder %v7035_v18, 2  ;;  %v2531_v35 = vand.u32 8388607, %v2524_v34  ;;  %v7120_v15 = vpop.permute.xlu0 %576 }
 0x325   : > { %v2393_v41 = vadd.s32 127, %v2392_v6  ;;  %v2390_v21 = vshrl.u32 %v7038_v36, %v2388_v40  ;;  %vm2535_vm8 = vcmp.gt.s32.totalorder %v2534_v59, 0  ;;  %v2389_v13 = vshll.u32 %v7040_v45, %v2387_v27 }
 0x326   : > { %vm2269_vm9 = vc.u32 %v7075_v43, %v7078_v48  ;;  %v2270_v39 = vadd.s32 1, %v7079_v56  ;;  %v2536_v36 = vsel %vm2535_vm8, %v2534_v59, 0  ;;  %v2210_v26 = vsel %vm2203_vm0, %v2206_v57, %v2209_v61 }
 0x327   : > { %v2394_v33 = vshll.u32 %v2393_v41, 23  ;;  %v5233_v52 = vpop.eup %5232  ;;  %v2267_v50 = vmul.u32 %v7042_v31, %v2251_v58  ;;  %v2391_v2 = vor.u32 %v2390_v21, %v2389_v13  ;;  %v2538_v54 = vand.u32 31, %v2536_v36 }
 0x328   : > { %v5235_v38 = vpop.eup %5234  ;;  %v2104_v25 = vxor.u32 2147483648, %v5233_v52  ;;  %v2271_v45 = vsel %vm2269_vm9, %v2270_v39, %v7079_v56  ;;  %vm2100_vm10 = vcmp.eq.s32.totalorder %v7035_v18, 0  ;;  %v878_v30 = vmul.f32 %v5884_v10, %v767_v60  ;;  %v7130_v39 = vpop.permute.xlu1 %591 }
 0x329   : > { %v2395_v44 = vor.u32 4788187, %v2394_v33  ;;  %v2101_v19 = vxor.u32 2147483648, %v5235_v38  ;;  %v2272_v32 = vadd.s32 %v2271_v45, %v2267_v50  ;;  %v2211_v46 = vsel %vm2200_vm3, nan, %v2210_v26 }
 0x32a   : > { %v2105_v24 = vsel %vm2103_vm7, %v2104_v25, %v5235_v38  ;;  %vm2099_vm11 = vcmp.lt.s32.totalorder %v7035_v18, 2  ;;  %v2539_v4 = vsub.s32 32, %v2538_v54  ;;  %v2532_v28 = vor.u32 8388608, %v2531_v35 }
 0x32b   : > { %v2102_v31 = vsel %vm2100_vm10, %v5233_v52, %v2101_v19  ;;  %v2396_v27 = vand.u32 2147483647, %v2395_v44  ;;  %v2273_v0 = vadd.s32 536870912, %v2272_v32  ;;  %v2398_v40 = vcvt.s32.f32 %v2391_v2  ;;  %v7137_v2 = vpop.permute.xlu0 %587 }
 0x32c   : > { %v2106_v1 = vsel %vm2099_vm11, %v2102_v31, %v2105_v24  ;;  %v2542_v6 = vshrl.u32 %v5550_v55, %v2539_v4  ;;  %v2545_v62 = vshrl.u32 %v5551_v5, %v2539_v4  ;;  %v2541_v18 = vshll.u32 %v5549_v53, %v2538_v54 }
 0x32d   : > { %v2107_v47 = vsel %vm2096_vm6, nan, %v2106_v1  ;;  %v7116_v29 = vshrl.u32 %v2273_v0, 30  ;;  %v2548_v60 = vshrl.u32 %v5552_v14, %v2539_v4  ;;  %v2537_v56 = vshrl.u32 %v2536_v36, 5  ;;  %v7148_v0 = vpop.permute.xlu1 %602 }
 0x32e   : > { %v4863_v9 = vpack.c.bf16 %v2211_v46, %v2107_v47  ;;  %v2544_v41 = vshll.u32 %v5550_v55, %v2538_v54  ;;  %v2550_v42 = vshll.u32 %v5552_v14, %v2538_v54  ;;  %v2551_v59 = vshrl.u32 %v5553_v16, %v2539_v4 }
 0x32f   : > { %v2399_v57 = vmul.f32 %v2398_v40, %v2396_v27  ;;  %v2275_v61 = vshll.u32 %v7116_v29, 30  ;;  %v2543_v21 = vor.u32 %v2542_v6, %v2541_v18  ;;  %v2547_v58 = vshll.u32 %v5551_v5, %v2538_v54 }
 0x330   : > { %4919 = vst [vmem:[%s6238_s7 + $0x28] sm:$0xff] %v4863_v9   ;;  %v2546_v33 = vor.u32 %v2545_v62, %v2544_v41  ;;  %v2552_v35 = vor.u32 %v2551_v59, %v2550_v42  ;;  %v2553_v52 = vshll.u32 %v5553_v16, %v2538_v54  ;;  %v2554_v13 = vshrl.u32 %v5554_v23, %v2539_v4 }
 0x331   : > { %v7132_v36 = vsub.s32 %v2272_v32, %v2275_v61  ;;  %v2549_v38 = vor.u32 %v2548_v60, %v2547_v58  ;;  %vm2318_vm12 = vcmp.lt.s32.totalorder %v6845_v49, 0  ;;  %v2572_v25 = vshll.u32 %v2532_v28, 8 }
 0x332   : > { %v2555_v26 = vor.u32 %v2554_v13, %v2553_v52  ;;  %v910_v44 = vadd.f32 %v878_v30, %v7030_v63  ;;  %v2400_v50 = vxor.u32 2147483648, %v2399_v57  ;;  %vm2556_vm13 = vcmp.lt.s32.totalorder %v2537_v56, 1 }
 0x333   : > { %v2278_v19 = vsub.s32 0, %v7132_v36  ;;  %vm2559_vm14 = vcmp.lt.s32.totalorder %v2537_v56, 4  ;;  %v2540_v45 = vshrl.u32 %v5549_v53, %v2539_v4  ;;  %vm2558_vm15 = vcmp.lt.s32.totalorder %v2537_v56, 3 }
 0x334   : > { %v2564_v54 = vsel %vm2556_vm13, %v2543_v21, %v2546_v33  ;;  %v2565_v24 = vsel %vm2559_vm14, %v2552_v35, 920167782  ;;  %vm2557_vm0 = vcmp.lt.s32.totalorder %v2537_v56, 2  ;;  %v2561_v46 = vsel %vm2559_vm14, %v2549_v38, 2102212464 }
 0x335   : > { %v4684_v32 = vmin.u32 %v2278_v19, %v7132_v36  ;;  %v2566_v31 = vsel %vm2558_vm15, %v2549_v38, %v2565_v24  ;;  %v2568_v30 = vsel %vm2556_vm13, %v2546_v33, %v2549_v38  ;;  %v2569_v1 = vsel %vm2559_vm14, %v2555_v26, 1326507024 }
 0x336   : > { %v2567_v63 = vsel %vm2557_vm0, %v2564_v54, %v2566_v31  ;;  %v7146_v27 = vadd.f32 %v5890_v12, %v910_v44  ;;  %v2401_v4 = vsel %vm2318_vm12, %v2400_v50, %v2399_v57  ;;  %v2402_v28 = vsub.s32 4, %v7026_v3  ;;  %v7168_v57 = vpop.permute.xlu0 %598  ;;  %v7189_v44 = vpop.permute.xlu1 %613 }
 0x337   : > { %v2280_v47 = vclz %v4684_v32  ;;  %v2560_v40 = vsel %vm2556_vm13, %v2540_v45, %v2543_v21  ;;  %v2562_v6 = vsel %vm2558_vm15, %v2546_v33, %v2561_v46  ;;  %v2570_v62 = vsel %vm2558_vm15, %v2552_v35, %v2569_v1 }
 0x338   : > { %v7156_v9 = vmul.u32.u64.low %v2572_v25, %v2567_v63  ;;  %v7157_v18 = vmul.u32.u64.high %v2572_v25, %v2567_v63, %v7156_v9  ;;  %vm7162_vm1 = vcmp.le.f32.partialorder %v2316_v22, 0.7853982  ;;  %v2298_v42 = vsub.s32 4, %v7116_v29 }
 0x339   : > { %v4685_v41 = vadd.s32 4294967294, %v2280_v47  ;;  %v2571_v59 = vsel %vm2557_vm0, %v2568_v30, %v2570_v62  ;;  %v2404_v61 = vsel %vm7162_vm1, %v6845_v49, %v2401_v4  ;;  %v2423_v33 = vand.u32 2139095040, %v7146_v27 }
 0x33a   : > { %v7173_v21 = vmul.u32.u64.low %v2572_v25, %v2571_v59  ;;  %v7174_v58 = vmul.u32.u64.high %v2572_v25, %v2571_v59, %v7173_v21  ;;  %vm7179_vm2 = vcmp.le.f32.partialorder %v2212_v20, 0.7853982  ;;  %vm2214_vm3 = vcmp.lt.s32.totalorder %v6979_v37, 0  ;;  %v7200_v31 = vpop.permute.xlu0 %609 }
 0x33b   : > { %vm4686_vm4 = vcmp.lt.s32.totalorder %v4685_v41, 0  ;;  %v2563_v35 = vsel %vm2557_vm0, %v2560_v40, %v2562_v6  ;;  %v2403_v52 = vsel %vm2318_vm12, %v2402_v28, %v7026_v3  ;;  %v2582_v38 = vadd.s32 1, %v7157_v18 }
 0x33c   : > { %v2283_v13 = vsel %vm4686_vm4, 0, %v4685_v41  ;;  %v2424_v26 = vshrl.u32 %v2423_v33, 23  ;;  %5236 = vcosq.f32 %v2404_v61  ;;  %v2268_v20 = vadd.s32 %v7078_v48, %v7075_v43 }
 0x33d   : > { %v2284_v50 = vsub.s32 32, %v2283_v13  ;;  %v2288_v19 = vsub.s32 4294967266, %v2283_v13  ;;  %v2299_v56 = vsel %vm2214_vm3, %v2298_v42, %v7116_v29  ;;  %v2579_v45 = vmul.u32 %v2572_v25, %v2563_v35 }
 0x33e   : > { %vm2581_vm5 = vc.u32 %v7174_v58, %v7156_v9  ;;  %v4691_v3 = vadd.s32 4294967169, %v2424_v26  ;;  %v2285_v54 = vshll.u32 %v7132_v36, %v2283_v13  ;;  %v2405_v43 = vsel %vm7162_vm1, 0, %v2403_v52  ;;  %v7207_v36 = vpop.permute.xlu1 %624  ;;  %v7213_v59 = vpop.permute.xlu0 %620 }
 0x33f   : > { %v2286_v24 = vshrl.u32 %v2268_v20, %v2284_v50  ;;  %v2289_v32 = vadd.s32 127, %v2288_v19  ;;  %v2583_v46 = vsel %vm2581_vm5, %v2582_v38, %v7157_v18  ;;  %v2420_v63 = vand.u32 2147483647, %v7146_v27 }
 0x340   : > { %v2584_v48 = vadd.s32 %v2583_v46, %v2579_v45  ;;  %v2430_v29 = vadd.s32 1, %v4691_v3  ;;  %v2301_v1 = vsel %vm7179_vm2, 0, %v2299_v56  ;;  %5238 = vsinq.f32 %v2404_v61 }
 0x341   : > { %v2287_v25 = vor.u32 %v2286_v24, %v2285_v54  ;;  %v2290_v30 = vshll.u32 %v2289_v32, 23  ;;  %v2409_v28 = vadd.s32 3, %v2405_v43  ;;  %v2305_v6 = vadd.s32 3, %v2301_v1 }
 0x342   : > { %v2585_v4 = vadd.s32 536870912, %v2584_v48  ;;  %vm2431_vm6 = vcmp.gt.s32.totalorder %v2430_v29, 0  ;;  %v2427_v18 = vand.u32 8388607, %v2420_v63  ;;  %v7223_v20 = vpop.permute.xlu1 %635  ;;  %vm2408_vm15 = vweird.f32 %v6845_v49 }
 0x343   : > { %v2291_v47 = vor.u32 4788187, %v2290_v30  ;;  %v2432_v40 = vsel %vm2431_vm6, %v2430_v29, 0  ;;  %v2294_v42 = vcvt.s32.f32 %v2287_v25  ;;  %v7216_v35 = vand.u32 3, %v2409_v28  ;;  %v7237_v30 = vpop.permute.xlu0 %631 }
 0x344   : > { %v7209_v62 = vshrl.u32 %v2585_v4, 30  ;;  %v2434_v60 = vand.u32 31, %v2432_v40  ;;  %v7218_v52 = vand.u32 3, %v2305_v6  ;;  %v2428_v38 = vor.u32 8388608, %v2427_v18 }
 0x345   : > { %v2292_v41 = vand.u32 2147483647, %v2291_v47  ;;  %vm2412_vm7 = vcmp.eq.s32.totalorder %v7216_v35, 0  ;;  %vm2415_vm8 = vcmp.eq.s32.totalorder %v7216_v35, 2  ;;  %vm2411_vm12 = vcmp.lt.s32.totalorder %v7216_v35, 2 }
 0x346   : > { %v2587_v21 = vshll.u32 %v7209_v62, 30  ;;  %v2435_v33 = vsub.s32 32, %v2434_v60  ;;  %v2437_v19 = vshll.u32 %v5549_v53, %v2434_v60  ;;  %v2440_v24 = vshll.u32 %v5550_v55, %v2434_v60 }
 0x347   : > { %v2295_v61 = vmul.f32 %v2294_v42, %v2292_v41  ;;  %v2443_v32 = vshll.u32 %v5551_v5, %v2434_v60  ;;  %v2446_v25 = vshll.u32 %v5552_v14, %v2434_v60  ;;  %v2449_v18 = vshll.u32 %v5553_v16, %v2434_v60 }
 0x348   : > { %v7220_v13 = vsub.s32 %v2584_v48, %v2587_v21  ;;  %v2438_v26 = vshrl.u32 %v5550_v55, %v2435_v33  ;;  %v2441_v56 = vshrl.u32 %v5551_v5, %v2435_v33  ;;  %v2444_v45 = vshrl.u32 %v5552_v14, %v2435_v33  ;;  %v7251_v21 = vpop.permute.xlu1 %646 }
 0x349   : > { %v2296_v50 = vxor.u32 2147483648, %v2295_v61  ;;  %v7228_v3 = vpop.eup %5236  ;;  %v2447_v46 = vshrl.u32 %v5553_v16, %v2435_v33  ;;  %v2433_v48 = vshrl.u32 %v2432_v40, 5  ;;  %v2450_v41 = vshrl.u32 %v5554_v23, %v2435_v33 }
 0x34a   : > { %v2590_v54 = vsub.s32 0, %v7220_v13  ;;  %v2439_v29 = vor.u32 %v2438_v26, %v2437_v19  ;;  %v2442_v28 = vor.u32 %v2441_v56, %v2440_v24  ;;  %v2445_v47 = vor.u32 %v2444_v45, %v2443_v32 }
 0x34b   : > { %v2297_v43 = vsel %vm2214_vm3, %v2296_v50, %v2295_v61  ;;  %v2448_v6 = vor.u32 %v2447_v46, %v2446_v25  ;;  %v2580_v40 = vadd.s32 %v7156_v9, %v7174_v58  ;;  %v7249_v42 = vshll.u32 %v2428_v38, 8 }
 0x34c   : > { %v2300_v1 = vsel %vm7179_vm2, %v6979_v37, %v2297_v43  ;;  %v4696_v4 = vmin.u32 %v2590_v54, %v7220_v13  ;;  %v2416_v61 = vxor.u32 2147483648, %v7228_v3  ;;  %v2436_v26 = vshrl.u32 %v5549_v53, %v2435_v33  ;;  %v7258_v54 = vpop.permute.xlu0 %642 }
 0x34d   : > { %5240 = vcosq.f32 %v2300_v1  ;;  %v2451_v60 = vor.u32 %v2450_v41, %v2449_v18  ;;  %vm2452_vm9 = vcmp.lt.s32.totalorder %v2433_v48, 1  ;;  %v5239_v50 = vpop.eup %5238  ;;  %vm2454_vm10 = vcmp.lt.s32.totalorder %v2433_v48, 3 }
 0x34e   : > { %5242 = vsinq.f32 %v2300_v1  ;;  %v2592_v22 = vclz %v4696_v4  ;;  %vm2455_vm11 = vcmp.lt.s32.totalorder %v2433_v48, 4  ;;  %v2460_v56 = vsel %vm2452_vm9, %v2439_v29, %v2442_v28 }
 0x34f   : > { %v2457_v9 = vsel %vm2455_vm11, %v2445_v47, 2102212464  ;;  %v2461_v58 = vsel %vm2455_vm11, %v2448_v6, 920167782  ;;  %v2464_v38 = vsel %vm2452_vm9, %v2442_v28, %v2445_v47  ;;  %v2465_v45 = vsel %vm2455_vm11, %v2451_v60, 1326507024 }
 0x350   : > { %v4697_v19 = vadd.s32 4294967294, %v2592_v22  ;;  %vm2453_vm14 = vcmp.lt.s32.totalorder %v2433_v48, 2  ;;  %v2462_v33 = vsel %vm2454_vm10, %v2445_v47, %v2461_v58  ;;  %v2466_v24 = vsel %vm2454_vm10, %v2448_v6, %v2465_v45  ;;  %v782_v22 = vpop.permute.xlu1 %781 }
 0x351   : > { %v2413_v32 = vxor.u32 2147483648, %v5239_v50  ;;  %v2463_v43 = vsel %vm2453_vm14, %v2460_v56, %v2462_v33  ;;  %v2467_v25 = vsel %vm2453_vm14, %v2464_v38, %v2466_v24  ;;  %v2456_v18 = vsel %vm2452_vm9, %v2436_v26, %v2439_v29  ;;  %v778_v33 = vpop.permute.xlu0 %777 }
 0x352   : > { %vm4698_vm13 = vcmp.lt.s32.totalorder %v4697_v19, 0  ;;  %v2458_v41 = vsel %vm2454_vm10, %v2442_v28, %v2457_v9  ;;  %v7268_v60 = vmul.u32.u64.low %v7249_v42, %v2467_v25  ;;  %v7269_v47 = vmul.u32.u64.high %v7249_v42, %v2467_v25, %v7268_v60 }
 0x353   : > { %v2595_v46 = vsel %vm4698_vm13, 0, %v4697_v19  ;;  %v7272_v6 = vmul.u32.u64.low %v7249_v42, %v2463_v43  ;;  %v7273_v19 = vmul.u32.u64.high %v7249_v42, %v2463_v43, %v7272_v6  ;;  %v669_v45 = vmul.f32 %v5887_v11, %v7088_v17 }
 0x354   : > { %v2596_v1 = vsub.s32 32, %v2595_v46  ;;  %v2600_v4 = vsub.s32 4294967266, %v2595_v46  ;;  %v2597_v56 = vshll.u32 %v7220_v13, %v2595_v46  ;;  %v2414_v29 = vsel %vm2412_vm7, %v7228_v3, %v2413_v32 }
 0x355   : > { %v2417_v28 = vsel %vm2415_vm8, %v2416_v61, %v5239_v50  ;;  %v2459_v26 = vsel %vm2453_vm14, %v2456_v18, %v2458_v41  ;;  %v881_v9 = vmul.f32 %v5884_v10, %v782_v22  ;;  %vm2307_vm0 = vcmp.lt.s32.totalorder %v7218_v52, 2 }
 0x356   : > { %v2598_v58 = vshrl.u32 %v2580_v40, %v2596_v1  ;;  %v2601_v38 = vadd.s32 127, %v2600_v4  ;;  %v668_v24 = vmul.f32 %v5887_v11, %v7100_v51  ;;  %vm2308_vm1 = vcmp.eq.s32.totalorder %v7218_v52, 0 }
 0x357   : > { %vm2477_vm2 = vc.u32 %v7269_v47, %v7272_v6  ;;  %v2478_v17 = vadd.s32 1, %v7273_v19  ;;  %v913_v3 = vadd.f32 %v881_v9, %v669_v45  ;;  %v2418_v61 = vsel %vm2411_vm12, %v2414_v29, %v2417_v28 }
 0x358   : > { %v2599_v13 = vor.u32 %v2598_v58, %v2597_v56  ;;  %v2602_v40 = vshll.u32 %v2601_v38, 23  ;;  %v2475_v32 = vmul.u32 %v7249_v42, %v2459_v26  ;;  %v880_v46 = vmul.f32 %v5884_v10, %v778_v33 }
 0x359   : > { %vm2311_vm3 = vcmp.eq.s32.totalorder %v7218_v52, 2  ;;  %v2479_v25 = vsel %vm2477_vm2, %v2478_v17, %v7273_v19  ;;  %v7300_v1 = vadd.f32 %v5890_v12, %v913_v3  ;;  %v2419_v35 = vsel %vm2408_vm15, nan, %v2418_v61  ;;  %v793_v3 = vpop.permute.xlu1 %792 }
 0x35a   : > { %v5241_v48 = vpop.eup %5240  ;;  %v2603_v50 = vor.u32 4788187, %v2602_v40  ;;  %v2606_v41 = vcvt.s32.f32 %v2599_v13  ;;  %v2480_v22 = vadd.s32 %v2479_v25, %v2475_v32  ;;  %v912_v45 = vadd.f32 %v880_v46, %v668_v24 }
 0x35b   : > { %v5243_v43 = vpop.eup %5242  ;;  %v2312_v51 = vxor.u32 2147483648, %v5241_v48  ;;  %v2732_v42 = vand.u32 2147483647, %v7300_v1  ;;  %v2735_v56 = vand.u32 2139095040, %v7300_v1  ;;  %vm2304_vm4 = vweird.f32 %v6979_v37 }
 0x35c   : > { %v2309_v4 = vxor.u32 2147483648, %v5243_v43  ;;  %v2604_v18 = vand.u32 2147483647, %v2603_v50  ;;  %v2481_v19 = vadd.s32 536870912, %v2480_v22  ;;  %v2610_v9 = vsub.s32 4, %v7209_v62 }
 0x35d   : > { %v2313_v60 = vsel %vm2311_vm3, %v2312_v51, %v5243_v43  ;;  %v2736_v28 = vshrl.u32 %v2735_v56, 23  ;;  %v2739_v17 = vand.u32 8388607, %v2732_v42  ;;  %vm2526_vm5 = vcmp.lt.s32.totalorder %v7021_v7, 0 }
 0x35e   : > { %v2310_v58 = vsel %vm2308_vm1, %v5241_v48, %v2309_v4  ;;  %v2607_v38 = vmul.f32 %v2606_v41, %v2604_v18  ;;  %v7312_v33 = vshrl.u32 %v2481_v19, 30  ;;  %v7319_v52 = vadd.f32 %v5890_v12, %v912_v45 }
 0x35f   : > { %v2314_v29 = vsel %vm2307_vm0, %v2310_v58, %v2313_v60  ;;  %v4703_v40 = vadd.s32 4294967169, %v2736_v28  ;;  %v7323_v61 = vsel %vm2526_vm5, %v2610_v9, %v7209_v62  ;;  %v883_v32 = vmul.f32 %v5884_v10, %v793_v3 }
 0x360   : > { %v2315_v49 = vsel %vm2304_vm4, nan, %v2314_v29  ;;  %v2608_v26 = vxor.u32 2147483648, %v2607_v38  ;;  %v2483_v37 = vshll.u32 %v7312_v33, 30  ;;  %vm7328_vm6 = vcmp.le.f32.partialorder %v2524_v34, 0.7853982 }
 0x361   : > { %v4868_v13 = vpack.c.bf16 %v2419_v35, %v2315_v49  ;;  %v2742_v48 = vadd.s32 1, %v4703_v40  ;;  %v671_v43 = vmul.f32 %v5887_v11, %v7110_v8  ;;  %v2740_v51 = vor.u32 8388608, %v2739_v17 }
 0x362   : > { %v2609_v24 = vsel %vm2526_vm5, %v2608_v26, %v2607_v38  ;;  %v2484_v50 = vsub.s32 %v2480_v22, %v2483_v37  ;;  %v2631_v18 = vand.u32 2139095040, %v7319_v52  ;;  %v2613_v34 = vsel %vm7328_vm6, 0, %v7323_v61 }
 0x363   : > { %4920 = vst [vmem:[%s6238_s7 + $0x30] sm:$0xff] %v4868_v13   ;;  %vm2743_vm7 = vcmp.gt.s32.totalorder %v2742_v48, 0  ;;  %v2612_v25 = vsel %vm7328_vm6, %v7021_v7, %v2609_v24  ;;  %v2476_v22 = vadd.s32 %v7272_v6, %v7269_v47  ;;  %v2628_v8 = vand.u32 2147483647, %v7319_v52 }
 0x364   : > { %v2486_v62 = vsub.s32 0, %v2484_v50  ;;  %v2744_v4 = vsel %vm2743_vm7, %v2742_v48, 0  ;;  %v915_v60 = vadd.f32 %v883_v32, %v671_v43  ;;  %5244 = vcosq.f32 %v2612_v25 }
 0x365   : > { %v2746_v41 = vand.u32 31, %v2744_v4  ;;  %v2506_v56 = vsub.s32 4, %v7312_v33  ;;  %v7345_v38 = vshll.u32 %v2740_v51, 8  ;;  %v2745_v45 = vshrl.u32 %v2744_v4, 5 }
 0x366   : > { %v4692_v35 = vmin.u32 %v2486_v62, %v2484_v50  ;;  %v2632_v28 = vshrl.u32 %v2631_v18, 23  ;;  %5246 = vsinq.f32 %v2612_v25  ;;  %v7358_v62 = vadd.f32 %v5890_v12, %v915_v60 }
 0x367   : > { %v2747_v58 = vsub.s32 32, %v2746_v41  ;;  %v2749_v29 = vshll.u32 %v5549_v53, %v2746_v41  ;;  %v2752_v26 = vshll.u32 %v5550_v55, %v2746_v41  ;;  %v2755_v13 = vshll.u32 %v5551_v5, %v2746_v41 }
 0x368   : > { %v2488_v19 = vclz %v4692_v35  ;;  %v2758_v40 = vshll.u32 %v5552_v14, %v2746_v41  ;;  %v2761_v24 = vshll.u32 %v5553_v16, %v2746_v41  ;;  %v4699_v51 = vadd.s32 4294967169, %v2632_v28 }
 0x369   : > { %v2750_v49 = vshrl.u32 %v5550_v55, %v2747_v58  ;;  %v2753_v47 = vshrl.u32 %v5551_v5, %v2747_v58  ;;  %v2756_v6 = vshrl.u32 %v5552_v14, %v2747_v58  ;;  %v2759_v17 = vshrl.u32 %v5553_v16, %v2747_v58 }
 0x36a   : > { %v4693_v9 = vadd.s32 4294967294, %v2488_v19  ;;  %v2762_v48 = vshrl.u32 %v5554_v23, %v2747_v58  ;;  %vm2764_vm9 = vcmp.lt.s32.totalorder %v2745_v45, 1  ;;  %vm2767_vm10 = vcmp.lt.s32.totalorder %v2745_v45, 4 }
 0x36b   : > { %v2751_v3 = vor.u32 %v2750_v49, %v2749_v29  ;;  %v2754_v37 = vor.u32 %v2753_v47, %v2752_v26  ;;  %v2757_v61 = vor.u32 %v2756_v6, %v2755_v13  ;;  %v2760_v32 = vor.u32 %v2759_v17, %v2758_v40 }
 0x36c   : > { %vm4694_vm8 = vcmp.lt.s32.totalorder %v4693_v9, 0  ;;  %v2763_v43 = vor.u32 %v2762_v48, %v2761_v24  ;;  %v2748_v35 = vshrl.u32 %v5549_v53, %v2747_v58  ;;  %vm2766_vm11 = vcmp.lt.s32.totalorder %v2745_v45, 3 }
 0x36d   : > { %v2491_v46 = vsel %vm4694_vm8, 0, %v4693_v9  ;;  %v2772_v41 = vsel %vm2764_vm9, %v2751_v3, %v2754_v37  ;;  %v2773_v19 = vsel %vm2767_vm10, %v2760_v32, 920167782  ;;  %v2769_v26 = vsel %vm2767_vm10, %v2757_v61, 2102212464 }
 0x36e   : > { %v2492_v4 = vsub.s32 32, %v2491_v46  ;;  %v2496_v18 = vsub.s32 4294967266, %v2491_v46  ;;  %v2493_v25 = vshll.u32 %v2484_v50, %v2491_v46  ;;  %vm2765_vm12 = vcmp.lt.s32.totalorder %v2745_v45, 2 }
 0x36f   : > { %v2774_v28 = vsel %vm2766_vm11, %v2757_v61, %v2773_v19  ;;  %v2776_v60 = vsel %vm2764_vm9, %v2754_v37, %v2757_v61  ;;  %v2777_v47 = vsel %vm2767_vm10, %v2763_v43, 1326507024  ;;  %v2768_v13 = vsel %vm2764_vm9, %v2748_v35, %v2751_v3  ;;  %v789_v19 = vpop.permute.xlu0 %788 }
 0x370   : > { %v2494_v29 = vshrl.u32 %v2476_v22, %v2492_v4  ;;  %v2497_v49 = vadd.s32 127, %v2496_v18  ;;  %v2775_v58 = vsel %vm2765_vm12, %v2772_v41, %v2774_v28  ;;  %v2770_v40 = vsel %vm2766_vm11, %v2754_v37, %v2769_v26 }
 0x371   : > { %v2778_v17 = vsel %vm2766_vm11, %v2760_v32, %v2777_v47  ;;  %v7369_v50 = vmul.u32.u64.low %v7345_v38, %v2775_v58  ;;  %v7370_v22 = vmul.u32.u64.high %v7345_v38, %v2775_v58, %v7369_v50  ;;  %v7373_v24 = vpop.eup %5244  ;;  %v2617_v48 = vadd.s32 3, %v2613_v34 }
 0x372   : > { %v2495_v6 = vor.u32 %v2494_v29, %v2493_v25  ;;  %v2498_v9 = vshll.u32 %v2497_v49, 23  ;;  %vm2422_vm13 = vcmp.lt.s32.totalorder %v7146_v27, 0  ;;  %v2779_v46 = vsel %vm2765_vm12, %v2776_v60, %v2778_v17 }
 0x373   : > { %v2507_v3 = vsel %vm2422_vm13, %v2506_v56, %v7312_v33  ;;  %v7381_v37 = vmul.u32.u64.low %v7345_v38, %v2779_v46  ;;  %v7382_v32 = vmul.u32.u64.high %v7345_v38, %v2779_v46, %v7381_v37  ;;  %v2771_v18 = vsel %vm2765_vm12, %v2768_v13, %v2770_v40 }
 0x374   : > { %v2499_v61 = vor.u32 4788187, %v2498_v9  ;;  %v2502_v4 = vcvt.s32.f32 %v2495_v6  ;;  %v2638_v35 = vadd.s32 1, %v4699_v51  ;;  %vm7387_vm14 = vcmp.le.f32.partialorder %v2420_v63, 0.7853982  ;;  %v7399_v51 = vpop.eup %5246 }
 0x375   : > { %v2790_v41 = vadd.s32 1, %v7370_v22  ;;  %v2635_v33 = vand.u32 8388607, %v2628_v8  ;;  %v2943_v56 = vand.u32 2139095040, %v7358_v62  ;;  %v7395_v25 = vand.u32 3, %v2617_v48 }
 0x376   : > { %v2500_v43 = vand.u32 2147483647, %v2499_v61  ;;  %v2509_v45 = vsel %vm7387_vm14, 0, %v2507_v3  ;;  %vm2639_vm15 = vcmp.gt.s32.totalorder %v2638_v35, 0  ;;  %v670_v63 = vmul.f32 %v5887_v11, %v7120_v15 }
 0x377   : > { %v2787_v49 = vmul.u32 %v7345_v38, %v2771_v18  ;;  %vm2789_vm0 = vc.u32 %v7382_v32, %v7369_v50  ;;  %v2640_v26 = vsel %vm2639_vm15, %v2638_v35, 0  ;;  %v882_v6 = vmul.f32 %v5884_v10, %v789_v19 }
 0x378   : > { %v2503_v29 = vmul.f32 %v2502_v4, %v2500_v43  ;;  %v2791_v60 = vsel %vm2789_vm0, %v2790_v41, %v7370_v22  ;;  %v2642_v47 = vand.u32 31, %v2640_v26  ;;  %v2513_v9 = vadd.s32 3, %v2509_v45 }
 0x379   : > { %v2792_v13 = vadd.s32 %v2791_v60, %v2787_v49  ;;  %v2636_v58 = vor.u32 8388608, %v2635_v33  ;;  %v2944_v40 = vshrl.u32 %v2943_v56, 23  ;;  %vm2623_vm1 = vcmp.eq.s32.totalorder %v7395_v25, 2 }
 0x37a   : > { %v2504_v28 = vxor.u32 2147483648, %v2503_v29  ;;  %v7411_v38 = vshrl.u32 %v2640_v26, 5  ;;  %v2643_v17 = vsub.s32 32, %v2642_v47  ;;  %v2645_v48 = vshll.u32 %v5549_v53, %v2642_v47 }
 0x37b   : > { %v2793_v61 = vadd.s32 536870912, %v2792_v13  ;;  %v2648_v46 = vshll.u32 %v5550_v55, %v2642_v47  ;;  %v2651_v3 = vshll.u32 %v5551_v5, %v2642_v47  ;;  %vm2620_vm2 = vcmp.eq.s32.totalorder %v7395_v25, 0 }
 0x37c   : > { %v2505_v15 = vsel %vm2422_vm13, %v2504_v28, %v2503_v29  ;;  %v2646_v37 = vshrl.u32 %v5550_v55, %v2643_v17  ;;  %v2649_v43 = vshrl.u32 %v5551_v5, %v2643_v17  ;;  %v2654_v4 = vshll.u32 %v5552_v14, %v2642_v47 }
 0x37d   : > { %v2508_v22 = vsel %vm7387_vm14, %v7146_v27, %v2505_v15  ;;  %v7423_v18 = vshrl.u32 %v2793_v61, 30  ;;  %v2652_v35 = vshrl.u32 %v5552_v14, %v2643_v17  ;;  %v2655_v34 = vshrl.u32 %v5553_v16, %v2643_v17 }
 0x37e   : > { %5248 = vcosq.f32 %v2508_v22  ;;  %v2647_v41 = vor.u32 %v2646_v37, %v2645_v48  ;;  %v2650_v33 = vor.u32 %v2649_v43, %v2648_v46  ;;  %v2657_v56 = vshll.u32 %v5553_v16, %v2642_v47 }
 0x37f   : > { %5250 = vsinq.f32 %v2508_v22  ;;  %v2658_v19 = vshrl.u32 %v5554_v23, %v2643_v17  ;;  %vm2619_vm3 = vcmp.lt.s32.totalorder %v7395_v25, 2  ;;  %v2624_v29 = vxor.u32 2147483648, %v7373_v24 }
 0x380   : > { %v2795_v45 = vshll.u32 %v7423_v18, 30  ;;  %v2653_v49 = vor.u32 %v2652_v35, %v2651_v3  ;;  %v2656_v26 = vor.u32 %v2655_v34, %v2654_v4  ;;  %v2514_v28 = vand.u32 3, %v2513_v9 }
 0x381   : > { %v2659_v60 = vor.u32 %v2658_v19, %v2657_v56  ;;  %v7432_v15 = vshll.u32 %v2636_v58, 8  ;;  %v7434_v22 = vadd.f32 %v882_v6, %v670_v63  ;;  %v2621_v48 = vxor.u32 2147483648, %v7399_v51 }
 0x382   : > { %v7437_v61 = vsub.s32 %v2792_v13, %v2795_v45  ;;  %vm2660_vm4 = vcmp.lt.s32.totalorder %v7411_v38, 1  ;;  %vm2663_vm5 = vcmp.lt.s32.totalorder %v7411_v38, 4  ;;  %vm2616_vm6 = vweird.f32 %v7021_v7 }
 0x383   : > { %vm2662_vm7 = vcmp.lt.s32.totalorder %v7411_v38, 3  ;;  %v2668_v47 = vsel %vm2660_vm4, %v2647_v41, %v2650_v33  ;;  %v2669_v9 = vsel %vm2663_vm5, %v2656_v26, 920167782  ;;  %v4711_v58 = vadd.s32 4294967169, %v2944_v40 }
 0x384   : > { %v2625_v63 = vsel %vm2623_vm1, %v2624_v29, %v7399_v51  ;;  %v2798_v6 = vsub.s32 0, %v7437_v61  ;;  %vm2661_vm8 = vcmp.lt.s32.totalorder %v7411_v38, 2  ;;  %v2670_v13 = vsel %vm2662_vm7, %v2653_v49, %v2669_v9 }
 0x385   : > { %v2665_v46 = vsel %vm2663_vm5, %v2653_v49, 2102212464  ;;  %v2671_v3 = vsel %vm2661_vm8, %v2668_v47, %v2670_v13  ;;  %v2672_v37 = vsel %vm2660_vm4, %v2650_v33, %v2653_v49  ;;  %v2673_v43 = vsel %vm2663_vm5, %v2659_v60, 1326507024 }
 0x386   : > { %v2622_v40 = vsel %vm2620_vm2, %v7373_v24, %v2621_v48  ;;  %v4704_v51 = vmin.u32 %v2798_v6, %v7437_v61  ;;  %v2644_v4 = vshrl.u32 %v5549_v53, %v2643_v17  ;;  %v2674_v35 = vsel %vm2662_vm7, %v2656_v26, %v2673_v43 }
 0x387   : > { %vm2512_vm9 = vweird.f32 %v7146_v27  ;;  %v2675_v34 = vsel %vm2661_vm8, %v2672_v37, %v2674_v35  ;;  %v7467_v56 = vmul.u32.u64.low %v7432_v15, %v2671_v3  ;;  %v7468_v19 = vmul.u32.u64.high %v7432_v15, %v2671_v3, %v7467_v56 }
 0x388   : > { %v2950_v29 = vadd.s32 1, %v4711_v58  ;;  %vm2515_vm10 = vcmp.lt.s32.totalorder %v2514_v28, 2  ;;  %v2800_v24 = vclz %v4704_v51  ;;  %v2664_v45 = vsel %vm2660_vm4, %v2644_v4, %v2647_v41 }
 0x389   : > { %v2666_v17 = vsel %vm2662_vm7, %v2650_v33, %v2665_v46  ;;  %v2626_v49 = vsel %vm2619_vm3, %v2622_v40, %v2625_v63  ;;  %v7478_v26 = vmul.u32.u64.low %v7432_v15, %v2675_v34  ;;  %v7479_v60 = vmul.u32.u64.high %v7432_v15, %v2675_v34, %v7478_v26 }
 0x38a   : > { %vm2951_vm11 = vcmp.gt.s32.totalorder %v2950_v29, 0  ;;  %vm2516_vm12 = vcmp.eq.s32.totalorder %v2514_v28, 0  ;;  %vm2519_vm13 = vcmp.eq.s32.totalorder %v2514_v28, 2  ;;  %v4705_v47 = vadd.s32 4294967294, %v2800_v24 }
 0x38b   : > { %v5249_v48 = vpop.eup %5248  ;;  %v2952_v9 = vsel %vm2951_vm11, %v2950_v29, 0  ;;  %v2667_v41 = vsel %vm2661_vm8, %v2664_v45, %v2666_v17  ;;  %v2686_v33 = vadd.s32 1, %v7468_v19  ;;  %v2627_v25 = vsel %vm2616_vm6, nan, %v2626_v49 }
 0x38c   : > { %v5251_v58 = vpop.eup %5250  ;;  %v2520_v6 = vxor.u32 2147483648, %v5249_v48  ;;  %v2954_v13 = vand.u32 31, %v2952_v9  ;;  %vm4706_vm14 = vcmp.lt.s32.totalorder %v4705_v47, 0  ;;  %v2940_v46 = vand.u32 2147483647, %v7358_v62 }
 0x38d   : > { %v2517_v63 = vxor.u32 2147483648, %v5251_v58  ;;  %v2788_v37 = vadd.s32 %v7369_v50, %v7382_v32  ;;  %v2803_v43 = vsel %vm4706_vm14, 0, %v4705_v47  ;;  %vm2685_vm15 = vc.u32 %v7479_v60, %v7467_v56 }
 0x38e   : > { %v2521_v3 = vsel %vm2519_vm13, %v2520_v6, %v5251_v58  ;;  %v2804_v40 = vsub.s32 32, %v2803_v43  ;;  %v2808_v51 = vsub.s32 4294967266, %v2803_v43  ;;  %v2683_v4 = vmul.u32 %v7432_v15, %v2667_v41 }
 0x38f   : > { %v2518_v38 = vsel %vm2516_vm12, %v5249_v48, %v2517_v63  ;;  %v2805_v35 = vshll.u32 %v7437_v61, %v2803_v43  ;;  %v2687_v34 = vsel %vm2685_vm15, %v2686_v33, %v7468_v19  ;;  %v2955_v29 = vsub.s32 32, %v2954_v13 }
 0x390   : > { %v2522_v7 = vsel %vm2515_vm10, %v2518_v38, %v2521_v3  ;;  %vm2734_vm0 = vcmp.lt.s32.totalorder %v7300_v1, 0  ;;  %v2806_v32 = vshrl.u32 %v2788_v37, %v2804_v40  ;;  %v2809_v24 = vadd.s32 127, %v2808_v51 }
 0x391   : > { %v2523_v50 = vsel %vm2512_vm9, nan, %v2522_v7  ;;  %v2688_v45 = vadd.s32 %v2687_v34, %v2683_v4  ;;  %v2818_v49 = vsub.s32 4, %v7423_v18  ;;  %v2947_v28 = vand.u32 8388607, %v2940_v46 }
 0x392   : > { %v4873_v17 = vpack.c.bf16 %v2627_v25, %v2523_v50  ;;  %v7504_v15 = vadd.f32 %v5890_v12, %v7434_v22  ;;  %v2807_v61 = vor.u32 %v2806_v32, %v2805_v35  ;;  %v2810_v19 = vshll.u32 %v2809_v24, 23 }
 0x393   : > { %v2689_v26 = vadd.s32 536870912, %v2688_v45  ;;  %v2953_v27 = vshrl.u32 %v2952_v9, 5  ;;  %v2957_v48 = vshll.u32 %v5549_v53, %v2954_v13  ;;  %v2958_v47 = vshrl.u32 %v5550_v55, %v2955_v29 }
 0x394   : > { %4921 = vst [vmem:[%s6238_s7 + $0x38] sm:$0xff] %v4873_v17   ;;  %v2961_v58 = vshrl.u32 %v5551_v5, %v2955_v29  ;;  %v2964_v6 = vshrl.u32 %v5552_v14, %v2955_v29  ;;  %v2811_v41 = vor.u32 4788187, %v2810_v19  ;;  %v2960_v25 = vshll.u32 %v5550_v55, %v2954_v13 }
 0x395   : > { %v2690_v33 = vshrl.u32 %v2689_v26, 30  ;;  %v2963_v22 = vshll.u32 %v5551_v5, %v2954_v13  ;;  %v2966_v63 = vshll.u32 %v5552_v14, %v2954_v13  ;;  %v2967_v3 = vshrl.u32 %v5553_v16, %v2955_v29 }
 0x396   : > { %v2969_v9 = vshll.u32 %v5553_v16, %v2954_v13  ;;  %v2970_v37 = vshrl.u32 %v5554_v23, %v2955_v29  ;;  %v2812_v43 = vand.u32 2147483647, %v2811_v41  ;;  %v2814_v38 = vcvt.s32.f32 %v2807_v61 }
 0x397   : > { %v2691_v40 = vshll.u32 %v2690_v33, 30  ;;  %v2965_v51 = vor.u32 %v2964_v6, %v2963_v22  ;;  %v2959_v4 = vor.u32 %v2958_v47, %v2957_v48  ;;  %v2962_v7 = vor.u32 %v2961_v58, %v2960_v25 }
 0x398   : > { %v2968_v35 = vor.u32 %v2967_v3, %v2966_v63  ;;  %v2971_v34 = vor.u32 %v2970_v37, %v2969_v9  ;;  %vm7519_vm1 = vcmp.le.f32.partialorder %v2732_v42, 0.7853982  ;;  %v2815_v32 = vmul.f32 %v2814_v38, %v2812_v43 }
 0x399   : > { %v7523_v24 = vsub.s32 %v2688_v45, %v2691_v40  ;;  %v2948_v13 = vor.u32 8388608, %v2947_v28  ;;  %v2819_v17 = vsel %vm2734_vm0, %v2818_v49, %v7423_v18  ;;  %v2956_v61 = vshrl.u32 %v5549_v53, %v2955_v29 }
 0x39a   : > { %vm2975_vm2 = vcmp.lt.s32.totalorder %v2953_v27, 4  ;;  %v2839_v19 = vand.u32 2139095040, %v7504_v15  ;;  %vm2972_vm3 = vcmp.lt.s32.totalorder %v2953_v27, 1  ;;  %vm2974_vm4 = vcmp.lt.s32.totalorder %v2953_v27, 3 }
 0x39b   : > { %v2694_v26 = vsub.s32 0, %v7523_v24  ;;  %v2977_v42 = vsel %vm2975_vm2, %v2965_v51, 2102212464  ;;  %v2816_v48 = vxor.u32 2147483648, %v2815_v32  ;;  %v2980_v47 = vsel %vm2972_vm3, %v2959_v4, %v2962_v7 }
 0x39c   : > { %v2981_v45 = vsel %vm2975_vm2, %v2968_v35, 920167782  ;;  %v2985_v58 = vsel %vm2975_vm2, %v2971_v34, 1326507024  ;;  %v2714_v6 = vsub.s32 4, %v2690_v33  ;;  %v2984_v29 = vsel %vm2972_vm3, %v2962_v7, %v2965_v51 }
 0x39d   : > { %v4700_v28 = vmin.u32 %v2694_v26, %v7523_v24  ;;  %v2982_v18 = vsel %vm2974_vm4, %v2965_v51, %v2981_v45  ;;  %vm2630_vm5 = vcmp.lt.s32.totalorder %v7319_v52, 0  ;;  %vm2973_vm6 = vcmp.lt.s32.totalorder %v2953_v27, 2 }
 0x39e   : > { %v2986_v49 = vsel %vm2974_vm4, %v2968_v35, %v2985_v58  ;;  %v2988_v41 = vshll.u32 %v2948_v13, 8  ;;  %v2976_v22 = vsel %vm2972_vm3, %v2956_v61, %v2959_v4  ;;  %v2978_v63 = vsel %vm2974_vm4, %v2962_v7, %v2977_v42 }
 0x39f   : > { %v2696_v25 = vclz %v4700_v28  ;;  %v2983_v3 = vsel %vm2973_vm6, %v2980_v47, %v2982_v18  ;;  %v2817_v9 = vsel %vm2734_vm0, %v2816_v48, %v2815_v32  ;;  %v2821_v37 = vsel %vm7519_vm1, 0, %v2819_v17 }
 0x3a0   : > { %v2987_v43 = vsel %vm2973_vm6, %v2984_v29, %v2986_v49  ;;  %v2840_v38 = vshrl.u32 %v2839_v19, 23  ;;  %v2715_v51 = vsel %vm2630_vm5, %v2714_v6, %v2690_v33  ;;  %v2979_v13 = vsel %vm2973_vm6, %v2976_v22, %v2978_v63 }
 0x3a1   : > { %v4701_v40 = vadd.s32 4294967294, %v2696_v25  ;;  %v7545_v35 = vmul.u32.u64.low %v2988_v41, %v2987_v43  ;;  %v7546_v34 = vmul.u32.u64.high %v2988_v41, %v2987_v43, %v7545_v35  ;;  %v2820_v32 = vsel %vm7519_vm1, %v7300_v1, %v2817_v9 }
 0x3a2   : > { %v7548_v4 = vmul.u32.u64.low %v2988_v41, %v2983_v3  ;;  %v7549_v27 = vmul.u32.u64.high %v2988_v41, %v2983_v3, %v7548_v4  ;;  %v4707_v7 = vadd.s32 4294967169, %v2840_v38  ;;  %vm7557_vm7 = vcmp.le.f32.partialorder %v2628_v8, 0.7853982 }
 0x3a3   : > { %vm4702_vm8 = vcmp.lt.s32.totalorder %v4701_v40, 0  ;;  %v2836_v33 = vand.u32 2147483647, %v7504_v15  ;;  %v2825_v61 = vadd.s32 3, %v2821_v37  ;;  %v2684_v19 = vadd.s32 %v7467_v56, %v7479_v60  ;;  %v804_v60 = vpop.permute.xlu1 %803 }
 0x3a4   : > { %v2699_v26 = vsel %vm4702_vm8, 0, %v4701_v40  ;;  %v2846_v42 = vadd.s32 1, %v4707_v7  ;;  %v2717_v50 = vsel %vm7557_vm7, 0, %v2715_v51  ;;  %v2995_v45 = vmul.u32 %v2988_v41, %v2979_v13 }
 0x3a5   : > { %v2700_v48 = vsub.s32 32, %v2699_v26  ;;  %v2704_v47 = vsub.s32 4294967266, %v2699_v26  ;;  %5252 = vcosq.f32 %v2820_v32  ;;  %vm2997_vm9 = vc.u32 %v7546_v34, %v7548_v4 }
 0x3a6   : > { %v2998_v8 = vadd.s32 1, %v7549_v27  ;;  %vm2847_vm10 = vcmp.gt.s32.totalorder %v2846_v42, 0  ;;  %v2701_v58 = vshll.u32 %v7523_v24, %v2699_v26  ;;  %v2721_v18 = vadd.s32 3, %v2717_v50 }
 0x3a7   : > { %v2702_v28 = vshrl.u32 %v2684_v19, %v2700_v48  ;;  %v2705_v6 = vadd.s32 127, %v2704_v47  ;;  %v2848_v56 = vsel %vm2847_vm10, %v2846_v42, 0  ;;  %v2843_v49 = vand.u32 8388607, %v2836_v33 }
 0x3a8   : > { %v2999_v29 = vsel %vm2997_vm9, %v2998_v8, %v7549_v27  ;;  %v2850_v41 = vand.u32 31, %v2848_v56  ;;  %5254 = vsinq.f32 %v2820_v32  ;;  %v885_v9 = vmul.f32 %v5884_v10, %v804_v60 }
 0x3a9   : > { %v2703_v25 = vor.u32 %v2702_v28, %v2701_v58  ;;  %v2706_v22 = vshll.u32 %v2705_v6, 23  ;;  %v3000_v63 = vadd.s32 %v2999_v29, %v2995_v45  ;;  %v673_v24 = vmul.f32 %v5887_v11, %v7130_v39  ;;  %v800_v28 = vpop.permute.xlu0 %799 }
 0x3aa   : > { %v2851_v3 = vsub.s32 32, %v2850_v41  ;;  %v7578_v38 = vmul.f32 %v5887_v11, %v7137_v2  ;;  %v7580_v40 = vand.u32 3, %v2825_v61  ;;  %v7582_v51 = vand.u32 3, %v2721_v18 }
 0x3ab   : > { %v2707_v37 = vor.u32 4788187, %v2706_v22  ;;  %v3001_v43 = vadd.s32 536870912, %v3000_v63  ;;  %v2844_v35 = vor.u32 8388608, %v2843_v49  ;;  %v2710_v27 = vcvt.s32.f32 %v2703_v25 }
 0x3ac   : > { %v2860_v32 = vshrl.u32 %v5552_v14, %v2851_v3  ;;  %v2854_v19 = vshrl.u32 %v5550_v55, %v2851_v3  ;;  %v2857_v39 = vshrl.u32 %v5551_v5, %v2851_v3  ;;  %v2863_v26 = vshrl.u32 %v5553_v16, %v2851_v3 }
 0x3ad   : > { %v2708_v13 = vand.u32 2147483647, %v2707_v37  ;;  %v7584_v7 = vshrl.u32 %v3001_v43, 30  ;;  %v917_v42 = vadd.f32 %v885_v9, %v673_v24  ;;  %v2849_v48 = vshrl.u32 %v2848_v56, 5 }
 0x3ae   : > { %v2859_v47 = vshll.u32 %v5551_v5, %v2850_v41  ;;  %v2853_v50 = vshll.u32 %v5549_v53, %v2850_v41  ;;  %v2856_v45 = vshll.u32 %v5550_v55, %v2850_v41  ;;  %v2862_v8 = vshll.u32 %v5552_v14, %v2850_v41 }
 0x3af   : > { %v2711_v2 = vmul.f32 %v2710_v27, %v2708_v13  ;;  %v3003_v61 = vshll.u32 %v7584_v7, 30  ;;  %v2866_v58 = vshrl.u32 %v5554_v23, %v2851_v3  ;;  %v7598_v29 = vshll.u32 %v2844_v35, 8 }
 0x3b0   : > { %v2861_v18 = vor.u32 %v2860_v32, %v2859_v47  ;;  %v2855_v49 = vor.u32 %v2854_v19, %v2853_v50  ;;  %v2858_v25 = vor.u32 %v2857_v39, %v2856_v45  ;;  %v2864_v56 = vor.u32 %v2863_v26, %v2862_v8 }
 0x3b1   : > { %v2712_v6 = vxor.u32 2147483648, %v2711_v2  ;;  %v7596_v60 = vsub.s32 %v3000_v63, %v3003_v61  ;;  %v2865_v22 = vshll.u32 %v5553_v16, %v2850_v41  ;;  %v7605_v43 = vadd.f32 %v5890_v12, %v917_v42 }
 0x3b2   : > { %v5253_v9 = vpop.eup %5252  ;;  %v884_v63 = vmul.f32 %v5884_v10, %v800_v28  ;;  %vm2828_vm11 = vcmp.eq.s32.totalorder %v7580_v40, 0  ;;  %vm2831_vm12 = vcmp.eq.s32.totalorder %v7580_v40, 2  ;;  %v2852_v41 = vshrl.u32 %v5549_v53, %v2851_v3 }
 0x3b3   : > { %v2713_v24 = vsel %vm2630_vm5, %v2712_v6, %v2711_v2  ;;  %v3006_v37 = vsub.s32 0, %v7596_v60  ;;  %v2867_v13 = vor.u32 %v2866_v58, %v2865_v22  ;;  %vm2871_vm13 = vcmp.lt.s32.totalorder %v2849_v48, 4 }
 0x3b4   : > { %v2716_v35 = vsel %vm7557_vm7, %v7319_v52, %v2713_v24  ;;  %vm2868_vm14 = vcmp.lt.s32.totalorder %v2849_v48, 1  ;;  %v2873_v32 = vsel %vm2871_vm13, %v2861_v18, 2102212464  ;;  %v2832_v39 = vxor.u32 2147483648, %v5253_v9 }
 0x3b5   : > { %5256 = vcosq.f32 %v2716_v35  ;;  %v4712_v27 = vmin.u32 %v3006_v37, %v7596_v60  ;;  %v5255_v19 = vpop.eup %5254  ;;  %v2876_v26 = vsel %vm2868_vm14, %v2855_v49, %v2858_v25  ;;  %v2877_v42 = vsel %vm2871_vm13, %v2864_v56, 920167782 }
 0x3b6   : > { %5258 = vsinq.f32 %v2716_v35  ;;  %vm2942_vm15 = vcmp.lt.s32.totalorder %v7358_v62, 0  ;;  %vm2869_vm0 = vcmp.lt.s32.totalorder %v2849_v48, 2  ;;  %vm2870_vm1 = vcmp.lt.s32.totalorder %v2849_v48, 3 }
 0x3b7   : > { %v3008_v17 = vclz %v4712_v27  ;;  %v2872_v3 = vsel %vm2868_vm14, %v2852_v41, %v2855_v49  ;;  %v2874_v2 = vsel %vm2870_vm1, %v2858_v25, %v2873_v32  ;;  %v2878_v61 = vsel %vm2870_vm1, %v2861_v18, %v2877_v42 }
 0x3b8   : > { %v2880_v47 = vsel %vm2868_vm14, %v2858_v25, %v2861_v18  ;;  %v2881_v50 = vsel %vm2871_vm13, %v2867_v13, 1326507024  ;;  %vm2827_vm2 = vcmp.lt.s32.totalorder %v7580_v40, 2  ;;  %v2829_v45 = vxor.u32 2147483648, %v5255_v19 }
 0x3b9   : > { %v4713_v8 = vadd.s32 4294967294, %v3008_v17  ;;  %v2879_v58 = vsel %vm2869_vm0, %v2876_v26, %v2878_v61  ;;  %v2882_v28 = vsel %vm2870_vm1, %v2864_v56, %v2881_v50  ;;  %vm7623_vm3 = vcmp.le.f32.partialorder %v2940_v46, 0.7853982 }
 0x3ba   : > { %v2996_v49 = vadd.s32 %v7548_v4, %v7546_v34  ;;  %v2883_v18 = vsel %vm2869_vm0, %v2880_v47, %v2882_v28  ;;  %v7631_v25 = vmul.u32.u64.low %v7598_v29, %v2879_v58  ;;  %v7632_v22 = vmul.u32.u64.high %v7598_v29, %v2879_v58, %v7631_v25 }
 0x3bb   : > { %vm4714_vm4 = vcmp.lt.s32.totalorder %v4713_v8, 0  ;;  %v2875_v24 = vsel %vm2869_vm0, %v2872_v3, %v2874_v2  ;;  %v7637_v56 = vmul.u32.u64.low %v7598_v29, %v2883_v18  ;;  %v7638_v37 = vmul.u32.u64.high %v7598_v29, %v2883_v18, %v7637_v56 }
 0x3bc   : > { %v3011_v46 = vsel %vm4714_vm4, 0, %v4713_v8  ;;  %v3026_v35 = vsub.s32 4, %v7584_v7  ;;  %v3151_v41 = vand.u32 2139095040, %v7605_v43  ;;  %v916_v34 = vadd.f32 %v884_v63, %v7578_v38 }
 0x3bd   : > { %vm2824_vm5 = vweird.f32 %v7300_v1  ;;  %v2830_v4 = vsel %vm2828_vm11, %v5253_v9, %v2829_v45  ;;  %v2833_v48 = vsel %vm2831_vm12, %v2832_v39, %v5255_v19  ;;  %v3012_v13 = vsub.s32 32, %v3011_v46 }
 0x3be   : > { %v3016_v27 = vsub.s32 4294967266, %v3011_v46  ;;  %vm2723_vm6 = vcmp.lt.s32.totalorder %v7582_v51, 2  ;;  %v2891_v32 = vmul.u32 %v7598_v29, %v2875_v24  ;;  %v2894_v26 = vadd.s32 1, %v7632_v22 }
 0x3bf   : > { %v3148_v42 = vand.u32 2147483647, %v7605_v43  ;;  %v3152_v17 = vshrl.u32 %v3151_v41, 23  ;;  %vm2720_vm7 = vweird.f32 %v7319_v52  ;;  %v3013_v38 = vshll.u32 %v7596_v60, %v3011_v46 }
 0x3c0   : > { %v3014_v63 = vshrl.u32 %v2996_v49, %v3012_v13  ;;  %v3017_v9 = vadd.s32 127, %v3016_v27  ;;  %vm2893_vm8 = vc.u32 %v7638_v37, %v7631_v25  ;;  %v3027_v19 = vsel %vm2942_vm15, %v3026_v35, %v7584_v7 }
 0x3c1   : > { %v2895_v29 = vsel %vm2893_vm8, %v2894_v26, %v7632_v22  ;;  %v4719_v39 = vadd.s32 4294967169, %v3152_v17  ;;  %v7661_v3 = vadd.f32 %v5890_v12, %v916_v34  ;;  %vm2724_vm9 = vcmp.eq.s32.totalorder %v7582_v51, 0 }
 0x3c2   : > { %v3015_v2 = vor.u32 %v3014_v63, %v3013_v38  ;;  %v3018_v61 = vshll.u32 %v3017_v9, 23  ;;  %v2896_v60 = vadd.s32 %v2895_v29, %v2891_v32  ;;  %v5257_v47 = vpop.eup %5256  ;;  %v2834_v50 = vsel %vm2827_vm2, %v2830_v4, %v2833_v48 }
 0x3c3   : > { %vm2727_vm10 = vcmp.eq.s32.totalorder %v7582_v51, 2  ;;  %v3155_v7 = vand.u32 8388607, %v3148_v42  ;;  %v3158_v45 = vadd.s32 1, %v4719_v39  ;;  %v5259_v8 = vpop.eup %5258  ;;  %v2728_v58 = vxor.u32 2147483648, %v5257_v47 }
 0x3c4   : > { %v3019_v28 = vor.u32 4788187, %v3018_v61  ;;  %v3029_v49 = vsel %vm7623_vm3, 0, %v3027_v19  ;;  %v2897_v18 = vadd.s32 536870912, %v2896_v60  ;;  %v2725_v22 = vxor.u32 2147483648, %v5259_v8 }
 0x3c5   : > { %v3022_v24 = vcvt.s32.f32 %v3015_v2  ;;  %vm3159_vm11 = vcmp.gt.s32.totalorder %v3158_v45, 0  ;;  %v3047_v56 = vand.u32 2139095040, %v7661_v3  ;;  %v2729_v40 = vsel %vm2727_vm10, %v2728_v58, %v5259_v8 }
 0x3c6   : > { %v3020_v46 = vand.u32 2147483647, %v3019_v28  ;;  %v2898_v35 = vshrl.u32 %v2897_v18, 30  ;;  %v3160_v41 = vsel %vm3159_vm11, %v3158_v45, 0  ;;  %v2835_v34 = vsel %vm2824_vm5, nan, %v2834_v50 }
 0x3c7   : > { %v2726_v4 = vsel %vm2724_vm9, %v5257_v47, %v2725_v22  ;;  %v3156_v48 = vor.u32 8388608, %v3155_v7  ;;  %v3162_v13 = vand.u32 31, %v3160_v41  ;;  %vm2838_vm12 = vcmp.lt.s32.totalorder %v7504_v15, 0 }
 0x3c8   : > { %v2730_v27 = vsel %vm2723_vm6, %v2726_v4, %v2729_v40  ;;  %v3023_v32 = vmul.f32 %v3022_v24, %v3020_v46  ;;  %v2899_v26 = vshll.u32 %v2898_v35, 30  ;;  %v7681_v38 = vadd.s32 3, %v3029_v49 }
 0x3c9   : > { %v2731_v17 = vsel %vm2720_vm7, nan, %v2730_v27  ;;  %v3163_v1 = vsub.s32 32, %v3162_v13  ;;  %v3044_v63 = vand.u32 2147483647, %v7661_v3  ;;  %v3048_v39 = vshrl.u32 %v3047_v56, 23 }
 0x3ca   : > { %v4878_v9 = vpack.c.bf16 %v2835_v34, %v2731_v17  ;;  %v3024_v19 = vxor.u32 2147483648, %v3023_v32  ;;  %v2900_v29 = vsub.s32 %v2896_v60, %v2899_v26  ;;  %v2892_v51 = vadd.s32 %v7631_v25, %v7638_v37 }
 0x3cb   : > { %v3166_v2 = vshrl.u32 %v5550_v55, %v3163_v1  ;;  %v3169_v61 = vshrl.u32 %v5551_v5, %v3163_v1  ;;  %v7688_v47 = vshll.u32 %v3156_v48, 8  ;;  %v2922_v7 = vsub.s32 4, %v2898_v35 }
 0x3cc   : > { %4922 = vst [vmem:[%s6238_s7 + $0x40] sm:$0xff] %v4878_v9   ;;  %v3025_v52 = vsel %vm2942_vm15, %v3024_v19, %v3023_v32  ;;  %v2902_v50 = vsub.s32 0, %v2900_v29  ;;  %v3165_v45 = vshll.u32 %v5549_v53, %v3162_v13  ;;  %v3168_v25 = vshll.u32 %v5550_v55, %v3162_v13 }
 0x3cd   : > { %v3028_v60 = vsel %vm7623_vm3, %v7358_v62, %v3025_v52  ;;  %v3171_v37 = vshll.u32 %v5551_v5, %v3162_v13  ;;  %v3172_v8 = vshrl.u32 %v5552_v14, %v3163_v1  ;;  %v3161_v28 = vshrl.u32 %v3160_v41, 5 }
 0x3ce   : > { %v4708_v58 = vmin.u32 %v2902_v50, %v2900_v29  ;;  %v3167_v49 = vor.u32 %v3166_v2, %v3165_v45  ;;  %v4715_v18 = vadd.s32 4294967169, %v3048_v39  ;;  %v3170_v22 = vor.u32 %v3169_v61, %v3168_v25 }
 0x3cf   : > { %v3173_v24 = vor.u32 %v3172_v8, %v3171_v37  ;;  %v3174_v56 = vshll.u32 %v5552_v14, %v3162_v13  ;;  %v3175_v40 = vshrl.u32 %v5553_v16, %v3163_v1  ;;  %5260 = vcosq.f32 %v3028_v60 }
 0x3d0   : > { %v2904_v46 = vclz %v4708_v58  ;;  %v2923_v6 = vsel %vm2838_vm12, %v2922_v7, %v2898_v35  ;;  %v3164_v34 = vshrl.u32 %v5549_v53, %v3163_v1  ;;  %5262 = vsinq.f32 %v3028_v60 }
 0x3d1   : > { %v3176_v4 = vor.u32 %v3175_v40, %v3174_v56  ;;  %v3177_v48 = vshll.u32 %v5553_v16, %v3162_v13  ;;  %v3178_v41 = vshrl.u32 %v5554_v23, %v3163_v1  ;;  %vm3180_vm13 = vcmp.lt.s32.totalorder %v3161_v28, 1  ;;  %v815_v56 = vpop.permute.xlu1 %814 }
 0x3d2   : > { %v4709_v27 = vadd.s32 4294967294, %v2904_v46  ;;  %vm3182_vm14 = vcmp.lt.s32.totalorder %v3161_v28, 3  ;;  %vm3183_vm15 = vcmp.lt.s32.totalorder %v3161_v28, 4  ;;  %v3188_v17 = vsel %vm3180_vm13, %v3167_v49, %v3170_v22 }
 0x3d3   : > { %v3179_v32 = vor.u32 %v3178_v41, %v3177_v48  ;;  %v3185_v26 = vsel %vm3183_vm15, %v3173_v24, 2102212464  ;;  %v3189_v9 = vsel %vm3183_vm15, %v3176_v4, 920167782  ;;  %vm3181_vm1 = vcmp.lt.s32.totalorder %v3161_v28, 2 }
 0x3d4   : > { %vm4710_vm0 = vcmp.lt.s32.totalorder %v4709_v27, 0  ;;  %v3190_v35 = vsel %vm3182_vm14, %v3173_v24, %v3189_v9  ;;  %v3192_v19 = vsel %vm3180_vm13, %v3170_v22, %v3173_v24  ;;  %v3184_v2 = vsel %vm3180_vm13, %v3164_v34, %v3167_v49 }
 0x3d5   : > { %v2907_v39 = vsel %vm4710_vm0, 0, %v4709_v27  ;;  %v3191_v61 = vsel %vm3181_vm1, %v3188_v17, %v3190_v35  ;;  %v3193_v13 = vsel %vm3183_vm15, %v3179_v32, 1326507024  ;;  %v3186_v50 = vsel %vm3182_vm14, %v3170_v22, %v3185_v26 }
 0x3d6   : > { %v2908_v52 = vsub.s32 32, %v2907_v39  ;;  %v2912_v1 = vsub.s32 4294967266, %v2907_v39  ;;  %v3194_v7 = vsel %vm3182_vm14, %v3176_v4, %v3193_v13  ;;  %v2909_v45 = vshll.u32 %v2900_v29, %v2907_v39 }
 0x3d7   : > { %v3195_v60 = vsel %vm3181_vm1, %v3192_v19, %v3194_v7  ;;  %v7713_v25 = vmul.u32.u64.low %v7688_v47, %v3191_v61  ;;  %v7714_v37 = vmul.u32.u64.high %v7688_v47, %v3191_v61, %v7713_v25  ;;  %vm7723_vm2 = vcmp.le.f32.partialorder %v2836_v33, 0.7853982 }
 0x3d8   : > { %v2910_v8 = vshrl.u32 %v2892_v51, %v2908_v52  ;;  %v2913_v58 = vadd.s32 127, %v2912_v1  ;;  %v7718_v49 = vmul.u32.u64.low %v7688_v47, %v3195_v60  ;;  %v7719_v24 = vmul.u32.u64.high %v7688_v47, %v3195_v60, %v7718_v49 }
 0x3d9   : > { %v3054_v29 = vadd.s32 1, %v4715_v18  ;;  %v2925_v34 = vsel %vm7723_vm2, 0, %v2923_v6  ;;  %v3187_v51 = vsel %vm3181_vm1, %v3184_v2, %v3186_v50  ;;  %v3206_v4 = vadd.s32 1, %v7714_v37  ;;  %v811_v6 = vpop.permute.xlu0 %810 }
 0x3da   : > { %v2911_v40 = vor.u32 %v2910_v8, %v2909_v45  ;;  %v2914_v46 = vshll.u32 %v2913_v58, 23  ;;  %v7732_v48 = vand.u32 3, %v7681_v38  ;;  %v3051_v33 = vand.u32 8388607, %v3044_v63 }
 0x3db   : > { %vm3055_vm3 = vcmp.gt.s32.totalorder %v3054_v29, 0  ;;  %v887_v18 = vmul.f32 %v5884_v10, %v815_v56  ;;  %v2929_v32 = vadd.s32 3, %v2925_v34  ;;  %v3203_v26 = vmul.u32 %v7688_v47, %v3187_v51 }
 0x3dc   : > { %v2915_v41 = vor.u32 4788187, %v2914_v46  ;;  %v7737_v27 = vpop.eup %5260  ;;  %vm3205_vm4 = vc.u32 %v7719_v24, %v7713_v25  ;;  %v3056_v28 = vsel %vm3055_vm3, %v3054_v29, 0  ;;  %v675_v38 = vmul.f32 %v5887_v11, %v7148_v0 }
 0x3dd   : > { %v5263_v17 = vpop.eup %5262  ;;  %v2918_v35 = vcvt.s32.f32 %v2911_v40  ;;  %v3207_v19 = vsel %vm3205_vm4, %v3206_v4, %v7714_v37  ;;  %v7747_v39 = vmul.f32 %v5887_v11, %v7168_v57  ;;  %v7751_v47 = vmul.f32 %v5887_v11, %v7189_v44 }
 0x3de   : > { %v2916_v9 = vand.u32 2147483647, %v2915_v41  ;;  %v3208_v2 = vadd.s32 %v3207_v19, %v3203_v26  ;;  %v3058_v61 = vand.u32 31, %v3056_v28  ;;  %vm3039_vm5 = vcmp.eq.s32.totalorder %v7732_v48, 2 }
 0x3df   : > { %v3052_v52 = vor.u32 8388608, %v3051_v33  ;;  %v886_v0 = vmul.f32 %v5884_v10, %v811_v6  ;;  %v7755_v1 = vand.u32 3, %v2929_v32  ;;  %v919_v45 = vadd.f32 %v887_v18, %v675_v38 }
 0x3e0   : > { %v2919_v13 = vmul.f32 %v2918_v35, %v2916_v9  ;;  %v3209_v50 = vadd.s32 536870912, %v3208_v2  ;;  %v3059_v7 = vsub.s32 32, %v3058_v61  ;;  %v3040_v57 = vxor.u32 2147483648, %v7737_v27 }
 0x3e1   : > { %v3061_v37 = vshll.u32 %v5549_v53, %v3058_v61  ;;  %v3064_v44 = vshll.u32 %v5550_v55, %v3058_v61  ;;  %vm3036_vm6 = vcmp.eq.s32.totalorder %v7732_v48, 0  ;;  %v3067_v29 = vshll.u32 %v5551_v5, %v3058_v61 }
 0x3e2   : > { %v2920_v60 = vxor.u32 2147483648, %v2919_v13  ;;  %v7761_v8 = vshrl.u32 %v3209_v50, 30  ;;  %v3062_v58 = vshrl.u32 %v5550_v55, %v3059_v7  ;;  %v3065_v49 = vshrl.u32 %v5551_v5, %v3059_v7 }
 0x3e3   : > { %v3068_v40 = vshrl.u32 %v5552_v14, %v3059_v7  ;;  %v3070_v46 = vshll.u32 %v5552_v14, %v3058_v61  ;;  %v3071_v34 = vshrl.u32 %v5553_v16, %v3059_v7  ;;  %v3057_v41 = vshrl.u32 %v3056_v28, 5 }
 0x3e4   : > { %v2921_v56 = vsel %vm2838_vm12, %v2920_v60, %v2919_v13  ;;  %v3211_v4 = vshll.u32 %v7761_v8, 30  ;;  %v3063_v33 = vor.u32 %v3062_v58, %v3061_v37  ;;  %vm3035_vm7 = vcmp.lt.s32.totalorder %v7732_v48, 2 }
 0x3e5   : > { %v2924_v51 = vsel %vm7723_vm2, %v7504_v15, %v2921_v56  ;;  %v3066_v18 = vor.u32 %v3065_v49, %v3064_v44  ;;  %v3069_v32 = vor.u32 %v3068_v40, %v3067_v29  ;;  %v3072_v26 = vor.u32 %v3071_v34, %v3070_v46 }
 0x3e6   : > { %5264 = vcosq.f32 %v2924_v51  ;;  %v7776_v6 = vsub.s32 %v3208_v2, %v3211_v4  ;;  %v3073_v38 = vshll.u32 %v5553_v16, %v3058_v61  ;;  %v3074_v9 = vshrl.u32 %v5554_v23, %v3059_v7 }
 0x3e7   : > { %5266 = vsinq.f32 %v2924_v51  ;;  %v3037_v35 = vxor.u32 2147483648, %v5263_v17  ;;  %v3041_v22 = vsel %vm3039_vm5, %v3040_v57, %v5263_v17  ;;  %v3092_v19 = vshll.u32 %v3052_v52, 8 }
 0x3e8   : > { %v7783_v28 = vadd.f32 %v5890_v12, %v919_v45  ;;  %v3214_v13 = vsub.s32 0, %v7776_v6  ;;  %v3075_v50 = vor.u32 %v3074_v9, %v3073_v38  ;;  %vm3076_vm8 = vcmp.lt.s32.totalorder %v3057_v41, 1 }
 0x3e9   : > { %vm3079_vm9 = vcmp.lt.s32.totalorder %v3057_v41, 4  ;;  %vm3032_vm10 = vweird.f32 %v7358_v62  ;;  %vm3078_vm11 = vcmp.lt.s32.totalorder %v3057_v41, 3  ;;  %v3084_v61 = vsel %vm3076_vm8, %v3063_v33, %v3066_v18 }
 0x3ea   : > { %v3081_v2 = vsel %vm3079_vm9, %v3069_v32, 2102212464  ;;  %v3085_v60 = vsel %vm3079_vm9, %v3072_v26, 920167782  ;;  %v4720_v37 = vmin.u32 %v3214_v13, %v7776_v6  ;;  %v3060_v17 = vshrl.u32 %v5549_v53, %v3059_v7 }
 0x3eb   : > { %vm3077_vm12 = vcmp.lt.s32.totalorder %v3057_v41, 2  ;;  %v3086_v52 = vsel %vm3078_vm11, %v3069_v32, %v3085_v60  ;;  %v3038_v45 = vsel %vm3036_vm6, %v7737_v27, %v3037_v35  ;;  %v3088_v44 = vsel %vm3076_vm8, %v3066_v18, %v3069_v32 }
 0x3ec   : > { %v3087_v57 = vsel %vm3077_vm12, %v3084_v61, %v3086_v52  ;;  %v3089_v58 = vsel %vm3079_vm9, %v3075_v50, 1326507024  ;;  %v3216_v49 = vclz %v4720_v37  ;;  %v3080_v29 = vsel %vm3076_vm8, %v3060_v17, %v3063_v33 }
 0x3ed   : > { %v3082_v56 = vsel %vm3078_vm11, %v3066_v18, %v3081_v2  ;;  %v918_v40 = vadd.f32 %v886_v0, %v7747_v39  ;;  %v3090_v7 = vsel %vm3078_vm11, %v3072_v26, %v3089_v58  ;;  %v3359_v27 = vand.u32 2139095040, %v7783_v28 }
 0x3ee   : > { %v7800_v46 = vmul.u32.u64.low %v3092_v19, %v3087_v57  ;;  %v7801_v34 = vmul.u32.u64.high %v3092_v19, %v3087_v57, %v7800_v46  ;;  %v3042_v51 = vsel %vm3035_vm7, %v3038_v45, %v3041_v22  ;;  %vm2931_vm13 = vcmp.lt.s32.totalorder %v7755_v1, 2 }
 0x3ef   : > { %vm2932_vm14 = vcmp.eq.s32.totalorder %v7755_v1, 0  ;;  %v4721_v4 = vadd.s32 4294967294, %v3216_v49  ;;  %v3091_v33 = vsel %vm3077_vm12, %v3088_v44, %v3090_v7  ;;  %vm2928_vm15 = vweird.f32 %v7504_v15 }
 0x3f0   : > { %v3083_v39 = vsel %vm3077_vm12, %v3080_v29, %v3082_v56  ;;  %v7812_v0 = vmul.u32.u64.low %v3092_v19, %v3091_v33  ;;  %v7813_v18 = vmul.u32.u64.high %v3092_v19, %v3091_v33, %v7812_v0  ;;  %v3360_v32 = vshrl.u32 %v3359_v27, 23  ;;  %v826_v27 = vpop.permute.xlu1 %825 }
 0x3f1   : > { %vm2935_vm0 = vcmp.eq.s32.totalorder %v7755_v1, 2  ;;  %v3204_v48 = vadd.s32 %v7713_v25, %v7719_v24  ;;  %vm4722_vm1 = vcmp.lt.s32.totalorder %v4721_v4, 0  ;;  %v7819_v26 = vadd.f32 %v5890_v12, %v918_v40 }
 0x3f2   : > { %v3219_v38 = vsel %vm4722_vm1, 0, %v4721_v4  ;;  %v3102_v9 = vadd.s32 1, %v7801_v34  ;;  %v3356_v35 = vand.u32 2147483647, %v7783_v28  ;;  %v4727_v41 = vadd.s32 4294967169, %v3360_v32 }
 0x3f3   : > { %v5265_v22 = vpop.eup %5264  ;;  %v3043_v13 = vsel %vm3032_vm10, nan, %v3042_v51  ;;  %v3220_v50 = vsub.s32 32, %v3219_v38  ;;  %v3224_v2 = vsub.s32 4294967266, %v3219_v38  ;;  %v3099_v61 = vmul.u32 %v3092_v19, %v3083_v39 }
 0x3f4   : > { %v5267_v60 = vpop.eup %5266  ;;  %v2936_v37 = vxor.u32 2147483648, %v5265_v22  ;;  %v3221_v25 = vshll.u32 %v7776_v6, %v3219_v38  ;;  %vm3101_vm2 = vc.u32 %v7813_v18, %v7800_v46  ;;  %v3366_v24 = vadd.s32 1, %v4727_v41 }
 0x3f5   : > { %v2933_v17 = vxor.u32 2147483648, %v5267_v60  ;;  %v3222_v52 = vshrl.u32 %v3204_v48, %v3220_v50  ;;  %v3225_v45 = vadd.s32 127, %v3224_v2  ;;  %v3103_v57 = vsel %vm3101_vm2, %v3102_v9, %v7801_v34 }
 0x3f6   : > { %v2937_v62 = vsel %vm2935_vm0, %v2936_v37, %v5267_v60  ;;  %v3234_v44 = vsub.s32 4, %v7761_v8  ;;  %v3104_v58 = vadd.s32 %v3103_v57, %v3099_v61  ;;  %vm3367_vm3 = vcmp.gt.s32.totalorder %v3366_v24, 0 }
 0x3f7   : > { %v2934_v19 = vsel %vm2932_vm14, %v5265_v22, %v2933_v17  ;;  %v3223_v6 = vor.u32 %v3222_v52, %v3221_v25  ;;  %v3226_v49 = vshll.u32 %v3225_v45, 23  ;;  %v3368_v29 = vsel %vm3367_vm3, %v3366_v24, 0 }
 0x3f8   : > { %v2938_v56 = vsel %vm2931_vm13, %v2934_v19, %v2937_v62  ;;  %v3105_v40 = vadd.s32 536870912, %v3104_v58  ;;  %v3363_v7 = vand.u32 8388607, %v3356_v35  ;;  %v3370_v34 = vand.u32 31, %v3368_v29 }
 0x3f9   : > { %v2939_v51 = vsel %vm2928_vm15, nan, %v2938_v56  ;;  %vm7842_vm4 = vcmp.le.f32.partialorder %v3148_v42, 0.7853982  ;;  %vm3150_vm5 = vcmp.lt.s32.totalorder %v7605_v43, 0  ;;  %v3227_v1 = vor.u32 4788187, %v3226_v49 }
 0x3fa   : > { %v4883_v33 = vpack.c.bf16 %v3043_v13, %v2939_v51  ;;  %v7847_v39 = vshrl.u32 %v3105_v40, 30  ;;  %v3371_v0 = vsub.s32 32, %v3370_v34  ;;  %v3255_v32 = vand.u32 2139095040, %v7819_v26 }
 0x3fb   : > { %v3228_v48 = vand.u32 2147483647, %v3227_v1  ;;  %v3230_v38 = vcvt.s32.f32 %v3223_v6  ;;  %v7853_v15 = vsel %vm3150_vm5, %v3234_v44, %v7761_v8  ;;  %v7856_v42 = vmul.f32 %v5884_v10, %v826_v27 }
 0x3fc   : > { %4923 = vst [vmem:[%s6238_s7 + $0x48] sm:$0xff] %v4883_v33   ;;  %v3107_v9 = vshll.u32 %v7847_v39, 30  ;;  %v3364_v41 = vor.u32 8388608, %v3363_v7  ;;  %v3373_v22 = vshll.u32 %v5549_v53, %v3370_v34  ;;  %v3374_v13 = vshrl.u32 %v5550_v55, %v3371_v0 }
 0x3fd   : > { %v3231_v50 = vmul.f32 %v3230_v38, %v3228_v48  ;;  %v3377_v2 = vshrl.u32 %v5551_v5, %v3371_v0  ;;  %v3380_v61 = vshrl.u32 %v5552_v14, %v3371_v0  ;;  %v3383_v60 = vshrl.u32 %v5553_v16, %v3371_v0 }
 0x3fe   : > { %v7865_v8 = vsub.s32 %v3104_v58, %v3107_v9  ;;  %v3369_v37 = vshrl.u32 %v3368_v29, 5  ;;  %v3376_v25 = vshll.u32 %v5550_v55, %v3370_v34  ;;  %v3256_v24 = vshrl.u32 %v3255_v32, 23 }
 0x3ff   : > { %v3232_v17 = vxor.u32 2147483648, %v3231_v50  ;;  %v3375_v52 = vor.u32 %v3374_v13, %v3373_v22  ;;  %v3379_v45 = vshll.u32 %v5551_v5, %v3370_v34  ;;  %v3382_v57 = vshll.u32 %v5552_v14, %v3370_v34 }
 0x400   : > { %v3110_v62 = vsub.s32 0, %v7865_v8  ;;  %v3378_v44 = vor.u32 %v3377_v2, %v3376_v25  ;;  %v3385_v19 = vshll.u32 %v5553_v16, %v3370_v34  ;;  %v3386_v6 = vshrl.u32 %v5554_v23, %v3371_v0 }
 0x401   : > { %v3233_v58 = vsel %vm3150_vm5, %v3232_v17, %v3231_v50  ;;  %v3237_v49 = vsel %vm7842_vm4, 0, %v7853_v15  ;;  %vm3046_vm6 = vcmp.lt.s32.totalorder %v7661_v3, 0  ;;  %v3381_v29 = vor.u32 %v3380_v61, %v3379_v45 }
 0x402   : > { %v3384_v56 = vor.u32 %v3383_v60, %v3382_v57  ;;  %v4716_v40 = vmin.u32 %v3110_v62, %v7865_v8  ;;  %v3387_v7 = vor.u32 %v3386_v6, %v3385_v19  ;;  %v3404_v27 = vshll.u32 %v3364_v41, 8 }
 0x403   : > { %v4723_v51 = vadd.s32 4294967169, %v3256_v24  ;;  %v3236_v34 = vsel %vm7842_vm4, %v7605_v43, %v3233_v58  ;;  %v3130_v1 = vsub.s32 4, %v7847_v39  ;;  %v3372_v33 = vshrl.u32 %v5549_v53, %v3371_v0 }
 0x404   : > { %vm3388_vm7 = vcmp.lt.s32.totalorder %v3369_v37, 1  ;;  %vm7887_vm8 = vcmp.le.f32.partialorder %v3044_v63, 0.7853982  ;;  %v3112_v48 = vclz %v4716_v40  ;;  %vm3389_vm9 = vcmp.lt.s32.totalorder %v3369_v37, 2 }
 0x405   : > { %vm3391_vm10 = vcmp.lt.s32.totalorder %v3369_v37, 4  ;;  %v3396_v38 = vsel %vm3388_vm7, %v3375_v52, %v3378_v44  ;;  %vm3390_vm11 = vcmp.lt.s32.totalorder %v3369_v37, 3  ;;  %v3400_v4 = vsel %vm3388_vm7, %v3378_v44, %v3381_v29 }
 0x406   : > { %v3393_v15 = vsel %vm3391_vm10, %v3381_v29, 2102212464  ;;  %v3397_v9 = vsel %vm3391_vm10, %v3384_v56, 920167782  ;;  %5268 = vcosq.f32 %v3236_v34  ;;  %v4717_v41 = vadd.s32 4294967294, %v3112_v48 }
 0x407   : > { %v3398_v22 = vsel %vm3390_vm11, %v3381_v29, %v3397_v9  ;;  %v3401_v13 = vsel %vm3391_vm10, %v3387_v7, 1326507024  ;;  %v3392_v0 = vsel %vm3388_vm7, %v3372_v33, %v3375_v52  ;;  %v3394_v50 = vsel %vm3390_vm11, %v3378_v44, %v3393_v15  ;;  %v822_v9 = vpop.permute.xlu0 %821 }
 0x408   : > { %v3399_v2 = vsel %vm3389_vm9, %v3396_v38, %v3398_v22  ;;  %v3402_v63 = vsel %vm3390_vm11, %v3384_v56, %v3401_v13  ;;  %vm4718_vm12 = vcmp.lt.s32.totalorder %v4717_v41, 0  ;;  %v3100_v24 = vadd.s32 %v7800_v46, %v7813_v18 }
 0x409   : > { %v3403_v61 = vsel %vm3389_vm9, %v3400_v4, %v3402_v63  ;;  %v7893_v60 = vmul.u32.u64.low %v3404_v27, %v3399_v2  ;;  %v7894_v25 = vmul.u32.u64.high %v3404_v27, %v3399_v2, %v7893_v60  ;;  %v3115_v17 = vsel %vm4718_vm12, 0, %v4717_v41 }
 0x40a   : > { %v7899_v45 = vmul.u32.u64.low %v3404_v27, %v3403_v61  ;;  %v7900_v57 = vmul.u32.u64.high %v3404_v27, %v3403_v61, %v7899_v45  ;;  %v3116_v62 = vsub.s32 32, %v3115_v17  ;;  %v3120_v52 = vsub.s32 4294967266, %v3115_v17 }
 0x40b   : > { %v3131_v44 = vsel %vm3046_vm6, %v3130_v1, %v7847_v39  ;;  %v3395_v19 = vsel %vm3389_vm9, %v3392_v0, %v3394_v50  ;;  %5270 = vsinq.f32 %v3236_v34  ;;  %v3241_v6 = vadd.s32 3, %v3237_v49 }
 0x40c   : > { %v3252_v58 = vand.u32 2147483647, %v7819_v26  ;;  %v3262_v29 = vadd.s32 1, %v4723_v51  ;;  %v3117_v56 = vshll.u32 %v7865_v8, %v3115_v17  ;;  %v3118_v46 = vshrl.u32 %v3100_v24, %v3116_v62 }
 0x40d   : > { %v3121_v18 = vadd.s32 127, %v3120_v52  ;;  %v3414_v40 = vadd.s32 1, %v7894_v25  ;;  %v3133_v7 = vsel %vm7887_vm8, 0, %v3131_v44  ;;  %v3411_v33 = vmul.u32 %v3404_v27, %v3395_v19 }
 0x40e   : > { %vm3413_vm13 = vc.u32 %v7900_v57, %v7893_v60  ;;  %vm3263_vm14 = vcmp.gt.s32.totalorder %v3262_v29, 0  ;;  %v3119_v39 = vor.u32 %v3118_v46, %v3117_v56  ;;  %v7914_v51 = vand.u32 3, %v3241_v6 }
 0x40f   : > { %v3122_v37 = vshll.u32 %v3121_v18, 23  ;;  %v3415_v49 = vsel %vm3413_vm13, %v3414_v40, %v7894_v25  ;;  %v3264_v34 = vsel %vm3263_vm14, %v3262_v29, 0  ;;  %v3137_v38 = vadd.s32 3, %v3133_v7 }
 0x410   : > { %v3416_v8 = vadd.s32 %v3415_v49, %v3411_v33  ;;  %v3266_v1 = vand.u32 31, %v3264_v34  ;;  %v3259_v15 = vand.u32 8388607, %v3252_v58  ;;  %v921_v27 = vadd.f32 %v7856_v42, %v7751_v47 }
 0x411   : > { %v3123_v48 = vor.u32 4788187, %v3122_v37  ;;  %v676_v22 = vmul.f32 %v5887_v11, %v7200_v31  ;;  %v3126_v0 = vcvt.s32.f32 %v3119_v39  ;;  %vm3247_vm15 = vcmp.eq.s32.totalorder %v7914_v51, 2 }
 0x412   : > { %v3417_v4 = vadd.s32 536870912, %v3416_v8  ;;  %v3267_v41 = vsub.s32 32, %v3266_v1  ;;  %v888_v61 = vmul.f32 %v5884_v10, %v822_v9  ;;  %v7927_v24 = vand.u32 3, %v3137_v38 }
 0x413   : > { %v3124_v13 = vand.u32 2147483647, %v3123_v48  ;;  %v5269_v50 = vpop.eup %5268  ;;  %v3260_v47 = vor.u32 8388608, %v3259_v15  ;;  %v7930_v42 = vadd.f32 %v5890_v12, %v921_v27  ;;  %v3269_v17 = vshll.u32 %v5549_v53, %v3266_v1 }
 0x414   : > { %v7923_v2 = vshrl.u32 %v3417_v4, 30  ;;  %v3270_v63 = vshrl.u32 %v5550_v55, %v3267_v41  ;;  %v3273_v45 = vshrl.u32 %v5551_v5, %v3267_v41  ;;  %v3276_v62 = vshrl.u32 %v5552_v14, %v3267_v41 }
 0x415   : > { %v3127_v25 = vmul.f32 %v3126_v0, %v3124_v13  ;;  %v3248_v52 = vxor.u32 2147483648, %v5269_v50  ;;  %v7936_v19 = vshrl.u32 %v3264_v34, 5  ;;  %v3272_v6 = vshll.u32 %v5550_v55, %v3266_v1 }
 0x416   : > { %v3419_v31 = vshll.u32 %v7923_v2, 30  ;;  %vm3244_vm0 = vcmp.eq.s32.totalorder %v7914_v51, 0  ;;  %v3271_v56 = vor.u32 %v3270_v63, %v3269_v17  ;;  %v3275_v46 = vshll.u32 %v5551_v5, %v3266_v1 }
 0x417   : > { %v3128_v44 = vxor.u32 2147483648, %v3127_v25  ;;  %v3279_v18 = vshrl.u32 %v5553_v16, %v3267_v41  ;;  %v3278_v33 = vshll.u32 %v5552_v14, %v3266_v1  ;;  %v3281_v39 = vshll.u32 %v5553_v16, %v3266_v1 }
 0x418   : > { %v7940_v29 = vsub.s32 %v3416_v8, %v3419_v31  ;;  %v5271_v40 = vpop.eup %5270  ;;  %v3282_v37 = vshrl.u32 %v5554_v23, %v3267_v41  ;;  %v3274_v8 = vor.u32 %v3273_v45, %v3272_v6  ;;  %v3277_v48 = vor.u32 %v3276_v62, %v3275_v46 }
 0x419   : > { %v3129_v7 = vsel %vm3046_vm6, %v3128_v44, %v3127_v25  ;;  %v3280_v38 = vor.u32 %v3279_v18, %v3278_v33  ;;  %v920_v27 = vadd.f32 %v888_v61, %v676_v22  ;;  %vm3243_vm1 = vcmp.lt.s32.totalorder %v7914_v51, 2 }
 0x41a   : > { %v3132_v49 = vsel %vm7887_vm8, %v7661_v3, %v3129_v7  ;;  %v3422_v34 = vsub.s32 0, %v7940_v29  ;;  %v3283_v15 = vor.u32 %v3282_v37, %v3281_v39  ;;  %v7955_v1 = vshll.u32 %v3260_v47, 8 }
 0x41b   : > { %5272 = vcosq.f32 %v3132_v49  ;;  %v3567_v4 = vand.u32 2139095040, %v7930_v42  ;;  %v3245_v13 = vxor.u32 2147483648, %v5271_v40  ;;  %v3249_v32 = vsel %vm3247_vm15, %v3248_v52, %v5271_v40 }
 0x41c   : > { %5274 = vsinq.f32 %v3132_v49  ;;  %v4728_v9 = vmin.u32 %v3422_v34, %v7940_v29  ;;  %vm3284_vm2 = vcmp.lt.s32.totalorder %v7936_v19, 1  ;;  %vm3286_vm3 = vcmp.lt.s32.totalorder %v7936_v19, 3 }
 0x41d   : > { %vm3287_vm4 = vcmp.lt.s32.totalorder %v7936_v19, 4  ;;  %v3292_v22 = vsel %vm3284_vm2, %v3271_v56, %v3274_v8  ;;  %v3296_v63 = vsel %vm3284_vm2, %v3274_v8, %v3277_v48  ;;  %v3268_v61 = vshrl.u32 %v5549_v53, %v3267_v41 }
 0x41e   : > { %v3424_v0 = vclz %v4728_v9  ;;  %v3289_v25 = vsel %vm3287_vm4, %v3277_v48, 2102212464  ;;  %v3293_v47 = vsel %vm3287_vm4, %v3280_v38, 920167782  ;;  %v3297_v31 = vsel %vm3287_vm4, %v3283_v15, 1326507024 }
 0x41f   : > { %vm3240_vm5 = vweird.f32 %v7605_v43  ;;  %vm3285_vm6 = vcmp.lt.s32.totalorder %v7936_v19, 2  ;;  %v3294_v45 = vsel %vm3286_vm3, %v3277_v48, %v3293_v47  ;;  %v3298_v62 = vsel %vm3286_vm3, %v3280_v38, %v3297_v31 }
 0x420   : > { %v4729_v17 = vadd.s32 4294967294, %v3424_v0  ;;  %v3246_v52 = vsel %vm3244_vm0, %v5269_v50, %v3245_v13  ;;  %vm3358_vm7 = vcmp.lt.s32.totalorder %v7783_v28, 0  ;;  %v3288_v41 = vsel %vm3284_vm2, %v3268_v61, %v3271_v56 }
 0x421   : > { %v3295_v44 = vsel %vm3285_vm6, %v3292_v22, %v3294_v45  ;;  %v3299_v6 = vsel %vm3285_vm6, %v3296_v63, %v3298_v62  ;;  %v3290_v46 = vsel %vm3286_vm3, %v3274_v8, %v3289_v25  ;;  %v3568_v56 = vshrl.u32 %v3567_v4, 23 }
 0x422   : > { %vm4730_vm8 = vcmp.lt.s32.totalorder %v4729_v17, 0  ;;  %v7986_v18 = vmul.u32.u64.low %v7955_v1, %v3299_v6  ;;  %v7987_v40 = vmul.u32.u64.high %v7955_v1, %v3299_v6, %v7986_v18  ;;  %vm3139_vm9 = vcmp.lt.s32.totalorder %v7927_v24, 2 }
 0x423   : > { %v3427_v50 = vsel %vm4730_vm8, 0, %v4729_v17  ;;  %v7990_v7 = vmul.u32.u64.low %v7955_v1, %v3295_v44  ;;  %v7991_v33 = vmul.u32.u64.high %v7955_v1, %v3295_v44, %v7990_v7  ;;  %vm3140_vm10 = vcmp.eq.s32.totalorder %v7927_v24, 0 }
 0x424   : > { %v3412_v39 = vadd.s32 %v7893_v60, %v7900_v57  ;;  %v3428_v37 = vsub.s32 32, %v3427_v50  ;;  %v3432_v49 = vsub.s32 4294967266, %v3427_v50  ;;  %v3250_v34 = vsel %vm3243_vm1, %v3246_v52, %v3249_v32 }
 0x425   : > { %v3442_v8 = vsub.s32 4, %v7923_v2  ;;  %v3291_v48 = vsel %vm3285_vm6, %v3288_v41, %v3290_v46  ;;  %v4735_v38 = vadd.s32 4294967169, %v3568_v56  ;;  %v3429_v15 = vshll.u32 %v7940_v29, %v3427_v50 }
 0x426   : > { %v3430_v9 = vshrl.u32 %v3412_v39, %v3428_v37  ;;  %v3433_v4 = vadd.s32 127, %v3432_v49  ;;  %vm3309_vm11 = vc.u32 %v7987_v40, %v7990_v7  ;;  %v3310_v13 = vadd.s32 1, %v7991_v33 }
 0x427   : > { %v3564_v60 = vand.u32 2147483647, %v7930_v42  ;;  %v3574_v57 = vadd.s32 1, %v4735_v38  ;;  %v8007_v51 = vadd.f32 %v5890_v12, %v920_v27  ;;  %vm3143_vm12 = vcmp.eq.s32.totalorder %v7927_v24, 2 }
 0x428   : > { %v5273_v32 = vpop.eup %5272  ;;  %v3431_v19 = vor.u32 %v3430_v9, %v3429_v15  ;;  %v3434_v0 = vshll.u32 %v3433_v4, 23  ;;  %v3307_v22 = vmul.u32 %v7955_v1, %v3291_v48  ;;  %v3251_v63 = vsel %vm3240_vm5, nan, %v3250_v34 }
 0x429   : > { %v5275_v29 = vpop.eup %5274  ;;  %v3144_v61 = vxor.u32 2147483648, %v5273_v32  ;;  %v3311_v25 = vsel %vm3309_vm11, %v3310_v13, %v7991_v33  ;;  %vm3575_vm13 = vcmp.gt.s32.totalorder %v3574_v57, 0  ;;  %v8017_v27 = vsel %vm3358_vm7, %v3442_v8, %v7923_v2 }
 0x42a   : > { %v3141_v47 = vxor.u32 2147483648, %v5275_v29  ;;  %v3435_v31 = vor.u32 4788187, %v3434_v0  ;;  %v3312_v17 = vadd.s32 %v3311_v25, %v3307_v22  ;;  %v3571_v1 = vand.u32 8388607, %v3564_v60 }
 0x42b   : > { %v3145_v45 = vsel %vm3143_vm12, %v3144_v61, %v5275_v29  ;;  %v3576_v62 = vsel %vm3575_vm13, %v3574_v57, 0  ;;  %v3463_v43 = vand.u32 2139095040, %v8007_v51  ;;  %v3438_v44 = vcvt.s32.f32 %v3431_v19 }
 0x42c   : > { %v3142_v52 = vsel %vm3140_vm10, %v5273_v32, %v3141_v47  ;;  %v3436_v41 = vand.u32 2147483647, %v3435_v31  ;;  %v3313_v6 = vadd.s32 536870912, %v3312_v17  ;;  %vm3136_vm14 = vweird.f32 %v7661_v3 }
 0x42d   : > { %v3146_v2 = vsel %vm3139_vm9, %v3142_v52, %v3145_v45  ;;  %vm8029_vm15 = vcmp.le.f32.partialorder %v3356_v35, 0.7853982  ;;  %v3578_v18 = vand.u32 31, %v3576_v62  ;;  %vm3254_vm0 = vcmp.lt.s32.totalorder %v7819_v26, 0 }
 0x42e   : > { %v3147_v50 = vsel %vm3136_vm14, nan, %v3146_v2  ;;  %v3439_v33 = vmul.f32 %v3438_v44, %v3436_v41  ;;  %v3314_v56 = vshrl.u32 %v3313_v6, 30  ;;  %v3445_v3 = vsel %vm8029_vm15, 0, %v8017_v27 }
 0x42f   : > { %v4888_v39 = vpack.c.bf16 %v3251_v63, %v3147_v50  ;;  %v8038_v24 = vadd.s32 %v7990_v7, %v7987_v40  ;;  %v3579_v37 = vsub.s32 32, %v3578_v18  ;;  %v3572_v34 = vor.u32 8388608, %v3571_v1 }
 0x430   : > { %v3440_v49 = vxor.u32 2147483648, %v3439_v33  ;;  %v3315_v35 = vshll.u32 %v3314_v56, 30  ;;  %v3464_v8 = vshrl.u32 %v3463_v43, 23  ;;  %v3577_v48 = vshrl.u32 %v3576_v62, 5 }
 0x431   : > { %4924 = vst [vmem:[%s6238_s7 + $0x50] sm:$0xff] %v4888_v39   ;;  %v3582_v38 = vshrl.u32 %v5550_v55, %v3579_v37  ;;  %v3585_v15 = vshrl.u32 %v5551_v5, %v3579_v37  ;;  %v3588_v9 = vshrl.u32 %v5552_v14, %v3579_v37  ;;  %v3581_v40 = vshll.u32 %v5549_v53, %v3578_v18 }
 0x432   : > { %v3441_v4 = vsel %vm3358_vm7, %v3440_v49, %v3439_v33  ;;  %v8046_v13 = vsub.s32 %v3312_v17, %v3315_v35  ;;  %v3584_v7 = vshll.u32 %v5550_v55, %v3578_v18  ;;  %v3338_v57 = vsub.s32 4, %v3314_v56 }
 0x433   : > { %v3587_v32 = vshll.u32 %v5551_v5, %v3578_v18  ;;  %v3590_v19 = vshll.u32 %v5552_v14, %v3578_v18  ;;  %v3460_v0 = vand.u32 2147483647, %v8007_v51  ;;  %v3444_v22 = vsel %vm8029_vm15, %v7783_v28, %v3441_v4 }
 0x434   : > { %v3318_v29 = vsub.s32 0, %v8046_v13  ;;  %v3583_v63 = vor.u32 %v3582_v38, %v3581_v40  ;;  %v3586_v61 = vor.u32 %v3585_v15, %v3584_v7  ;;  %v3591_v47 = vshrl.u32 %v5553_v16, %v3579_v37 }
 0x435   : > { %v3589_v25 = vor.u32 %v3588_v9, %v3587_v32  ;;  %v3593_v31 = vshll.u32 %v5553_v16, %v3578_v18  ;;  %v3594_v17 = vshrl.u32 %v5554_v23, %v3579_v37  ;;  %vm8062_vm1 = vcmp.le.f32.partialorder %v3252_v58, 0.7853982 }
 0x436   : > { %v4724_v1 = vmin.u32 %v3318_v29, %v8046_v13  ;;  %vm3596_vm2 = vcmp.lt.s32.totalorder %v3577_v48, 1  ;;  %v3612_v62 = vshll.u32 %v3572_v34, 8  ;;  %v4731_v43 = vadd.s32 4294967169, %v3464_v8 }
 0x437   : > { %v3339_v52 = vsel %vm3254_vm0, %v3338_v57, %v3314_v56  ;;  %v3580_v41 = vshrl.u32 %v5549_v53, %v3579_v37  ;;  %v3592_v44 = vor.u32 %v3591_v47, %v3590_v19  ;;  %v3595_v6 = vor.u32 %v3594_v17, %v3593_v31 }
 0x438   : > { %5276 = vcosq.f32 %v3444_v22  ;;  %v3320_v2 = vclz %v4724_v1  ;;  %vm3598_vm3 = vcmp.lt.s32.totalorder %v3577_v48, 3  ;;  %vm3599_vm4 = vcmp.lt.s32.totalorder %v3577_v48, 4  ;;  %v837_v1 = vpop.permute.xlu1 %836 }
 0x439   : > { %v3601_v58 = vsel %vm3599_vm4, %v3589_v25, 2102212464  ;;  %v3604_v18 = vsel %vm3596_vm2, %v3583_v63, %v3586_v61  ;;  %v3605_v50 = vsel %vm3599_vm4, %v3592_v44, 920167782  ;;  %v3608_v33 = vsel %vm3596_vm2, %v3586_v61, %v3589_v25 }
 0x43a   : > { %v4725_v39 = vadd.s32 4294967294, %v3320_v2  ;;  %vm3597_vm5 = vcmp.lt.s32.totalorder %v3577_v48, 2  ;;  %v3606_v49 = vsel %vm3598_vm3, %v3589_v25, %v3605_v50  ;;  %v3609_v35 = vsel %vm3599_vm4, %v3595_v6, 1326507024 }
 0x43b   : > { %v3600_v56 = vsel %vm3596_vm2, %v3580_v41, %v3583_v63  ;;  %v3602_v34 = vsel %vm3598_vm3, %v3586_v61, %v3601_v58  ;;  %v3607_v37 = vsel %vm3597_vm5, %v3604_v18, %v3606_v49  ;;  %v3610_v8 = vsel %vm3598_vm3, %v3592_v44, %v3609_v35  ;;  %v833_v58 = vpop.permute.xlu0 %832 }
 0x43c   : > { %vm4726_vm6 = vcmp.lt.s32.totalorder %v4725_v39, 0  ;;  %v3611_v38 = vsel %vm3597_vm5, %v3608_v33, %v3610_v8  ;;  %v8073_v15 = vmul.u32.u64.low %v3612_v62, %v3607_v37  ;;  %v8074_v9 = vmul.u32.u64.high %v3612_v62, %v3607_v37, %v8073_v15 }
 0x43d   : > { %5278 = vsinq.f32 %v3444_v22  ;;  %v3323_v4 = vsel %vm4726_vm6, 0, %v4725_v39  ;;  %v8077_v40 = vmul.u32.u64.low %v3612_v62, %v3611_v38  ;;  %v8078_v7 = vmul.u32.u64.high %v3612_v62, %v3611_v38, %v8077_v40 }
 0x43e   : > { %v3324_v57 = vsub.s32 32, %v3323_v4  ;;  %v3328_v32 = vsub.s32 4294967266, %v3323_v4  ;;  %v3603_v19 = vsel %vm3597_vm5, %v3600_v56, %v3602_v34  ;;  %v3470_v29 = vadd.s32 1, %v4731_v43 }
 0x43f   : > { %v3325_v48 = vshll.u32 %v8046_v13, %v3323_v4  ;;  %v3341_v63 = vsel %vm8062_vm1, 0, %v3339_v52  ;;  %v3467_v61 = vand.u32 8388607, %v3460_v0  ;;  %v3622_v22 = vadd.s32 1, %v8074_v9 }
 0x440   : > { %v3326_v25 = vshrl.u32 %v8038_v24, %v3324_v57  ;;  %v3329_v47 = vadd.s32 127, %v3328_v32  ;;  %vm3471_vm7 = vcmp.gt.s32.totalorder %v3470_v29, 0  ;;  %v3449_v31 = vadd.s32 3, %v3445_v3 }
 0x441   : > { %v3619_v17 = vmul.u32 %v3612_v62, %v3603_v19  ;;  %vm3621_vm8 = vc.u32 %v8078_v7, %v8073_v15  ;;  %v3472_v13 = vsel %vm3471_vm7, %v3470_v29, 0  ;;  %v3345_v24 = vadd.s32 3, %v3341_v63 }
 0x442   : > { %v3327_v43 = vor.u32 %v3326_v25, %v3325_v48  ;;  %v3330_v52 = vshll.u32 %v3329_v47, 23  ;;  %v3623_v41 = vsel %vm3621_vm8, %v3622_v22, %v8074_v9  ;;  %v3468_v6 = vor.u32 8388608, %v3467_v61 }
 0x443   : > { %v3624_v44 = vadd.s32 %v3623_v41, %v3619_v17  ;;  %v3474_v2 = vand.u32 31, %v3472_v13  ;;  %v891_v46 = vmul.f32 %v5884_v10, %v837_v1  ;;  %v679_v3 = vmul.f32 %v5887_v11, %v7207_v36 }
 0x444   : > { %v3331_v18 = vor.u32 4788187, %v3330_v52  ;;  %v8097_v62 = vand.u32 3, %v3449_v31  ;;  %v8101_v39 = vmul.f32 %v5887_v11, %v7213_v59  ;;  %v3334_v35 = vcvt.s32.f32 %v3327_v43 }
 0x445   : > { %v5277_v27 = vpop.eup %5276  ;;  %v3625_v50 = vadd.s32 536870912, %v3624_v44  ;;  %v3475_v33 = vsub.s32 32, %v3474_v2  ;;  %v8104_v56 = vmul.f32 %v5884_v10, %v833_v58  ;;  %v8106_v34 = vand.u32 3, %v3345_v24 }
 0x446   : > { %v3332_v49 = vand.u32 2147483647, %v3331_v18  ;;  %v8111_v36 = vshll.u32 %v3468_v6, 8  ;;  %v923_v59 = vadd.f32 %v891_v46, %v679_v3  ;;  %vm3455_vm9 = vcmp.eq.s32.totalorder %v8097_v62, 2 }
 0x447   : > { %v8108_v37 = vshrl.u32 %v3625_v50, 30  ;;  %v3478_v8 = vshrl.u32 %v5550_v55, %v3475_v33  ;;  %v3481_v9 = vshrl.u32 %v5551_v5, %v3475_v33  ;;  %v3484_v4 = vshrl.u32 %v5552_v14, %v3475_v33 }
 0x448   : > { %v3335_v38 = vmul.f32 %v3334_v35, %v3332_v49  ;;  %v3477_v57 = vshll.u32 %v5549_v53, %v3474_v2  ;;  %v3483_v32 = vshll.u32 %v5551_v5, %v3474_v2  ;;  %v3487_v19 = vshrl.u32 %v5553_v16, %v3475_v33 }
 0x449   : > { %v3627_v40 = vshll.u32 %v8108_v37, 30  ;;  %vm3452_vm10 = vcmp.eq.s32.totalorder %v8097_v62, 0  ;;  %v3473_v63 = vshrl.u32 %v3472_v13, 5  ;;  %v3480_v61 = vshll.u32 %v5550_v55, %v3474_v2 }
 0x44a   : > { %v5279_v29 = vpop.eup %5278  ;;  %v3336_v48 = vxor.u32 2147483648, %v3335_v38  ;;  %v3486_v25 = vshll.u32 %v5552_v14, %v3474_v2  ;;  %v3479_v22 = vor.u32 %v3478_v8, %v3477_v57  ;;  %v3485_v31 = vor.u32 %v3484_v4, %v3483_v32 }
 0x44b   : > { %v8123_v47 = vsub.s32 %v3624_v44, %v3627_v40  ;;  %v3490_v17 = vshrl.u32 %v5554_v23, %v3475_v33  ;;  %v3482_v43 = vor.u32 %v3481_v9, %v3480_v61  ;;  %v3489_v41 = vshll.u32 %v5553_v16, %v3474_v2 }
 0x44c   : > { %v3337_v1 = vsel %vm3254_vm0, %v3336_v48, %v3335_v38  ;;  %v3488_v52 = vor.u32 %v3487_v19, %v3486_v25  ;;  %v3453_v24 = vxor.u32 2147483648, %v5279_v29  ;;  %v3456_v6 = vxor.u32 2147483648, %v5277_v27 }
 0x44d   : > { %v3340_v13 = vsel %vm8062_vm1, %v7819_v26, %v3337_v1  ;;  %v3630_v44 = vsub.s32 0, %v8123_v47  ;;  %v3476_v58 = vshrl.u32 %v5549_v53, %v3475_v33  ;;  %v3491_v18 = vor.u32 %v3490_v17, %v3489_v41 }
 0x44e   : > { %5280 = vcosq.f32 %v3340_v13  ;;  %vm3495_vm11 = vcmp.lt.s32.totalorder %v3473_v63, 4  ;;  %vm3492_vm12 = vcmp.lt.s32.totalorder %v3473_v63, 1  ;;  %vm3494_vm13 = vcmp.lt.s32.totalorder %v3473_v63, 3 }
 0x44f   : > { %5282 = vsinq.f32 %v3340_v13  ;;  %v4736_v46 = vmin.u32 %v3630_v44, %v8123_v47  ;;  %v3497_v3 = vsel %vm3495_vm11, %v3485_v31, 2102212464  ;;  %v3500_v2 = vsel %vm3492_vm12, %v3479_v22, %v3482_v43 }
 0x450   : > { %v3501_v50 = vsel %vm3495_vm11, %v3488_v52, 920167782  ;;  %v8138_v45 = vadd.f32 %v5890_v12, %v923_v59  ;;  %v3496_v35 = vsel %vm3492_vm12, %v3476_v58, %v3479_v22  ;;  %v3498_v8 = vsel %vm3494_vm13, %v3482_v43, %v3497_v3 }
 0x451   : > { %v3632_v49 = vclz %v4736_v46  ;;  %v3504_v33 = vsel %vm3492_vm12, %v3482_v43, %v3485_v31  ;;  %v3457_v38 = vsel %vm3455_vm9, %v3456_v6, %v5279_v29  ;;  %vm3493_vm14 = vcmp.lt.s32.totalorder %v3473_v63, 2 }
 0x452   : > { %v3502_v9 = vsel %vm3494_vm13, %v3485_v31, %v3501_v50  ;;  %v3505_v4 = vsel %vm3495_vm11, %v3491_v18, 1326507024  ;;  %vm3448_vm15 = vweird.f32 %v7783_v28  ;;  %v3454_v40 = vsel %vm3452_vm10, %v5277_v27, %v3453_v24 }
 0x453   : > { %vm3566_vm0 = vcmp.lt.s32.totalorder %v7930_v42, 0  ;;  %v4737_v59 = vadd.s32 4294967294, %v3632_v49  ;;  %v3503_v57 = vsel %vm3493_vm14, %v3500_v2, %v3502_v9  ;;  %v3506_v32 = vsel %vm3494_vm13, %v3488_v52, %v3505_v4 }
 0x454   : > { %v3499_v19 = vsel %vm3493_vm14, %v3496_v35, %v3498_v8  ;;  %v3507_v48 = vsel %vm3493_vm14, %v3504_v33, %v3506_v32  ;;  %v8151_v29 = vmul.u32.u64.low %v8111_v36, %v3503_v57  ;;  %v8152_v61 = vmul.u32.u64.high %v8111_v36, %v3503_v57, %v8151_v29 }
 0x455   : > { %vm4738_vm1 = vcmp.lt.s32.totalorder %v4737_v59, 0  ;;  %v8156_v25 = vmul.u32.u64.low %v8111_v36, %v3507_v48  ;;  %v8157_v22 = vmul.u32.u64.high %v8111_v36, %v3507_v48, %v8156_v25  ;;  %v3775_v27 = vand.u32 2139095040, %v8138_v45 }
 0x456   : > { %vm3451_vm2 = vcmp.lt.s32.totalorder %v8097_v62, 2  ;;  %v3620_v63 = vadd.s32 %v8073_v15, %v8078_v7  ;;  %v3635_v31 = vsel %vm4738_vm1, 0, %v4737_v59  ;;  %v922_v17 = vadd.f32 %v8104_v56, %v8101_v39 }
 0x457   : > { %vm3347_vm3 = vcmp.lt.s32.totalorder %v8106_v34, 2  ;;  %v3636_v1 = vsub.s32 32, %v3635_v31  ;;  %v3640_v43 = vsub.s32 4294967266, %v3635_v31  ;;  %v3772_v52 = vand.u32 2147483647, %v8138_v45 }
 0x458   : > { %v3776_v41 = vshrl.u32 %v3775_v27, 23  ;;  %v3458_v24 = vsel %vm3451_vm2, %v3454_v40, %v3457_v38  ;;  %vm3344_vm4 = vweird.f32 %v7819_v26  ;;  %v3650_v6 = vsub.s32 4, %v8108_v37 }
 0x459   : > { %v3515_v62 = vmul.u32 %v8111_v36, %v3499_v19  ;;  %v3518_v15 = vadd.s32 1, %v8152_v61  ;;  %v3637_v7 = vshll.u32 %v8123_v47, %v3635_v31  ;;  %v3638_v13 = vshrl.u32 %v3620_v63, %v3636_v1 }
 0x45a   : > { %v3641_v39 = vadd.s32 127, %v3640_v43  ;;  %vm3517_vm5 = vc.u32 %v8157_v22, %v8151_v29  ;;  %vm3348_vm6 = vcmp.eq.s32.totalorder %v8106_v34, 0  ;;  %v4743_v44 = vadd.s32 4294967169, %v3776_v41 }
 0x45b   : > { %v3519_v56 = vsel %vm3517_vm5, %v3518_v15, %v8152_v61  ;;  %v8177_v58 = vadd.f32 %v5890_v12, %v922_v17  ;;  %v5281_v18 = vpop.eup %5280  ;;  %vm3351_vm7 = vcmp.eq.s32.totalorder %v8106_v34, 2  ;;  %v3639_v36 = vor.u32 %v3638_v13, %v3637_v7 }
 0x45c   : > { %v3642_v46 = vshll.u32 %v3641_v39, 23  ;;  %v3520_v3 = vadd.s32 %v3519_v56, %v3515_v62  ;;  %v5283_v47 = vpop.eup %5282  ;;  %v3459_v2 = vsel %vm3448_vm15, nan, %v3458_v24  ;;  %v3352_v50 = vxor.u32 2147483648, %v5281_v18 }
 0x45d   : > { %v8185_v49 = vsel %vm3566_vm0, %v3650_v6, %v8108_v37  ;;  %v3782_v35 = vadd.s32 1, %v4743_v44  ;;  %v3349_v8 = vxor.u32 2147483648, %v5283_v47  ;;  %v3779_v9 = vand.u32 8388607, %v3772_v52 }
 0x45e   : > { %v3643_v33 = vor.u32 4788187, %v3642_v46  ;;  %v3521_v38 = vadd.s32 536870912, %v3520_v3  ;;  %v3353_v4 = vsel %vm3351_vm7, %v3352_v50, %v5283_v47  ;;  %v3646_v40 = vcvt.s32.f32 %v3639_v36 }
 0x45f   : > { %vm3783_vm8 = vcmp.gt.s32.totalorder %v3782_v35, 0  ;;  %v3671_v59 = vand.u32 2139095040, %v8177_v58  ;;  %v3350_v28 = vsel %vm3348_vm6, %v5281_v18, %v3349_v8  ;;  %vm8196_vm9 = vcmp.le.f32.partialorder %v3564_v60, 0.7853982 }
 0x460   : > { %v3644_v57 = vand.u32 2147483647, %v3643_v33  ;;  %v3522_v32 = vshrl.u32 %v3521_v38, 30  ;;  %v3784_v19 = vsel %vm3783_vm8, %v3782_v35, 0  ;;  %v3354_v37 = vsel %vm3347_vm3, %v3350_v28, %v3353_v4 }
 0x461   : > { %vm3462_vm10 = vcmp.lt.s32.totalorder %v8007_v51, 0  ;;  %v3786_v61 = vand.u32 31, %v3784_v19  ;;  %v3355_v25 = vsel %vm3344_vm4, nan, %v3354_v37  ;;  %v3653_v63 = vsel %vm8196_vm9, 0, %v8185_v49 }
 0x462   : > { %v3647_v27 = vmul.f32 %v3646_v40, %v3644_v57  ;;  %v3523_v34 = vshll.u32 %v3522_v32, 30  ;;  %v4893_v31 = vpack.c.bf16 %v3459_v2, %v3355_v25  ;;  %v3780_v17 = vor.u32 8388608, %v3779_v9 }
 0x463   : > { %v3787_v1 = vsub.s32 32, %v3786_v61  ;;  %v3668_v60 = vand.u32 2147483647, %v8177_v58  ;;  %v3516_v41 = vadd.s32 %v8151_v29, %v8157_v22  ;;  %v3672_v6 = vshrl.u32 %v3671_v59, 23 }
 0x464   : > { %v3648_v43 = vxor.u32 2147483648, %v3647_v27  ;;  %v8209_v24 = vsub.s32 %v3520_v3, %v3523_v34  ;;  %4925 = vst [vmem:[%s6238_s7 + $0x58] sm:$0xff] %v4893_v31   ;;  %v3546_v26 = vsub.s32 4, %v3522_v32  ;;  %v3789_v62 = vshll.u32 %v5549_v53, %v3786_v61 }
 0x465   : > { %v3790_v15 = vshrl.u32 %v5550_v55, %v3787_v1  ;;  %v3793_v7 = vshrl.u32 %v5551_v5, %v3787_v1  ;;  %v3792_v56 = vshll.u32 %v5550_v55, %v3786_v61  ;;  %v3796_v29 = vshrl.u32 %v5552_v14, %v3787_v1 }
 0x466   : > { %v3649_v13 = vsel %vm3566_vm0, %v3648_v43, %v3647_v27  ;;  %v3526_v39 = vsub.s32 0, %v8209_v24  ;;  %v3785_v44 = vshrl.u32 %v3784_v19, 5  ;;  %v3795_v18 = vshll.u32 %v5551_v5, %v3786_v61 }
 0x467   : > { %v3652_v22 = vsel %vm8196_vm9, %v7930_v42, %v3649_v13  ;;  %v8224_v36 = vshll.u32 %v3780_v17, 8  ;;  %v3791_v3 = vor.u32 %v3790_v15, %v3789_v62  ;;  %v3794_v47 = vor.u32 %v3793_v7, %v3792_v56 }
 0x468   : > { %v4732_v46 = vmin.u32 %v3526_v39, %v8209_v24  ;;  %v3798_v2 = vshll.u32 %v5552_v14, %v3786_v61  ;;  %v3797_v50 = vor.u32 %v3796_v29, %v3795_v18  ;;  %v3799_v35 = vshrl.u32 %v5553_v16, %v3787_v1 }
 0x469   : > { %v3801_v8 = vshll.u32 %v5553_v16, %v3786_v61  ;;  %v3802_v33 = vshrl.u32 %v5554_v23, %v3787_v1  ;;  %5284 = vcosq.f32 %v3652_v22  ;;  %vm8233_vm11 = vcmp.le.f32.partialorder %v3460_v0, 0.7853982 }
 0x46a   : > { %v3528_v9 = vclz %v4732_v46  ;;  %v3547_v4 = vsel %vm3462_vm10, %v3546_v26, %v3522_v32  ;;  %v4739_v40 = vadd.s32 4294967169, %v3672_v6  ;;  %5286 = vsinq.f32 %v3652_v22 }
 0x46b   : > { %v3788_v59 = vshrl.u32 %v5549_v53, %v3787_v1  ;;  %v3800_v28 = vor.u32 %v3799_v35, %v3798_v2  ;;  %v3803_v57 = vor.u32 %v3802_v33, %v3801_v8  ;;  %vm3804_vm12 = vcmp.lt.s32.totalorder %v3785_v44, 1 }
 0x46c   : > { %v4733_v19 = vadd.s32 4294967294, %v3528_v9  ;;  %vm3806_vm13 = vcmp.lt.s32.totalorder %v3785_v44, 3  ;;  %vm3807_vm14 = vcmp.lt.s32.totalorder %v3785_v44, 4  ;;  %v3812_v61 = vsel %vm3804_vm12, %v3791_v3, %v3794_v47 }
 0x46d   : > { %v3809_v37 = vsel %vm3807_vm14, %v3797_v50, 2102212464  ;;  %v3813_v0 = vsel %vm3807_vm14, %v3800_v28, 920167782  ;;  %v3816_v25 = vsel %vm3804_vm12, %v3794_v47, %v3797_v50  ;;  %vm3805_vm0 = vcmp.lt.s32.totalorder %v3785_v44, 2 }
 0x46e   : > { %vm4734_vm15 = vcmp.lt.s32.totalorder %v4733_v19, 0  ;;  %v3814_v27 = vsel %vm3806_vm13, %v3797_v50, %v3813_v0  ;;  %v3817_v34 = vsel %vm3807_vm14, %v3803_v57, 1326507024  ;;  %v3808_v31 = vsel %vm3804_vm12, %v3788_v59, %v3791_v3 }
 0x46f   : > { %v3531_v32 = vsel %vm4734_vm15, 0, %v4733_v19  ;;  %v3815_v17 = vsel %vm3805_vm0, %v3812_v61, %v3814_v27  ;;  %v3818_v1 = vsel %vm3806_vm13, %v3800_v28, %v3817_v34  ;;  %v3810_v26 = vsel %vm3806_vm13, %v3794_v47, %v3809_v37  ;;  %v848_v28 = vpop.permute.xlu1 %847 }
 0x470   : > { %v3532_v43 = vsub.s32 32, %v3531_v32  ;;  %v3536_v6 = vsub.s32 4294967266, %v3531_v32  ;;  %v3819_v62 = vsel %vm3805_vm0, %v3816_v25, %v3818_v1  ;;  %v3533_v56 = vshll.u32 %v8209_v24, %v3531_v32 }
 0x471   : > { %v8246_v15 = vmul.u32.u64.low %v8224_v36, %v3819_v62  ;;  %v8247_v7 = vmul.u32.u64.high %v8224_v36, %v3819_v62, %v8246_v15  ;;  %v8250_v13 = vmul.u32.u64.low %v8224_v36, %v3815_v17  ;;  %v8251_v39 = vmul.u32.u64.high %v8224_v36, %v3815_v17, %v8250_v13 }
 0x472   : > { %v3534_v29 = vshrl.u32 %v3516_v41, %v3532_v43  ;;  %v3537_v22 = vadd.s32 127, %v3536_v6  ;;  %v3678_v18 = vadd.s32 1, %v4739_v40  ;;  %v3549_v46 = vsel %vm8233_vm11, 0, %v3547_v4 }
 0x473   : > { %v3811_v3 = vsel %vm3805_vm0, %v3808_v31, %v3810_v26  ;;  %v3657_v50 = vadd.s32 3, %v3653_v63  ;;  %vm3829_vm2 = vc.u32 %v8247_v7, %v8250_v13  ;;  %v3830_v41 = vadd.s32 1, %v8251_v39 }
 0x474   : > { %v3535_v47 = vor.u32 %v3534_v29, %v3533_v56  ;;  %v3538_v2 = vshll.u32 %v3537_v22, 23  ;;  %vm3679_vm1 = vcmp.gt.s32.totalorder %v3678_v18, 0  ;;  %v3553_v8 = vadd.s32 3, %v3549_v46 }
 0x475   : > { %v3680_v24 = vsel %vm3679_vm1, %v3678_v18, 0  ;;  %v3827_v33 = vmul.u32 %v8224_v36, %v3811_v3  ;;  %v3675_v44 = vand.u32 8388607, %v3668_v60  ;;  %v3831_v48 = vsel %vm3829_vm2, %v3830_v41, %v8251_v39 }
 0x476   : > { %v3539_v35 = vor.u32 4788187, %v3538_v2  ;;  %v8268_v9 = vpop.eup %5284  ;;  %v3682_v4 = vand.u32 31, %v3680_v24  ;;  %v3542_v40 = vcvt.s32.f32 %v3535_v47  ;;  %v681_v57 = vmul.f32 %v5887_v11, %v7223_v20 }
 0x477   : > { %v8271_v49 = vpop.eup %5286  ;;  %v3832_v59 = vadd.s32 %v3831_v48, %v3827_v33  ;;  %v8277_v36 = vmul.f32 %v5887_v11, %v7237_v30  ;;  %v8279_v19 = vand.u32 3, %v3657_v50  ;;  %v8281_v0 = vand.u32 3, %v3553_v8 }
 0x478   : > { %v3540_v63 = vand.u32 2147483647, %v3539_v35  ;;  %v3683_v37 = vsub.s32 32, %v3682_v4  ;;  %v3676_v27 = vor.u32 8388608, %v3675_v44  ;;  %v3685_v34 = vshll.u32 %v5549_v53, %v3682_v4 }
 0x479   : > { %v3833_v25 = vadd.s32 536870912, %v3832_v59  ;;  %v893_v20 = vmul.f32 %v5884_v10, %v848_v28  ;;  %v3688_v30 = vshll.u32 %v5550_v55, %v3682_v4  ;;  %v3681_v6 = vshrl.u32 %v3680_v24, 5 }
 0x47a   : > { %v3543_v61 = vmul.f32 %v3542_v40, %v3540_v63  ;;  %v3686_v32 = vshrl.u32 %v5550_v55, %v3683_v37  ;;  %v3689_v31 = vshrl.u32 %v5551_v5, %v3683_v37  ;;  %v3692_v43 = vshrl.u32 %v5552_v14, %v3683_v37 }
 0x47b   : > { %v8287_v1 = vshrl.u32 %v3833_v25, 30  ;;  %v3691_v26 = vshll.u32 %v5551_v5, %v3682_v4  ;;  %v3694_v62 = vshll.u32 %v5552_v14, %v3682_v4  ;;  %v3695_v15 = vshrl.u32 %v5553_v16, %v3683_v37 }
 0x47c   : > { %v3544_v17 = vxor.u32 2147483648, %v3543_v61  ;;  %v3687_v29 = vor.u32 %v3686_v32, %v3685_v34  ;;  %v3690_v22 = vor.u32 %v3689_v31, %v3688_v30  ;;  %v3697_v3 = vshll.u32 %v5553_v16, %v3682_v4 }
 0x47d   : > { %v3835_v56 = vshll.u32 %v8287_v1, 30  ;;  %v3696_v46 = vor.u32 %v3695_v15, %v3694_v62  ;;  %v3698_v47 = vshrl.u32 %v5554_v23, %v3683_v37  ;;  %v3693_v50 = vor.u32 %v3692_v43, %v3691_v26 }
 0x47e   : > { %v3545_v39 = vsel %vm3462_vm10, %v3544_v17, %v3543_v61  ;;  %v8304_v41 = vshll.u32 %v3676_v27, 8  ;;  %v3664_v24 = vxor.u32 2147483648, %v8268_v9  ;;  %v925_v8 = vadd.f32 %v893_v20, %v681_v57 }
 0x47f   : > { %v3548_v18 = vsel %vm8233_vm11, %v8007_v51, %v3545_v39  ;;  %v8302_v2 = vsub.s32 %v3832_v59, %v3835_v56  ;;  %v3699_v35 = vor.u32 %v3698_v47, %v3697_v3  ;;  %v3661_v33 = vxor.u32 2147483648, %v8271_v49 }
 0x480   : > { %5288 = vcosq.f32 %v3548_v18  ;;  %vm3700_vm3 = vcmp.lt.s32.totalorder %v3681_v6, 1  ;;  %vm3703_vm4 = vcmp.lt.s32.totalorder %v3681_v6, 4  ;;  %v3684_v44 = vshrl.u32 %v5549_v53, %v3683_v37 }
 0x481   : > { %5290 = vsinq.f32 %v3548_v18  ;;  %v3838_v38 = vsub.s32 0, %v8302_v2  ;;  %vm3702_vm5 = vcmp.lt.s32.totalorder %v3681_v6, 3  ;;  %v3708_v48 = vsel %vm3700_vm3, %v3687_v29, %v3690_v22 }
 0x482   : > { %v3709_v4 = vsel %vm3703_vm4, %v3696_v46, 920167782  ;;  %vm3701_vm6 = vcmp.lt.s32.totalorder %v3681_v6, 2  ;;  %v3705_v40 = vsel %vm3703_vm4, %v3693_v50, 2102212464  ;;  %v3712_v57 = vsel %vm3700_vm3, %v3690_v22, %v3693_v50 }
 0x483   : > { %v4744_v63 = vmin.u32 %v3838_v38, %v8302_v2  ;;  %v3710_v59 = vsel %vm3702_vm5, %v3693_v50, %v3709_v4  ;;  %v3713_v61 = vsel %vm3703_vm4, %v3699_v35, 1326507024  ;;  %v8316_v25 = vadd.f32 %v5890_v12, %v925_v8  ;;  %v844_v50 = vpop.permute.xlu0 %843 }
 0x484   : > { %v3711_v28 = vsel %vm3701_vm6, %v3708_v48, %v3710_v59  ;;  %vm3659_vm7 = vcmp.lt.s32.totalorder %v8279_v19, 2  ;;  %vm3660_vm8 = vcmp.eq.s32.totalorder %v8279_v19, 0  ;;  %v3704_v27 = vsel %vm3700_vm3, %v3684_v44, %v3687_v29 }
 0x485   : > { %v3840_v37 = vclz %v4744_v63  ;;  %vm3656_vm9 = vweird.f32 %v7930_v42  ;;  %v3706_v34 = vsel %vm3702_vm5, %v3690_v22, %v3705_v40  ;;  %v3714_v32 = vsel %vm3702_vm5, %v3696_v46, %v3713_v61 }
 0x486   : > { %v8325_v31 = vmul.u32.u64.low %v8304_v41, %v3711_v28  ;;  %v8326_v20 = vmul.u32.u64.high %v8304_v41, %v3711_v28, %v8325_v31  ;;  %vm3663_vm10 = vcmp.eq.s32.totalorder %v8279_v19, 2  ;;  %v3715_v30 = vsel %vm3701_vm6, %v3712_v57, %v3714_v32 }
 0x487   : > { %v4745_v17 = vadd.s32 4294967294, %v3840_v37  ;;  %v3983_v43 = vand.u32 2139095040, %v8316_v25  ;;  %v3662_v26 = vsel %vm3660_vm8, %v8268_v9, %v3661_v33  ;;  %v3665_v62 = vsel %vm3663_vm10, %v3664_v24, %v8271_v49 }
 0x488   : > { %vm3555_vm11 = vcmp.lt.s32.totalorder %v8281_v0, 2  ;;  %v8336_v15 = vmul.u32.u64.low %v8304_v41, %v3715_v30  ;;  %v8337_v39 = vmul.u32.u64.high %v8304_v41, %v3715_v30, %v8336_v15  ;;  %vm3552_vm12 = vweird.f32 %v8007_v51 }
 0x489   : > { %vm3556_vm13 = vcmp.eq.s32.totalorder %v8281_v0, 0  ;;  %vm4746_vm14 = vcmp.lt.s32.totalorder %v4745_v17, 0  ;;  %v3707_v56 = vsel %vm3701_vm6, %v3704_v27, %v3706_v34  ;;  %v3984_v29 = vshrl.u32 %v3983_v43, 23  ;;  %v859_v43 = vpop.permute.xlu1 %858 }
 0x48a   : > { %vm3559_vm15 = vcmp.eq.s32.totalorder %v8281_v0, 2  ;;  %v3828_v9 = vadd.s32 %v8250_v13, %v8247_v7  ;;  %v3843_v49 = vsel %vm4746_vm14, 0, %v4745_v17  ;;  %v3726_v22 = vadd.s32 1, %v8326_v20 }
 0x48b   : > { %v3666_v18 = vsel %vm3659_vm7, %v3662_v26, %v3665_v62  ;;  %v3844_v46 = vsub.s32 32, %v3843_v49  ;;  %v3848_v3 = vsub.s32 4294967266, %v3843_v49  ;;  %v4751_v47 = vadd.s32 4294967169, %v3984_v29 }
 0x48c   : > { %v3845_v6 = vshll.u32 %v8302_v2, %v3843_v49  ;;  %v3723_v35 = vmul.u32 %v8304_v41, %v3707_v56  ;;  %vm3725_vm0 = vc.u32 %v8337_v39, %v8325_v31  ;;  %v3980_v7 = vand.u32 2147483647, %v8316_v25 }
 0x48d   : > { %v5289_v24 = vpop.eup %5288  ;;  %v3846_v33 = vshrl.u32 %v3828_v9, %v3844_v46  ;;  %v3849_v38 = vadd.s32 127, %v3848_v3  ;;  %v3727_v19 = vsel %vm3725_vm0, %v3726_v22, %v8326_v20  ;;  %v3990_v4 = vadd.s32 1, %v4751_v47 }
 0x48e   : > { %v5291_v13 = vpop.eup %5290  ;;  %v3560_v8 = vxor.u32 2147483648, %v5289_v24  ;;  %v3728_v48 = vadd.s32 %v3727_v19, %v3723_v35  ;;  %v892_v63 = vmul.f32 %v5884_v10, %v844_v50  ;;  %v3667_v2 = vsel %vm3656_vm9, nan, %v3666_v18 }
 0x48f   : > { %v3557_v44 = vxor.u32 2147483648, %v5291_v13  ;;  %v3847_v40 = vor.u32 %v3846_v33, %v3845_v6  ;;  %v3850_v59 = vshll.u32 %v3849_v38, 23  ;;  %v3858_v57 = vsub.s32 4, %v8287_v1 }
 0x490   : > { %v3561_v41 = vsel %vm3559_vm15, %v3560_v8, %v5291_v13  ;;  %v3729_v61 = vadd.s32 536870912, %v3728_v48  ;;  %vm3991_vm1 = vcmp.gt.s32.totalorder %v3990_v4, 0  ;;  %v3987_v42 = vand.u32 8388607, %v3980_v7 }
 0x491   : > { %v3558_v28 = vsel %vm3556_vm13, %v5289_v24, %v3557_v44  ;;  %v3851_v27 = vor.u32 4788187, %v3850_v59  ;;  %v3992_v34 = vsel %vm3991_vm1, %v3990_v4, 0  ;;  %v924_v30 = vadd.f32 %v892_v63, %v8277_v36 }
 0x492   : > { %v3562_v37 = vsel %vm3555_vm11, %v3558_v28, %v3561_v41  ;;  %v3730_v20 = vshrl.u32 %v3729_v61, 30  ;;  %v3994_v17 = vand.u32 31, %v3992_v34  ;;  %vm8371_vm2 = vcmp.le.f32.partialorder %v3772_v52, 0.7853982 }
 0x493   : > { %v3563_v32 = vsel %vm3552_vm12, nan, %v3562_v37  ;;  %v3852_v62 = vand.u32 2147483647, %v3851_v27  ;;  %v3854_v15 = vcvt.s32.f32 %v3847_v40  ;;  %vm3774_vm3 = vcmp.lt.s32.totalorder %v8138_v45, 0 }
 0x494   : > { %v4898_v26 = vpack.c.bf16 %v3667_v2, %v3563_v32  ;;  %vm3670_vm4 = vcmp.lt.s32.totalorder %v8177_v58, 0  ;;  %v3731_v51 = vshll.u32 %v3730_v20, 30  ;;  %v3995_v56 = vsub.s32 32, %v3994_v17 }
 0x495   : > { %v3855_v29 = vmul.f32 %v3854_v15, %v3852_v62  ;;  %v8381_v36 = vsel %vm3774_vm3, %v3858_v57, %v8287_v1  ;;  %v3988_v9 = vor.u32 8388608, %v3987_v42  ;;  %v8384_v52 = vmul.f32 %v5884_v10, %v859_v43 }
 0x496   : > { %4926 = vst [vmem:[%s6238_s7 + $0x60] sm:$0xff] %v4898_v26   ;;  %v3724_v49 = vadd.s32 %v8325_v31, %v8337_v39  ;;  %v8388_v22 = vsub.s32 %v3728_v48, %v3731_v51  ;;  %v3998_v18 = vshrl.u32 %v5550_v55, %v3995_v56  ;;  %v8392_v46 = vadd.f32 %v5890_v12, %v924_v30 }
 0x497   : > { %v3856_v3 = vxor.u32 2147483648, %v3855_v29  ;;  %v3754_v47 = vsub.s32 4, %v3730_v20  ;;  %v4001_v50 = vshrl.u32 %v5551_v5, %v3995_v56  ;;  %v4004_v1 = vshrl.u32 %v5552_v14, %v3995_v56 }
 0x498   : > { %v3734_v24 = vsub.s32 0, %v8388_v22  ;;  %v3997_v6 = vshll.u32 %v5549_v53, %v3994_v17  ;;  %v4000_v35 = vshll.u32 %v5550_v55, %v3994_v17  ;;  %v4007_v31 = vshrl.u32 %v5553_v16, %v3995_v56 }
 0x499   : > { %v3857_v39 = vsel %vm3774_vm3, %v3856_v3, %v3855_v29  ;;  %v3993_v13 = vshrl.u32 %v3992_v34, 5  ;;  %v4003_v8 = vshll.u32 %v5551_v5, %v3994_v17  ;;  %v4006_v33 = vshll.u32 %v5552_v14, %v3994_v17 }
 0x49a   : > { %v3860_v38 = vsel %vm8371_vm2, %v8138_v45, %v3857_v39  ;;  %v4740_v19 = vmin.u32 %v3734_v24, %v8388_v22  ;;  %v3999_v44 = vor.u32 %v3998_v18, %v3997_v6  ;;  %v4002_v48 = vor.u32 %v4001_v50, %v4000_v35 }
 0x49b   : > { %v4005_v4 = vor.u32 %v4004_v1, %v4003_v8  ;;  %v4008_v63 = vor.u32 %v4007_v31, %v4006_v33  ;;  %v4009_v2 = vshll.u32 %v5553_v16, %v3994_v17  ;;  %v4010_v41 = vshrl.u32 %v5554_v23, %v3995_v56 }
 0x49c   : > { %v3736_v40 = vclz %v4740_v19  ;;  %v3755_v59 = vsel %vm3670_vm4, %v3754_v47, %v3730_v20  ;;  %v4028_v28 = vshll.u32 %v3988_v9, 8  ;;  %v3879_v57 = vand.u32 2139095040, %v8392_v46 }
 0x49d   : > { %5292 = vcosq.f32 %v3860_v38  ;;  %vm8415_vm5 = vcmp.le.f32.partialorder %v3668_v60, 0.7853982  ;;  %v3996_v37 = vshrl.u32 %v5549_v53, %v3995_v56  ;;  %v4011_v27 = vor.u32 %v4010_v41, %v4009_v2 }
 0x49e   : > { %vm4012_vm6 = vcmp.lt.s32.totalorder %v3993_v13, 1  ;;  %v4741_v42 = vadd.s32 4294967294, %v3736_v40  ;;  %vm4014_vm7 = vcmp.lt.s32.totalorder %v3993_v13, 3  ;;  %vm4015_vm8 = vcmp.lt.s32.totalorder %v3993_v13, 4 }
 0x49f   : > { %v4020_v34 = vsel %vm4012_vm6, %v3999_v44, %v4002_v48  ;;  %v4017_v32 = vsel %vm4015_vm8, %v4005_v4, 2102212464  ;;  %v4021_v20 = vsel %vm4015_vm8, %v4008_v63, 920167782  ;;  %v4024_v17 = vsel %vm4012_vm6, %v4002_v48, %v4005_v4 }
 0x4a0   : > { %v4025_v30 = vsel %vm4015_vm8, %v4011_v27, 1326507024  ;;  %vm4742_vm9 = vcmp.lt.s32.totalorder %v4741_v42, 0  ;;  %vm4013_vm10 = vcmp.lt.s32.totalorder %v3993_v13, 2  ;;  %v4022_v43 = vsel %vm4014_vm7, %v4005_v4, %v4021_v20  ;;  %v855_v27 = vpop.permute.xlu0 %854 }
 0x4a1   : > { %v4026_v60 = vsel %vm4014_vm7, %v4008_v63, %v4025_v30  ;;  %v3739_v26 = vsel %vm4742_vm9, 0, %v4741_v42  ;;  %v4016_v62 = vsel %vm4012_vm6, %v3996_v37, %v3999_v44  ;;  %v4023_v15 = vsel %vm4013_vm10, %v4020_v34, %v4022_v43 }
 0x4a2   : > { %v4027_v51 = vsel %vm4013_vm10, %v4024_v17, %v4026_v60  ;;  %v3740_v56 = vsub.s32 32, %v3739_v26  ;;  %v3744_v29 = vsub.s32 4294967266, %v3739_v26  ;;  %v4018_v9 = vsel %vm4014_vm7, %v4002_v48, %v4017_v32 }
 0x4a3   : > { %v3880_v18 = vshrl.u32 %v3879_v57, 23  ;;  %v8425_v3 = vmul.u32.u64.low %v4028_v28, %v4027_v51  ;;  %v8426_v47 = vmul.u32.u64.high %v4028_v28, %v4027_v51, %v8425_v3  ;;  %v3741_v24 = vshll.u32 %v8388_v22, %v3739_v26 }
 0x4a4   : > { %v8428_v50 = vmul.u32.u64.low %v4028_v28, %v4023_v15  ;;  %v8429_v1 = vmul.u32.u64.high %v4028_v28, %v4023_v15, %v8428_v50  ;;  %v3742_v6 = vshrl.u32 %v3724_v49, %v3740_v56  ;;  %v3745_v35 = vadd.s32 127, %v3744_v29 }
 0x4a5   : > { %v4747_v31 = vadd.s32 4294967169, %v3880_v18  ;;  %v3861_v39 = vsel %vm8371_vm2, 0, %v8381_v36  ;;  %5294 = vsinq.f32 %v3860_v38  ;;  %v4019_v8 = vsel %vm4013_vm10, %v4016_v62, %v4018_v9 }
 0x4a6   : > { %v3876_v33 = vand.u32 2147483647, %v8392_v46  ;;  %v3743_v19 = vor.u32 %v3742_v6, %v3741_v24  ;;  %v3746_v44 = vshll.u32 %v3745_v35, 23  ;;  %v3757_v48 = vsel %vm8415_vm5, 0, %v3755_v59 }
 0x4a7   : > { %v3886_v4 = vadd.s32 1, %v4747_v31  ;;  %v683_v49 = vmul.f32 %v5887_v11, %v7251_v21  ;;  %vm4037_vm11 = vc.u32 %v8426_v47, %v8428_v50  ;;  %v4038_v0 = vadd.s32 1, %v8429_v1 }
 0x4a8   : > { %v3865_v36 = vadd.s32 3, %v3861_v39  ;;  %v3747_v22 = vor.u32 4788187, %v3746_v44  ;;  %v4035_v13 = vmul.u32 %v4028_v28, %v4019_v8  ;;  %v3761_v38 = vadd.s32 3, %v3757_v48 }
 0x4a9   : > { %vm3887_vm12 = vcmp.gt.s32.totalorder %v3886_v4, 0  ;;  %v4039_v63 = vsel %vm4037_vm11, %v4038_v0, %v8429_v1  ;;  %v927_v41 = vadd.f32 %v8384_v52, %v683_v49  ;;  %v3750_v57 = vcvt.s32.f32 %v3743_v19 }
 0x4aa   : > { %v3888_v2 = vsel %vm3887_vm12, %v3886_v4, 0  ;;  %v8447_v40 = vpop.eup %5292  ;;  %v3748_v59 = vand.u32 2147483647, %v3747_v22  ;;  %v4040_v21 = vadd.s32 %v4039_v63, %v4035_v13  ;;  %v3883_v37 = vand.u32 8388607, %v3876_v33 }
 0x4ab   : > { %v3890_v42 = vand.u32 31, %v3888_v2  ;;  %v8453_v28 = vmul.f32 %v5887_v11, %v7258_v54  ;;  %v8455_v20 = vand.u32 3, %v3865_v36  ;;  %v8457_v17 = vand.u32 3, %v3761_v38 }
 0x4ac   : > { %v3751_v34 = vmul.f32 %v3750_v57, %v3748_v59  ;;  %v4041_v32 = vadd.s32 536870912, %v4040_v21  ;;  %v8460_v30 = vmul.f32 %v5884_v10, %v855_v27  ;;  %v3884_v26 = vor.u32 8388608, %v3883_v37 }
 0x4ad   : > { %v3891_v52 = vsub.s32 32, %v3890_v42  ;;  %v8465_v62 = vadd.f32 %v5890_v12, %v927_v41  ;;  %v3893_v11 = vshll.u32 %v5549_v53, %v3890_v42  ;;  %v3889_v29 = vshrl.u32 %v3888_v2, 5 }
 0x4ae   : > { %v3752_v43 = vxor.u32 2147483648, %v3751_v34  ;;  %v8462_v60 = vshrl.u32 %v4041_v32, 30  ;;  %v3899_v9 = vshll.u32 %v5551_v5, %v3890_v42  ;;  %vm3871_vm13 = vcmp.eq.s32.totalorder %v8455_v20, 2 }
 0x4af   : > { %v3894_v54 = vshrl.u32 %v5550_v55, %v3891_v52  ;;  %v3897_v15 = vshrl.u32 %v5551_v5, %v3891_v52  ;;  %v3900_v51 = vshrl.u32 %v5552_v14, %v3891_v52  ;;  %v3896_v1 = vshll.u32 %v5550_v55, %v3890_v42 }
 0x4b0   : > { %v3753_v56 = vsel %vm3670_vm4, %v3752_v43, %v3751_v34  ;;  %v4043_v10 = vshll.u32 %v8462_v60, 30  ;;  %v3902_v24 = vshll.u32 %v5552_v14, %v3890_v42  ;;  %v3903_v39 = vshrl.u32 %v5553_v16, %v3891_v52 }
 0x4b1   : > { %v3756_v18 = vsel %vm8415_vm5, %v8177_v58, %v3753_v56  ;;  %v3895_v3 = vor.u32 %v3894_v54, %v3893_v11  ;;  %v3901_v31 = vor.u32 %v3900_v51, %v3899_v9  ;;  %vm3868_vm14 = vcmp.eq.s32.totalorder %v8455_v20, 0 }
 0x4b2   : > { %v5295_v6 = vpop.eup %5294  ;;  %5296 = vcosq.f32 %v3756_v18  ;;  %v8481_v35 = vsub.s32 %v4040_v21, %v4043_v10  ;;  %v3898_v8 = vor.u32 %v3897_v15, %v3896_v1  ;;  %v3905_v19 = vshll.u32 %v5553_v16, %v3890_v42 }
 0x4b3   : > { %5298 = vsinq.f32 %v3756_v18  ;;  %v3906_v61 = vshrl.u32 %v5554_v23, %v3891_v52  ;;  %v3872_v44 = vxor.u32 2147483648, %v8447_v40  ;;  %v3904_v4 = vor.u32 %v3903_v39, %v3902_v24 }
 0x4b4   : > { %v4046_v48 = vsub.s32 0, %v8481_v35  ;;  %v3924_v49 = vshll.u32 %v3884_v26, 8  ;;  %v3869_v0 = vxor.u32 2147483648, %v5295_v6  ;;  %vm3911_vm15 = vcmp.lt.s32.totalorder %v3889_v29, 4 }
 0x4b5   : > { %v3907_v36 = vor.u32 %v3906_v61, %v3905_v19  ;;  %v4191_v22 = vand.u32 2139095040, %v8465_v62  ;;  %vm3867_vm0 = vcmp.lt.s32.totalorder %v8455_v20, 2  ;;  %v3892_v38 = vshrl.u32 %v5549_v53, %v3891_v52 }
 0x4b6   : > { %v4752_v13 = vmin.u32 %v4046_v48, %v8481_v35  ;;  %vm3908_vm1 = vcmp.lt.s32.totalorder %v3889_v29, 1  ;;  %v3913_v63 = vsel %vm3911_vm15, %v3901_v31, 2102212464  ;;  %v3917_v41 = vsel %vm3911_vm15, %v3904_v4, 920167782 }
 0x4b7   : > { %v3916_v2 = vsel %vm3908_vm1, %v3895_v3, %v3898_v8  ;;  %v3920_v59 = vsel %vm3908_vm1, %v3898_v8, %v3901_v31  ;;  %v3921_v57 = vsel %vm3911_vm15, %v3907_v36, 1326507024  ;;  %vm3909_vm2 = vcmp.lt.s32.totalorder %v3889_v29, 2 }
 0x4b8   : > { %v4048_v21 = vclz %v4752_v13  ;;  %vm3910_vm3 = vcmp.lt.s32.totalorder %v3889_v29, 3  ;;  %v3912_v37 = vsel %vm3908_vm1, %v3892_v38, %v3895_v3  ;;  %v4192_v32 = vshrl.u32 %v4191_v22, 23 }
 0x4b9   : > { %v3914_v27 = vsel %vm3910_vm3, %v3898_v8, %v3913_v63  ;;  %v3918_v42 = vsel %vm3910_vm3, %v3901_v31, %v3917_v41  ;;  %v3922_v34 = vsel %vm3910_vm3, %v3904_v4, %v3921_v57  ;;  %vm3864_vm4 = vweird.f32 %v8138_v45 }
 0x4ba   : > { %v3873_v43 = vsel %vm3871_vm13, %v3872_v44, %v5295_v6  ;;  %v4753_v52 = vadd.s32 4294967294, %v4048_v21  ;;  %v3919_v26 = vsel %vm3909_vm2, %v3916_v2, %v3918_v42  ;;  %v3923_v11 = vsel %vm3909_vm2, %v3920_v59, %v3922_v34 }
 0x4bb   : > { %v8498_v54 = vmul.u32.u64.low %v3924_v49, %v3923_v11  ;;  %v8499_v15 = vmul.u32.u64.high %v3924_v49, %v3923_v11, %v8498_v54  ;;  %v8501_v51 = vmul.u32.u64.low %v3924_v49, %v3919_v26  ;;  %v8502_v56 = vmul.u32.u64.high %v3924_v49, %v3919_v26, %v8501_v51 }
 0x4bc   : > { %v3870_v10 = vsel %vm3868_vm14, %v8447_v40, %v3869_v0  ;;  %vm3760_vm5 = vweird.f32 %v8177_v58  ;;  %vm4754_vm6 = vcmp.lt.s32.totalorder %v4753_v52, 0  ;;  %v3915_v9 = vsel %vm3909_vm2, %v3912_v37, %v3914_v27 }
 0x4bd   : > { %v4759_v18 = vadd.s32 4294967169, %v4192_v32  ;;  %vm3763_vm7 = vcmp.lt.s32.totalorder %v8457_v17, 2  ;;  %vm3764_vm8 = vcmp.eq.s32.totalorder %v8457_v17, 0  ;;  %v4036_v3 = vadd.s32 %v8428_v50, %v8426_v47 }
 0x4be   : > { %v4051_v1 = vsel %vm4754_vm6, 0, %v4753_v52  ;;  %v4188_v31 = vand.u32 2147483647, %v8465_v62  ;;  %v3874_v8 = vsel %vm3867_vm0, %v3870_v10, %v3873_v43  ;;  %v3931_v29 = vmul.u32 %v3924_v49, %v3915_v9 }
 0x4bf   : > { %v4052_v24 = vsub.s32 32, %v4051_v1  ;;  %v4056_v6 = vsub.s32 4294967266, %v4051_v1  ;;  %v4198_v39 = vadd.s32 1, %v4759_v18  ;;  %v5297_v40 = vpop.eup %5296  ;;  %vm3933_vm9 = vc.u32 %v8499_v15, %v8501_v51 }
 0x4c0   : > { %v3934_v19 = vadd.s32 1, %v8502_v56  ;;  %v5299_v61 = vpop.eup %5298  ;;  %v3768_v44 = vxor.u32 2147483648, %v5297_v40  ;;  %vm3767_vm11 = vcmp.eq.s32.totalorder %v8457_v17, 2  ;;  %v4053_v20 = vshll.u32 %v8481_v35, %v4051_v1 }
 0x4c1   : > { %v4054_v48 = vshrl.u32 %v4036_v3, %v4052_v24  ;;  %v4057_v47 = vadd.s32 127, %v4056_v6  ;;  %vm4199_vm10 = vcmp.gt.s32.totalorder %v4198_v39, 0  ;;  %v3765_v50 = vxor.u32 2147483648, %v5299_v61 }
 0x4c2   : > { %v3935_v4 = vsel %vm3933_vm9, %v3934_v19, %v8502_v56  ;;  %v4200_v0 = vsel %vm4199_vm10, %v4198_v39, 0  ;;  %v3769_v36 = vsel %vm3767_vm11, %v3768_v44, %v5299_v61  ;;  %v3875_v13 = vsel %vm3864_vm4, nan, %v3874_v8 }
 0x4c3   : > { %v4058_v49 = vshll.u32 %v4057_v47, 23  ;;  %v3936_v22 = vadd.s32 %v3935_v4, %v3931_v29  ;;  %v3766_v38 = vsel %vm3764_vm8, %v5297_v40, %v3765_v50  ;;  %v4195_v63 = vand.u32 8388607, %v4188_v31 }
 0x4c4   : > { %v4202_v2 = vand.u32 31, %v4200_v0  ;;  %v3770_v41 = vsel %vm3763_vm7, %v3766_v38, %v3769_v36  ;;  %v4055_v59 = vor.u32 %v4054_v48, %v4053_v20  ;;  %v926_v34 = vadd.f32 %v8460_v30, %v8453_v28 }
 0x4c5   : > { %v4059_v57 = vor.u32 4788187, %v4058_v49  ;;  %v3937_v21 = vadd.s32 536870912, %v3936_v22  ;;  %v3771_v35 = vsel %vm3760_vm5, nan, %v3770_v41  ;;  %v4196_v32 = vor.u32 8388608, %v4195_v63 }
 0x4c6   : > { %v4203_v37 = vsub.s32 32, %v4202_v2  ;;  %v4903_v45 = vpack.c.bf16 %v3875_v13, %v3771_v35  ;;  %v4062_v26 = vcvt.s32.f32 %v4055_v59  ;;  %v4205_v11 = vshll.u32 %v5549_v53, %v4202_v2 }
 0x4c7   : > { %v4060_v27 = vand.u32 2147483647, %v4059_v57  ;;  %v8533_v42 = vshrl.u32 %v3937_v21, 30  ;;  %v4208_v54 = vshll.u32 %v5550_v55, %v4202_v2  ;;  %v4201_v56 = vshrl.u32 %v4200_v0, 5 }
 0x4c8   : > { %v4206_v43 = vshrl.u32 %v5550_v55, %v4203_v37  ;;  %v4209_v17 = vshrl.u32 %v5551_v5, %v4203_v37  ;;  %v4212_v52 = vshrl.u32 %v5552_v14, %v4203_v37  ;;  %4927 = vst [vmem:[%s6238_s7 + $0x68] sm:$0xff] %v4903_v45   ;;  %v4211_v10 = vshll.u32 %v5551_v5, %v4202_v2 }
 0x4c9   : > { %v3939_v58 = vshll.u32 %v8533_v42, 30  ;;  %v4214_v28 = vshll.u32 %v5552_v14, %v4202_v2  ;;  %v4215_v30 = vshrl.u32 %v5553_v16, %v4203_v37  ;;  %v4063_v9 = vmul.f32 %v4062_v26, %v4060_v27 }
 0x4ca   : > { %v4207_v3 = vor.u32 %v4206_v43, %v4205_v11  ;;  %v4210_v1 = vor.u32 %v4209_v17, %v4208_v54  ;;  %v4213_v24 = vor.u32 %v4212_v52, %v4211_v10  ;;  %v4217_v39 = vshll.u32 %v5553_v16, %v4202_v2 }
 0x4cb   : > { %v3940_v18 = vsub.s32 %v3936_v22, %v3939_v58  ;;  %v4216_v6 = vor.u32 %v4215_v30, %v4214_v28  ;;  %v4218_v40 = vshrl.u32 %v5554_v23, %v4203_v37  ;;  %v4236_v19 = vshll.u32 %v4196_v32, 8 }
 0x4cc   : > { %v8550_v61 = vadd.f32 %v5890_v12, %v926_v34  ;;  %v4204_v48 = vshrl.u32 %v5549_v53, %v4203_v37  ;;  %vm4220_vm12 = vcmp.lt.s32.totalorder %v4201_v56, 1  ;;  %vm4223_vm13 = vcmp.lt.s32.totalorder %v4201_v56, 4 }
 0x4cd   : > { %v3942_v8 = vsub.s32 0, %v3940_v18  ;;  %v4219_v29 = vor.u32 %v4218_v40, %v4217_v39  ;;  %v4064_v47 = vxor.u32 2147483648, %v4063_v9  ;;  %v4225_v50 = vsel %vm4223_vm13, %v4213_v24, 2102212464 }
 0x4ce   : > { %v4228_v4 = vsel %vm4220_vm12, %v4207_v3, %v4210_v1  ;;  %v4229_v0 = vsel %vm4223_vm13, %v4216_v6, 920167782  ;;  %vm4221_vm14 = vcmp.lt.s32.totalorder %v4201_v56, 2  ;;  %vm4222_vm15 = vcmp.lt.s32.totalorder %v4201_v56, 3 }
 0x4cf   : > { %v4748_v44 = vmin.u32 %v3942_v8, %v3940_v18  ;;  %v4224_v20 = vsel %vm4220_vm12, %v4204_v48, %v4207_v3  ;;  %v4226_v49 = vsel %vm4222_vm15, %v4210_v1, %v4225_v50  ;;  %v4230_v22 = vsel %vm4222_vm15, %v4213_v24, %v4229_v0 }
 0x4d0   : > { %v4232_v13 = vsel %vm4220_vm12, %v4210_v1, %v4213_v24  ;;  %v4233_v38 = vsel %vm4223_vm13, %v4219_v29, 1326507024  ;;  %vm3982_vm0 = vcmp.lt.s32.totalorder %v8316_v25, 0  ;;  %v4231_v63 = vsel %vm4221_vm14, %v4228_v4, %v4230_v22 }
 0x4d1   : > { %v3944_v36 = vclz %v4748_v44  ;;  %v4234_v2 = vsel %vm4222_vm15, %v4216_v6, %v4233_v38  ;;  %v4065_v41 = vsel %vm3982_vm0, %v4064_v47, %v4063_v9  ;;  %v4227_v35 = vsel %vm4221_vm14, %v4224_v20, %v4226_v49 }
 0x4d2   : > { %v4235_v59 = vsel %vm4221_vm14, %v4232_v13, %v4234_v2  ;;  %v8556_v57 = vmul.u32.u64.low %v4236_v19, %v4231_v63  ;;  %v8557_v21 = vmul.u32.u64.high %v4236_v19, %v4231_v63, %v8556_v57  ;;  %vm8565_vm2 = vcmp.le.f32.partialorder %v3980_v7, 0.7853982 }
 0x4d3   : > { %v4749_v12 = vadd.s32 4294967294, %v3944_v36  ;;  %v8560_v37 = vmul.u32.u64.low %v4236_v19, %v4235_v59  ;;  %v8561_v45 = vmul.u32.u64.high %v4236_v19, %v4235_v59, %v8560_v37  ;;  %v4066_v34 = vsub.s32 4, %v8462_v60 }
 0x4d4   : > { %v4087_v43 = vand.u32 2139095040, %v8550_v61  ;;  %v4068_v17 = vsel %vm8565_vm2, %v8316_v25, %v4065_v41  ;;  %v3932_v52 = vadd.s32 %v8501_v51, %v8499_v15  ;;  %v4243_v11 = vmul.u32 %v4236_v19, %v4227_v35 }
 0x4d5   : > { %vm4750_vm1 = vcmp.lt.s32.totalorder %v4749_v12, 0  ;;  %v4246_v7 = vadd.s32 1, %v8557_v21  ;;  %vm4245_vm3 = vc.u32 %v8561_v45, %v8556_v57  ;;  %5300 = vcosq.f32 %v4068_v17 }
 0x4d6   : > { %v3947_v32 = vsel %vm4750_vm1, 0, %v4749_v12  ;;  %v4088_v54 = vshrl.u32 %v4087_v43, 23  ;;  %v4084_v9 = vand.u32 2147483647, %v8550_v61  ;;  %v4067_v15 = vsel %vm3982_vm0, %v4066_v34, %v8462_v60 }
 0x4d7   : > { %v3948_v26 = vsub.s32 32, %v3947_v32  ;;  %v3952_v58 = vsub.s32 4294967266, %v3947_v32  ;;  %v3949_v56 = vshll.u32 %v3940_v18, %v3947_v32  ;;  %v4247_v30 = vsel %vm4245_vm3, %v4246_v7, %v8557_v21 }
 0x4d8   : > { %v4755_v3 = vadd.s32 4294967169, %v4088_v54  ;;  %v4248_v24 = vadd.s32 %v4247_v30, %v4243_v11  ;;  %v3962_v18 = vsub.s32 4, %v8533_v42  ;;  %vm3878_vm4 = vcmp.lt.s32.totalorder %v8392_v46, 0 }
 0x4d9   : > { %v3950_v10 = vshrl.u32 %v3932_v52, %v3948_v26  ;;  %v3953_v28 = vadd.s32 127, %v3952_v58  ;;  %v4069_v8 = vsel %vm8565_vm2, 0, %v4067_v15  ;;  %5302 = vsinq.f32 %v4068_v17 }
 0x4da   : > { %v4094_v6 = vadd.s32 1, %v4755_v3  ;;  %v4249_v40 = vadd.s32 536870912, %v4248_v24  ;;  %v4091_v29 = vand.u32 8388607, %v4084_v9  ;;  %v3963_v47 = vsel %vm3878_vm4, %v3962_v18, %v8533_v42 }
 0x4db   : > { %v3951_v51 = vor.u32 %v3950_v10, %v3949_v56  ;;  %v3954_v1 = vshll.u32 %v3953_v28, 23  ;;  %v4073_v36 = vadd.s32 3, %v4069_v8  ;;  %vm8598_vm6 = vcmp.le.f32.partialorder %v3876_v33, 0.7853982 }
 0x4dc   : > { %vm4095_vm5 = vcmp.gt.s32.totalorder %v4094_v6, 0  ;;  %v8590_v44 = vshrl.u32 %v4249_v40, 30  ;;  %v3965_v13 = vsel %vm8598_vm6, 0, %v3963_v47  ;;  %v4092_v12 = vor.u32 8388608, %v4091_v29 }
 0x4dd   : > { %v3955_v39 = vor.u32 4788187, %v3954_v1  ;;  %v3958_v60 = vcvt.s32.f32 %v3951_v51  ;;  %v4096_v48 = vsel %vm4095_vm5, %v4094_v6, 0  ;;  %v4074_v11 = vand.u32 3, %v4073_v36 }
 0x4de   : > { %v4098_v50 = vand.u32 31, %v4096_v48  ;;  %v4251_v0 = vshll.u32 %v8590_v44, 30  ;;  %v4097_v27 = vshrl.u32 %v4096_v48, 5  ;;  %v3969_v7 = vadd.s32 3, %v3965_v13 }
 0x4df   : > { %v3956_v19 = vand.u32 2147483647, %v3955_v39  ;;  %v4132_v56 = vshll.u32 %v4092_v12, 8  ;;  %vm4076_vm12 = vcmp.eq.s32.totalorder %v4074_v11, 0  ;;  %vm4079_vm13 = vcmp.eq.s32.totalorder %v4074_v11, 2 }
 0x4e0   : > { %v4099_v49 = vsub.s32 32, %v4098_v50  ;;  %v8604_v38 = vsub.s32 %v4248_v24, %v4251_v0  ;;  %v4101_v42 = vshll.u32 %v5549_v53, %v4098_v50  ;;  %v4104_v2 = vshll.u32 %v5550_v55, %v4098_v50 }
 0x4e1   : > { %v3959_v4 = vmul.f32 %v3958_v60, %v3956_v19  ;;  %v4107_v21 = vshll.u32 %v5551_v5, %v4098_v50  ;;  %v4110_v52 = vshll.u32 %v5552_v14, %v4098_v50  ;;  %vm4116_vm7 = vcmp.lt.s32.totalorder %v4097_v27, 1 }
 0x4e2   : > { %v4102_v63 = vshrl.u32 %v5550_v55, %v4099_v49  ;;  %v4105_v41 = vshrl.u32 %v5551_v5, %v4099_v49  ;;  %v4254_v59 = vsub.s32 0, %v8604_v38  ;;  %v4108_v35 = vshrl.u32 %v5552_v14, %v4099_v49  ;;  %v5301_v43 = vpop.eup %5300 }
 0x4e3   : > { %v3960_v22 = vxor.u32 2147483648, %v3959_v4  ;;  %v4111_v26 = vshrl.u32 %v5553_v16, %v4099_v49  ;;  %v4113_v5 = vshll.u32 %v5553_v16, %v4098_v50  ;;  %v4114_v58 = vshrl.u32 %v5554_v23, %v4099_v49 }
 0x4e4   : > { %v4103_v34 = vor.u32 %v4102_v63, %v4101_v42  ;;  %v4106_v32 = vor.u32 %v4105_v41, %v4104_v2  ;;  %v4760_v55 = vmin.u32 %v4254_v59, %v8604_v38  ;;  %v4109_v17 = vor.u32 %v4108_v35, %v4107_v21 }
 0x4e5   : > { %v3961_v33 = vsel %vm3878_vm4, %v3960_v22, %v3959_v4  ;;  %v4080_v10 = vxor.u32 2147483648, %v5301_v43  ;;  %v4100_v28 = vshrl.u32 %v5549_v53, %v4099_v49  ;;  %v4112_v30 = vor.u32 %v4111_v26, %v4110_v52 }
 0x4e6   : > { %v3964_v37 = vsel %vm8598_vm6, %v8392_v46, %v3961_v33  ;;  %v4256_v54 = vclz %v4760_v55  ;;  %v4115_v3 = vor.u32 %v4114_v58, %v4113_v5  ;;  %v5303_v15 = vpop.eup %5302  ;;  %vm4118_vm8 = vcmp.lt.s32.totalorder %v4097_v27, 3 }
 0x4e7   : > { %5304 = vcosq.f32 %v3964_v37  ;;  %vm4119_vm9 = vcmp.lt.s32.totalorder %v4097_v27, 4  ;;  %v4124_v1 = vsel %vm4116_vm7, %v4103_v34, %v4106_v32  ;;  %v4128_v23 = vsel %vm4116_vm7, %v4106_v32, %v4109_v17 }
 0x4e8   : > { %5306 = vsinq.f32 %v3964_v37  ;;  %v4761_v51 = vadd.s32 4294967294, %v4256_v54  ;;  %v4121_v14 = vsel %vm4119_vm9, %v4109_v17, 2102212464  ;;  %v4125_v16 = vsel %vm4119_vm9, %v4112_v30, 920167782 }
 0x4e9   : > { %vm4117_vm11 = vcmp.lt.s32.totalorder %v4097_v27, 2  ;;  %v4126_v24 = vsel %vm4118_vm8, %v4109_v17, %v4125_v16  ;;  %v4129_v18 = vsel %vm4119_vm9, %v4115_v3, 1326507024  ;;  %v4077_v6 = vxor.u32 2147483648, %v5303_v15 }
 0x4ea   : > { %vm4762_vm10 = vcmp.lt.s32.totalorder %v4761_v51, 0  ;;  %v4127_v39 = vsel %vm4117_vm11, %v4124_v1, %v4126_v24  ;;  %v4130_v40 = vsel %vm4118_vm8, %v4112_v30, %v4129_v18  ;;  %v4120_v29 = vsel %vm4116_vm7, %v4100_v28, %v4103_v34 }
 0x4eb   : > { %v4259_v53 = vsel %vm4762_vm10, 0, %v4761_v51  ;;  %v4122_v19 = vsel %vm4118_vm8, %v4106_v32, %v4121_v14  ;;  %v4131_v60 = vsel %vm4117_vm11, %v4128_v23, %v4130_v40  ;;  %v4078_v0 = vsel %vm4076_vm12, %v5301_v43, %v4077_v6 }
 0x4ec   : > { %v4264_v8 = vsub.s32 4294967266, %v4259_v53  ;;  %v8632_v48 = vmul.u32.u64.low %v4132_v56, %v4131_v60  ;;  %v8633_v47 = vmul.u32.u64.high %v4132_v56, %v4131_v60, %v8632_v48  ;;  %v4081_v36 = vsel %vm4079_vm13, %v4080_v10, %v5303_v15 }
 0x4ed   : > { %v8635_v50 = vmul.u32.u64.low %v4132_v56, %v4127_v39  ;;  %v8636_v4 = vmul.u32.u64.high %v4132_v56, %v4127_v39, %v8635_v50  ;;  %v3970_v20 = vand.u32 3, %v3969_v7  ;;  %v4123_v49 = vsel %vm4117_vm11, %v4120_v29, %v4122_v19 }
 0x4ee   : > { %v4265_v22 = vadd.s32 127, %v4264_v8  ;;  %vm4072_vm14 = vweird.f32 %v8316_v25  ;;  %vm4075_vm15 = vcmp.lt.s32.totalorder %v4074_v11, 2  ;;  %v4260_v41 = vsub.s32 32, %v4259_v53 }
 0x4ef   : > { %vm4141_vm0 = vc.u32 %v8633_v47, %v8635_v50  ;;  %v4142_v12 = vadd.s32 1, %v8636_v4  ;;  %v4082_v63 = vsel %vm4075_vm15, %v4078_v0, %v4081_v36  ;;  %v4139_v33 = vmul.u32 %v4132_v56, %v4123_v49 }
 0x4f0   : > { %vm3972_vm1 = vcmp.eq.s32.totalorder %v3970_v20, 0  ;;  %vm3975_vm2 = vcmp.eq.s32.totalorder %v3970_v20, 2  ;;  %v4244_v37 = vadd.s32 %v8556_v57, %v8561_v45  ;;  %v4266_v27 = vshll.u32 %v4265_v22, 23 }
 0x4f1   : > { %v4143_v21 = vsel %vm4141_vm0, %v4142_v12, %v8636_v4  ;;  %v4083_v32 = vsel %vm4072_vm14, nan, %v4082_v63  ;;  %vm3971_vm3 = vcmp.lt.s32.totalorder %v3970_v20, 2  ;;  %vm3968_vm4 = vweird.f32 %v8392_v46 }
 0x4f2   : > { %v4144_v34 = vadd.s32 %v4143_v21, %v4139_v33  ;;  %v4262_v17 = vshrl.u32 %v4244_v37, %v4260_v41  ;;  %v4261_v58 = vshll.u32 %v8604_v38, %v4259_v53  ;;  %v4267_v11 = vor.u32 4788187, %v4266_v27 }
 0x4f3   : > { %vm4190_vm6 = vcmp.lt.s32.totalorder %v8465_v62, 0  ;;  %v4140_v14 = vadd.s32 %v8635_v50, %v8633_v47  ;;  %vm8656_vm7 = vcmp.le.f32.partialorder %v4188_v31, 0.7853982  ;;  %v4274_v29 = vsub.s32 4, %v8590_v44 }
 0x4f4   : > { %v5305_v13 = vpop.eup %5304  ;;  %v4145_v52 = vadd.s32 536870912, %v4144_v34  ;;  %v4263_v57 = vor.u32 %v4262_v17, %v4261_v58  ;;  %v4268_v54 = vand.u32 2147483647, %v4267_v11  ;;  %vm4086_vm8 = vcmp.lt.s32.totalorder %v8550_v61, 0 }
 0x4f5   : > { %v5307_v42 = vpop.eup %5306  ;;  %v3976_v2 = vxor.u32 2147483648, %v5305_v13  ;;  %v4275_v48 = vsel %vm4190_vm6, %v4274_v29, %v8590_v44  ;;  %vm4085_vm9 = vcmp.le.f32.partialorder %v4084_v9, 0.7853982  ;;  %vm4280_vm14 = vweird.f32 %v8465_v62 }
 0x4f6   : > { %v3973_v59 = vxor.u32 2147483648, %v5307_v42  ;;  %v4146_v7 = vshrl.u32 %v4145_v52, 30  ;;  %v4270_v25 = vcvt.s32.f32 %v4263_v57  ;;  %v4277_v0 = vsel %vm8656_vm7, 0, %v4275_v48 }
 0x4f7   : > { %v3977_v35 = vsel %vm3975_vm2, %v3976_v2, %v5307_v42  ;;  %v4281_v49 = vadd.s32 3, %v4277_v0 }
 0x4f8   : > { %v3974_v43 = vsel %vm3972_vm1, %v5305_v13, %v3973_v59  ;;  %v4147_v45 = vshll.u32 %v4146_v7, 30  ;;  %v4271_v28 = vmul.f32 %v4270_v25, %v4268_v54  ;;  %v4170_v50 = vsub.s32 4, %v4146_v7 }
 0x4f9   : > { %v3978_v55 = vsel %vm3971_vm3, %v3974_v43, %v3977_v35  ;;  %v4282_v12 = vand.u32 3, %v4281_v49  ;;  %vm4176_vm1 = vweird.f32 %v8550_v61 }
 0x4fa   : > { %v3979_v26 = vsel %vm3968_vm4, nan, %v3978_v55  ;;  %v4148_v56 = vsub.s32 %v4144_v34, %v4147_v45  ;;  %v4272_v46 = vxor.u32 2147483648, %v4271_v28  ;;  %v4171_v20 = vsel %vm4086_vm8, %v4170_v50, %v4146_v7 }
 0x4fb   : > { %v4908_v5 = vpack.c.bf16 %v4083_v32, %v3979_v26  ;;  %v4173_v44 = vsel %vm4085_vm9, 0, %v4171_v20  ;;  %vm4284_vm10 = vcmp.eq.s32.totalorder %v4282_v12, 0  ;;  %vm4287_vm11 = vcmp.eq.s32.totalorder %v4282_v12, 2 }
 0x4fc   : > { %v4150_v10 = vsub.s32 0, %v4148_v56  ;;  %v4273_v38 = vsel %vm4190_vm6, %v4272_v46, %v4271_v28  ;;  %v4177_v2 = vadd.s32 3, %v4173_v44  ;;  %vm4283_vm12 = vcmp.lt.s32.totalorder %v4282_v12, 2 }
 0x4fd   : > { %4928 = vst [vmem:[%s6238_s7 + $0x70] sm:$0xff] %v4908_v5   ;;  %v4276_v53 = vsel %vm8656_vm7, %v8465_v62, %v4273_v38 }
 0x4fe   : > { %v4756_v30 = vmin.u32 %v4150_v10, %v4148_v56  ;;  %5308 = vcosq.f32 %v4276_v53  ;;  %v4178_v33 = vand.u32 3, %v4177_v2 }
 0x4ff   : > { %5310 = vsinq.f32 %v4276_v53 }
 0x500   : > { %v4152_v3 = vclz %v4756_v30  ;;  %vm4183_vm13 = vcmp.eq.s32.totalorder %v4178_v33, 2  ;;  %vm4180_vm15 = vcmp.eq.s32.totalorder %v4178_v33, 0  ;;  %vm4179_vm0 = vcmp.lt.s32.totalorder %v4178_v33, 2 }
 0x502   : > { %v4757_v15 = vadd.s32 4294967294, %v4152_v3 }
 0x504   : > { %vm4758_vm5 = vcmp.lt.s32.totalorder %v4757_v15, 0 }
 0x505   : > { %v4155_v51 = vsel %vm4758_vm5, 0, %v4757_v15 }
 0x506   : > { %v4156_v1 = vsub.s32 32, %v4155_v51  ;;  %v4160_v16 = vsub.s32 4294967266, %v4155_v51  ;;  %v4157_v24 = vshll.u32 %v4148_v56, %v4155_v51 }
 0x508   : > { %v4158_v18 = vshrl.u32 %v4140_v14, %v4156_v1  ;;  %v4161_v6 = vadd.s32 127, %v4160_v16 }
 0x50a   : > { %v4159_v39 = vor.u32 %v4158_v18, %v4157_v24  ;;  %v4162_v40 = vshll.u32 %v4161_v6, 23 }
 0x50b   : > { %v5309_v22 = vpop.eup %5308 }
 0x50c   : > { %v4163_v8 = vor.u32 4788187, %v4162_v40  ;;  %v4166_v60 = vcvt.s32.f32 %v4159_v39  ;;  %v5311_v13 = vpop.eup %5310  ;;  %v4288_v63 = vxor.u32 2147483648, %v5309_v22 }
 0x50d   : > { %v4285_v42 = vxor.u32 2147483648, %v5311_v13 }
 0x50e   : > { %v4164_v19 = vand.u32 2147483647, %v4163_v8  ;;  %v4289_v41 = vsel %vm4287_vm11, %v4288_v63, %v5311_v13 }
 0x50f   : > { %v4286_v9 = vsel %vm4284_vm10, %v5309_v22, %v4285_v42 }
 0x510   : > { %v4167_v31 = vmul.f32 %v4166_v60, %v4164_v19  ;;  %v4290_v35 = vsel %vm4283_vm12, %v4286_v9, %v4289_v41 }
 0x511   : > { %v4291_v32 = vsel %vm4280_vm14, nan, %v4290_v35 }
 0x512   : > { %v4168_v47 = vxor.u32 2147483648, %v4167_v31 }
 0x514   : > { %v4169_v4 = vsel %vm4086_vm8, %v4168_v47, %v4167_v31 }
 0x515   : > { %v4172_v36 = vsel %vm4085_vm9, %v8550_v61, %v4169_v4 }
 0x516   : > { %5312 = vcosq.f32 %v4172_v36 }
 0x517   : > { %5314 = vsinq.f32 %v4172_v36 }
 0x523   : > { %v5313_v59 = vpop.eup %5312 }
 0x524   : > { %v5315_v21 = vpop.eup %5314  ;;  %v4184_v37 = vxor.u32 2147483648, %v5313_v59 }
 0x525   : > { %v4181_v27 = vxor.u32 2147483648, %v5315_v21 }
 0x526   : > { %v4185_v34 = vsel %vm4183_vm13, %v4184_v37, %v5315_v21 }
 0x527   : > { %v4182_v43 = vsel %vm4180_vm15, %v5313_v59, %v4181_v27 }
 0x528   : > { %v4186_v55 = vsel %vm4179_vm0, %v4182_v43, %v4185_v34 }
 0x529   : > { %v4187_v17 = vsel %vm4176_vm1, nan, %v4186_v55 }
 0x52a   : > { %v4913_v62 = vpack.c.bf16 %v4291_v32, %v4187_v17 }
 0x52c   : > { %4929 = vst [vmem:[%s6238_s7 + $0x78] sm:$0xff] %v4913_v62  }
 0x52d   : > { %5463 = shalt.err (!%p5460_p12)
}
 0x52e   : > { %s5464_s8 = scalar_lea.hbm %s8680_s4, 2048  ;;  %s5468_s27 = scalar_lea.hbm %s8736_s5, 4096 }
 0x52f   : > { %p5465_p10 = scmp.ne.s32.totalorder %s8680_s4, %s5464_s8  ;;  %p5469_p13 = scmp.lt.s32.totalorder %s8680_s4, %s8736_s5 }
 0x530   : > { %p5470_p9 = scmp.lt.s32.totalorder %s5468_s27, %s5464_s8 }
 0x531   : > { %p5466_p0 = pnand %p5465_p10, %p8834_p8 }
 0x532   : > { %p5471_p5 = por %p5470_p9, %p5469_p13 }
 0x533   : > { %p5467_p11 = pneg %p5466_p0 }
 0x535   : > { %p5472_p4 = pnand %p5471_p5, %p5467_p11 }
 0x537   : > { %5475 = shalt.err (!%p5472_p4)
}
 0x538   : > { %s5556_s25 = smov 64   ;;  %s5557_s24 = smov 4  }
 0x539   : > { %5090 = dma.vmem_to_hbm [thread:$0]  (%p8834_p8), %s8682_s16, 2048, %s8680_s4, %s4453_s21, %s5556_s25, %s5556_s25, %s5557_s24  }
 0x53a PF: > { %s8835_s26 = sld [smem:[#allocation16_spill]]  ;;  %s4484_s7 = sand.u32 1, %s5518_s18  }
 0x53b   : > { %p8837_p6 = scmp.ge.s32.totalorder %s5538_s23, 2  ;;  %s4485_s17 = scalar_lea.sflag [#allocation4], %s4484_s7 }
 0x540   : > { %p8836_p2 = scmp.ne.s32.totalorder %s8835_s26, 0 }
 0x542   : > { %p5110_p7 = pnand %p8837_p6, %p8836_p2 }
 0x544   : > { %p5111_p1 = pneg %p5110_p7 }
 0x546   : > { %5513 = dma.done.wait (%p5111_p1), %s4485_s17, 2048  }
 0x547   : > { %5515 = vsyncadd (%p5111_p1), %s4485_s17, 4294965248  ;;  %s23_s23 = sadd.s32 1, %s5538_s23   ;;  %s8838_s15 = sld [smem:[#allocation17_spill]] }
 0x548   : > { %p20_p3 = scmp.ge.s32.totalorder %s23_s23, 4   ;;  %s8839_s18 = smov %s5522_s19 }
 0x549   : > { %s8840_s19 = smov %s5526_s20  ;;  %s8841_s20 = smov %s5687_s29 }
 0x54a   : > { %s8842_s21 = smov %s5534_s22  ;;  %22 = sbr.rel (!%p20_p3) target bundleno = 12 (0xc), region = 110 }
 0x54d   : > { %s8843_s22 = smov %s8838_s15 }
 0x54f   :  { %4490 = vsyncpa [#allocation3], 1 }
 0x550   :  { %4492 = vsyncpa [#allocation3 + $0x1], 1 }
 0x551   :  { %4493 = vsyncpa [#allocation6], 1 }
 0x552   :  { %4494 = vsyncpa [#allocation9], 1 }
 0x553   :  { %4496 = vsyncpa [#allocation9 + $0x1], 1 }
 0x554   :  { %4497 = vsyncpa [#allocation4], 1 }
 0x555   :  { %4499 = vsyncpa [#allocation4 + $0x1], 1 }

</bundles_post_ra>
